<compile_context>
chip_gen: v7x
topology: tpu7x:2x2x1
jax: 0.10.0
libtpu: 0.0.40
codegen_flags: <defaults>
</compile_context>

<pallas_src>
import math
import functools

import jax
import jax.numpy as jnp
from jax.experimental import pallas as pl
from jax.experimental.pallas import tpu as pltpu


# ----------------------------------------------------------------------------- math helpers

def _mish(x):
    # mish(x) = x * tanh(softplus(x)) rewritten with a single exp (EUP relief):
    #   tanh(log(1+e)) = e*(e+2) / (e*(e+2)+2),  e = exp(x)
    # clamp so exp never overflows; for x > 15, mish(x) == x to f32 precision.
    e = jnp.exp(jnp.minimum(x, 15.0))
    n = e * (e + 2.0)
    return jnp.where(x > 15.0, x, x * n / (n + 2.0))


def diffusion_embedding(t, dim):
    """Sinusoidal diffusion-step embedding (matches DiffusionEmbedding)."""
    half = dim // 2
    scale = math.log(10000.0) / (half - 1)
    freqs = jnp.exp(jnp.arange(half, dtype=jnp.float32) * -scale)
    ang = t.astype(jnp.float32)[:, None] * freqs[None, :]
    return jnp.concatenate([jnp.sin(ang), jnp.cos(ang)], axis=-1)          # [B, dim]


# ----------------------------------------------------------------------------- fused kernel

def fused_denoiser_kernel(
    f0_ref,        # (1, T, 1)
    cond_ref,      # (1, T, Ce)
    mask_ref,      # (1, T, 1)
    diff_ref,      # (1, 1, 1, C)  diffusion-step projection for (b, layer)
    spk_ref,       # (1, 1, 1, C)  speaker projection for (b, layer)
    w_in_ref, b_in_ref,            # (1, C), (1, C)
    w_cond_ref, b_cond_ref,        # (1, Ce, C), (1, 1, C)
    w_conv_ref, b_conv_ref,        # (1, 3C, 2C), (1, 1, 2C)
    w_out_ref, b_out_ref,          # (1, C, 2C), (1, 1, 2C)
    w_skip_ref, b_skip_ref,        # (C, C), (1, C)
    w_outp_ref, b_outp_ref,        # (C, out_ch), (1, out_ch)
    out_ref,                       # (1, T, out_ch)
    x_sc, skip_sc,                 # VMEM scratch (T, C) each
    *, f0_max, n_layers):
    layer = pl.program_id(1)
    T, C = x_sc.shape

    # ---- prologue (layer 0 only): norm_f0 '[0,1]' + input_projection(1->C, k=1) + Mish
    @pl.when(layer == 0)
    def _prologue():
        f0 = f0_ref[0] * (1.0 / f0_max)                                    # [T, 1]
        x_sc[...] = _mish(f0 * w_in_ref[...] + b_in_ref[...])              # [T, C]
        skip_sc[...] = jnp.zeros_like(skip_sc)

    mask = mask_ref[0]                                                     # [T, 1]
    x = x_sc[...] * mask                                                   # f0 * f0_mask          [T, C]
    cond = cond_ref[0] * mask                                              # conditioner * f0_mask [T, Ce]

    diff = diff_ref[0, 0]                                                  # [1, C]
    spk = spk_ref[0, 0]                                                    # [1, C]

    cond_p = jnp.dot(cond, w_cond_ref[0],
                     preferred_element_type=jnp.float32) + b_cond_ref[0]   # [T, C]

    residual = x + diff                                                    # [T, C]
    h = residual + cond_p + spk                                            # conv input [T, C]

    # k=3, padding=1 "same" conv as ONE [T, 3C] @ [3C, 2C] matmul.
    row = jax.lax.broadcasted_iota(jnp.int32, (T, 1), 0)
    h_prev = jnp.where(row == 0, 0.0, pltpu.roll(h, shift=1, axis=0))          # h[t-1]
    h_next = jnp.where(row == T - 1, 0.0, pltpu.roll(h, shift=T - 1, axis=0))  # h[t+1]
    hcat = jnp.concatenate([h_prev, h, h_next], axis=-1)                   # [T, 3C]

    y = jnp.dot(hcat, w_conv_ref[0],
                preferred_element_type=jnp.float32) + b_conv_ref[0]        # [T, 2C]

    gate, filt = y[:, :C], y[:, C:]                                        # torch.chunk(y, 2, dim=channel)
    z = jax.nn.sigmoid(gate) * jnp.tanh(filt)

    o = jnp.dot(z, w_out_ref[0],
                preferred_element_type=jnp.float32) + b_out_ref[0]         # [T, 2C]

    x_sc[...] = (o[:, :C] + residual) * (1.0 / math.sqrt(2.0))             # next-layer x
    skip_sc[...] = skip_sc[...] + o[:, C:]                                 # running skip sum

    # ---- epilogue (last layer only): skip sum / sqrt(L) -> skip_proj -> Mish -> out_proj -> *mask
    @pl.when(layer == n_layers - 1)
    def _epilogue():
        acc = skip_sc[...] * (1.0 / math.sqrt(n_layers))
        hh = _mish(jnp.dot(acc, w_skip_ref[...],
                           preferred_element_type=jnp.float32) + b_skip_ref[...])
        oo = jnp.dot(hh, w_outp_ref[...],
                     preferred_element_type=jnp.float32) + b_outp_ref[...]  # [T, out_ch]
        out_ref[0] = oo * mask


# ----------------------------------------------------------------------------- pallas_call wrapper

def fused_denoiser(f0_ntc, cond_ntc, mask, diff_all, spk_all, params, f0_max):
    B, T, _ = f0_ntc.shape
    Ce = cond_ntc.shape[-1]
    L, _, C = params["w_cond"].shape
    out_ch = params["w_outp"].shape[-1]

    def fixed(shape):
        n = len(shape)
        return pl.BlockSpec(shape, lambda b, l, n=n: (0,) * n)

    grid_spec = pltpu.PrefetchScalarGridSpec(
        num_scalar_prefetch=0,
        grid=(B, L),                                   # layer axis trailing ("arbitrary")
        in_specs=[
            pl.BlockSpec((1, T, 1), lambda b, l: (b, 0, 0)),            # f0
            pl.BlockSpec((1, T, Ce), lambda b, l: (b, 0, 0)),           # conditioner
            pl.BlockSpec((1, T, 1), lambda b, l: (b, 0, 0)),            # f0 mask
            pl.BlockSpec((1, 1, 1, C), lambda b, l: (b, l, 0, 0)),      # diff proj [B,L,1,C]
            pl.BlockSpec((1, 1, 1, C), lambda b, l: (b, l, 0, 0)),      # spk  proj [B,L,1,C]
            fixed((1, C)), fixed((1, C)),                               # w_in, b_in
            pl.BlockSpec((1, Ce, C), lambda b, l: (l, 0, 0)),           # w_cond
            pl.BlockSpec((1, 1, C), lambda b, l: (l, 0, 0)),            # b_cond
            pl.BlockSpec((1, 3 * C, 2 * C), lambda b, l: (l, 0, 0)),    # w_conv (fused 3-tap)
            pl.BlockSpec((1, 1, 2 * C), lambda b, l: (l, 0, 0)),        # b_conv
            pl.BlockSpec((1, C, 2 * C), lambda b, l: (l, 0, 0)),        # w_out
            pl.BlockSpec((1, 1, 2 * C), lambda b, l: (l, 0, 0)),        # b_out
            fixed((C, C)), fixed((1, C)),                               # w_skip, b_skip
            fixed((C, out_ch)), fixed((1, out_ch)),                     # w_outp, b_outp
        ],
        out_specs=pl.BlockSpec((1, T, out_ch), lambda b, l: (b, 0, 0)),
        scratch_shapes=[pltpu.VMEM((T, C), jnp.float32),                # resident x
                        pltpu.VMEM((T, C), jnp.float32)],               # skip accumulator
    )
    return pl.pallas_call(
        functools.partial(fused_denoiser_kernel, f0_max=f0_max, n_layers=L),
        out_shape=jax.ShapeDtypeStruct((B, T, out_ch), jnp.float32),
        grid_spec=grid_spec,
        compiler_params=pltpu.CompilerParams(
            dimension_semantics=("parallel", "arbitrary")),
    )(f0_ntc, cond_ntc, mask, diff_all, spk_all,
      params["w_in"], params["b_in"],
      params["w_cond"], params["b_cond"],
      params["w_conv"], params["b_conv"],
      params["w_out"], params["b_out"],
      params["w_skip"], params["b_skip"],
      params["w_outp"], params["b_outp"])


# ----------------------------------------------------------------------------- model glue

def denoiser_forward(params, f0_nct, f0_len, conditioner_ntc, timesteps, g, f0_max):
    """Denoiser.forward.  f0_nct: [B, 1, T] (PyTorch NCW); conditioner_ntc: [B, T, d_enc]
    pre-aligned & channels-last (avoids a per-call full-array HBM transpose)."""
    B, _, T = f0_nct.shape
    C = params["w_skip"].shape[0]

    # f0 mask (commons.sequence_mask) -> [B, T, 1]
    mask = (jnp.arange(T)[None, :] < f0_len[:, None]).astype(jnp.float32)[:, :, None]
    f0_ntc = jnp.transpose(f0_nct, (0, 2, 1))                              # [B, T, 1] (tiny)

    # tiny per-step work stays in plain XLA (no extra pallas_call / HBM round-trips):
    spk = jnp.take(params["emb_g"], g, axis=0)                             # nn.Embedding  [B, C]
    demb = diffusion_embedding(timesteps.reshape(-1), C)                   # [B, C]
    tstep = _mish(demb @ params["mlp_w1"]) @ params["mlp_w2"]              # MLP           [B, C]

    # hoisted M=1 projections, batched over all layers in one einsum each:
    diff_all = jnp.einsum("bc,lcd->bld", tstep, params["w_diff"])[:, :, None, :]  # [B,L,1,C]
    spk_all = jnp.einsum("bc,lcd->bld", spk, params["w_spk"])[:, :, None, :]      # [B,L,1,C]

    out_ntc = fused_denoiser(f0_ntc, conditioner_ntc, mask, diff_all, spk_all,
                             params, f0_max)                               # [B, T, out_ch]
    return jnp.transpose(out_ntc, (0, 2, 1))                               # NCW [B, out_ch, T]


# ----------------------------------------------------------------------------- deterministic params

def init_params(key, C, out_ch, n_layers, n_speakers, d_enc):
    def nrm(k, shape, scale=0.1):
        return jax.random.normal(k, shape, dtype=jnp.float32) * scale

    keys = iter(jax.random.split(key, 24))
    return dict(
        emb_g=nrm(next(keys), (n_speakers, C), 0.5),
        w_in=nrm(next(keys), (1, C)),
        b_in=jnp.zeros((1, C), jnp.float32),
        mlp_w1=nrm(next(keys), (C, 4 * C)),
        mlp_w2=nrm(next(keys), (4 * C, C)),
        # per-layer weights stacked on a leading L axis:
        w_diff=nrm(next(keys), (n_layers, C, C)),
        w_spk=nrm(next(keys), (n_layers, C, C)),          # gin_channels == d_encoder == C
        w_cond=nrm(next(keys), (n_layers, d_enc, C)),
        b_cond=jnp.zeros((n_layers, 1, C), jnp.float32),
        # k=3 conv stored pre-fused as [L, 3C, 2C]  (rows = [h[t-1]; h[t]; h[t+1]] taps)
        w_conv=nrm(next(keys), (n_layers, 3 * C, 2 * C)),
        b_conv=jnp.zeros((n_layers, 1, 2 * C), jnp.float32),
        w_out=nrm(next(keys), (n_layers, C, 2 * C)),
        b_out=jnp.zeros((n_layers, 1, 2 * C), jnp.float32),
        w_skip=nrm(next(keys), (C, C)),
        b_skip=jnp.zeros((1, C), jnp.float32),
        w_outp=nrm(next(keys), (C, out_ch)),
        b_outp=jnp.zeros((1, out_ch), jnp.float32),
    )


# ----------------------------------------------------------------------------- main

if __name__ == "__main__":
    B, T, C = 2, 64, 128        # batch, f0 length, residual/inner channels (= d_encoder = gin)
    OUT_CH = 1
    N_LAYERS = 3
    N_SPEAKERS = 4
    F0_MAX = 800.0

    key = jax.random.PRNGKey(0)
    kp, k1, k2, k3 = jax.random.split(key, 4)

    params = init_params(kp, C=C, out_ch=OUT_CH, n_layers=N_LAYERS,
                         n_speakers=N_SPEAKERS, d_enc=C)

    f0 = jax.random.uniform(k1, (B, 1, T), dtype=jnp.float32, minval=80.0, maxval=700.0)
    f0_len = jnp.array([T, T - 8], dtype=jnp.int32)
    conditioner = jax.random.normal(k2, (B, T, C), dtype=jnp.float32) * 0.1  # pre-aligned, channels-last
    timesteps = jax.random.uniform(k3, (B,), dtype=jnp.float32, minval=0.0, maxval=10.0)
    g = jnp.array([0, 1], dtype=jnp.int32)                                   # speaker ids

    out = denoiser_forward(params, f0, f0_len, conditioner, timesteps, g, F0_MAX)
    jax.block_until_ready(out)
    assert out.shape == (B, OUT_CH, T)
    assert bool(jnp.all(jnp.isfinite(out)))
    print("KERNEL_OK")
</pallas_src>

<mosaic_0001>
module attributes {stable_mosaic.version = 11 : i64} {
  func.func @fused_denoiser_kernel(%arg0: i32, %arg1: i32, %arg2: memref<1x64x1xf32, #tpu.memory_space<vmem>>, %arg3: memref<1x64x128xf32, #tpu.memory_space<vmem>>, %arg4: memref<1x64x1xf32, #tpu.memory_space<vmem>>, %arg5: memref<1x1x1x128xf32, #tpu.memory_space<vmem>>, %arg6: memref<1x1x1x128xf32, #tpu.memory_space<vmem>>, %arg7: memref<1x128xf32, #tpu.memory_space<vmem>>, %arg8: memref<1x128xf32, #tpu.memory_space<vmem>>, %arg9: memref<1x128x128xf32, #tpu.memory_space<vmem>>, %arg10: memref<1x1x128xf32, #tpu.memory_space<vmem>>, %arg11: memref<1x384x256xf32, #tpu.memory_space<vmem>>, %arg12: memref<1x1x256xf32, #tpu.memory_space<vmem>>, %arg13: memref<1x128x256xf32, #tpu.memory_space<vmem>>, %arg14: memref<1x1x256xf32, #tpu.memory_space<vmem>>, %arg15: memref<128x128xf32, #tpu.memory_space<vmem>>, %arg16: memref<1x128xf32, #tpu.memory_space<vmem>>, %arg17: memref<128x1xf32, #tpu.memory_space<vmem>>, %arg18: memref<1x1xf32, #tpu.memory_space<vmem>>, %arg19: memref<1x64x1xf32, #tpu.memory_space<vmem>>, %arg20: memref<64x128xf32, #tpu.memory_space<vmem>>, %arg21: memref<64x128xf32, #tpu.memory_space<vmem>>) attributes {dimension_semantics = [#tpu.dimension_semantics<parallel>, #tpu.dimension_semantics<arbitrary>], iteration_bounds = array<i64: 2, 3>, scalar_prefetch = 0 : i64, scratch_operands = 2 : i64, tpu.core_type = #tpu.core_type<tc>, window_params = [{transform_indices = @transform_0, window_bounds = array<i64: 1, 64, 1>}, {transform_indices = @transform_1, window_bounds = array<i64: 1, 64, 128>}, {transform_indices = @transform_2, window_bounds = array<i64: 1, 64, 1>}, {transform_indices = @transform_3, window_bounds = array<i64: 1, 1, 1, 128>}, {transform_indices = @transform_4, window_bounds = array<i64: 1, 1, 1, 128>}, {pipeline_mode = #tpu.pipeline_mode<synchronous>, transform_indices = @transform_5, window_bounds = array<i64: 1, 128>}, {pipeline_mode = #tpu.pipeline_mode<synchronous>, transform_indices = @transform_6, window_bounds = array<i64: 1, 128>}, {transform_indices = @transform_7, window_bounds = array<i64: 1, 128, 128>}, {transform_indices = @transform_8, window_bounds = array<i64: 1, 1, 128>}, {transform_indices = @transform_9, window_bounds = array<i64: 1, 384, 256>}, {transform_indices = @transform_10, window_bounds = array<i64: 1, 1, 256>}, {transform_indices = @transform_11, window_bounds = array<i64: 1, 128, 256>}, {transform_indices = @transform_12, window_bounds = array<i64: 1, 1, 256>}, {pipeline_mode = #tpu.pipeline_mode<synchronous>, transform_indices = @transform_13, window_bounds = array<i64: 128, 128>}, {pipeline_mode = #tpu.pipeline_mode<synchronous>, transform_indices = @transform_14, window_bounds = array<i64: 1, 128>}, {pipeline_mode = #tpu.pipeline_mode<synchronous>, transform_indices = @transform_15, window_bounds = array<i64: 128, 1>}, {pipeline_mode = #tpu.pipeline_mode<synchronous>, transform_indices = @transform_16, window_bounds = array<i64: 1, 1>}, {transform_indices = @transform_17, window_bounds = array<i64: 1, 64, 1>}]} {
    %c0_i32 = arith.constant 0 : i32
    %0 = arith.cmpi eq, %arg1, %c0_i32 : i32
    %1 = arith.extui %0 : i1 to i32
    %c0_i32_0 = arith.constant 0 : i32
    %2 = arith.cmpi ne, %1, %c0_i32_0 : i32
    scf.if %2 {
      %c0_49 = arith.constant 0 : index
      %c0_50 = arith.constant 0 : index
      %c0_51 = arith.constant 0 : index
      %79 = vector.load %arg2[%c0_49, %c0_50, %c0_51] : memref<1x64x1xf32, #tpu.memory_space<vmem>>, vector<1x64x1xf32>
      %80 = vector.shape_cast %79 : vector<1x64x1xf32> to vector<64x1xf32>
      %cst_52 = arith.constant 1.250000e-03 : f32
      %81 = vector.broadcast %cst_52 : f32 to vector<64x1xf32>
      %82 = arith.mulf %80, %81 : vector<64x1xf32>
      %c0_53 = arith.constant 0 : index
      %c0_54 = arith.constant 0 : index
      %83 = vector.load %arg7[%c0_53, %c0_54] : memref<1x128xf32, #tpu.memory_space<vmem>>, vector<1x128xf32>
      %84 = vector.broadcast %82 : vector<64x1xf32> to vector<64x128xf32>
      %85 = vector.broadcast %83 : vector<1x128xf32> to vector<64x128xf32>
      %86 = arith.mulf %84, %85 : vector<64x128xf32>
      %c0_55 = arith.constant 0 : index
      %c0_56 = arith.constant 0 : index
      %87 = vector.load %arg8[%c0_55, %c0_56] : memref<1x128xf32, #tpu.memory_space<vmem>>, vector<1x128xf32>
      %88 = vector.broadcast %87 : vector<1x128xf32> to vector<64x128xf32>
      %89 = arith.addf %86, %88 : vector<64x128xf32>
      %cst_57 = arith.constant 1.500000e+01 : f32
      %90 = vector.broadcast %cst_57 : f32 to vector<64x128xf32>
      %91 = arith.minimumf %89, %90 : vector<64x128xf32>
      %92 = math.exp %91 : vector<64x128xf32>
      %cst_58 = arith.constant 2.000000e+00 : f32
      %93 = vector.broadcast %cst_58 : f32 to vector<64x128xf32>
      %94 = arith.addf %92, %93 : vector<64x128xf32>
      %95 = arith.mulf %92, %94 : vector<64x128xf32>
      %cst_59 = arith.constant 1.500000e+01 : f32
      %96 = vector.broadcast %cst_59 : f32 to vector<64x128xf32>
      %97 = arith.cmpf ogt, %89, %96 : vector<64x128xf32>
      %98 = arith.mulf %89, %95 : vector<64x128xf32>
      %cst_60 = arith.constant 2.000000e+00 : f32
      %99 = vector.broadcast %cst_60 : f32 to vector<64x128xf32>
      %100 = arith.addf %95, %99 : vector<64x128xf32>
      %101 = arith.divf %98, %100 : vector<64x128xf32>
      %102 = arith.select %97, %89, %101 : vector<64x128xi1>, vector<64x128xf32>
      %c0_61 = arith.constant 0 : index
      %c0_62 = arith.constant 0 : index
      %103 = vector.load %arg20[%c0_61, %c0_62] : memref<64x128xf32, #tpu.memory_space<vmem>>, vector<64x128xf32>
      tpu.vector_store %arg20[%c0_61, %c0_62], %102 {strides = array<i32>} : memref<64x128xf32, #tpu.memory_space<vmem>>, vector<64x128xf32>,
      %cst_63 = arith.constant 0.000000e+00 : f32
      %104 = vector.broadcast %cst_63 : f32 to vector<64x128xf32>
      %c0_64 = arith.constant 0 : index
      %c0_65 = arith.constant 0 : index
      %105 = vector.load %arg21[%c0_64, %c0_65] : memref<64x128xf32, #tpu.memory_space<vmem>>, vector<64x128xf32>
      tpu.vector_store %arg21[%c0_64, %c0_65], %104 {strides = array<i32>} : memref<64x128xf32, #tpu.memory_space<vmem>>, vector<64x128xf32>,
    } else {
    }
    %c0 = arith.constant 0 : index
    %c0_1 = arith.constant 0 : index
    %c0_2 = arith.constant 0 : index
    %3 = vector.load %arg4[%c0, %c0_1, %c0_2] : memref<1x64x1xf32, #tpu.memory_space<vmem>>, vector<1x64x1xf32>
    %4 = vector.shape_cast %3 : vector<1x64x1xf32> to vector<64x1xf32>
    %c0_3 = arith.constant 0 : index
    %c0_4 = arith.constant 0 : index
    %5 = vector.load %arg20[%c0_3, %c0_4] : memref<64x128xf32, #tpu.memory_space<vmem>>, vector<64x128xf32>
    %6 = vector.broadcast %4 : vector<64x1xf32> to vector<64x128xf32>
    %7 = arith.mulf %5, %6 : vector<64x128xf32>
    %c0_5 = arith.constant 0 : index
    %c0_6 = arith.constant 0 : index
    %c0_7 = arith.constant 0 : index
    %8 = vector.load %arg3[%c0_5, %c0_6, %c0_7] : memref<1x64x128xf32, #tpu.memory_space<vmem>>, vector<1x64x128xf32>
    %9 = vector.shape_cast %8 : vector<1x64x128xf32> to vector<64x128xf32>
    %10 = vector.broadcast %4 : vector<64x1xf32> to vector<64x128xf32>
    %11 = arith.mulf %9, %10 : vector<64x128xf32>
    %c0_8 = arith.constant 0 : index
    %c0_9 = arith.constant 0 : index
    %c0_10 = arith.constant 0 : index
    %c0_11 = arith.constant 0 : index
    %12 = vector.load %arg5[%c0_8, %c0_9, %c0_10, %c0_11] : memref<1x1x1x128xf32, #tpu.memory_space<vmem>>, vector<1x1x1x128xf32>
    %13 = vector.shape_cast %12 : vector<1x1x1x128xf32> to vector<1x128xf32>
    %c0_12 = arith.constant 0 : index
    %c0_13 = arith.constant 0 : index
    %c0_14 = arith.constant 0 : index
    %c0_15 = arith.constant 0 : index
    %14 = vector.load %arg6[%c0_12, %c0_13, %c0_14, %c0_15] : memref<1x1x1x128xf32, #tpu.memory_space<vmem>>, vector<1x1x1x128xf32>
    %15 = vector.shape_cast %14 : vector<1x1x1x128xf32> to vector<1x128xf32>
    %c0_16 = arith.constant 0 : index
    %c0_17 = arith.constant 0 : index
    %c0_18 = arith.constant 0 : index
    %16 = vector.load %arg9[%c0_16, %c0_17, %c0_18] : memref<1x128x128xf32, #tpu.memory_space<vmem>>, vector<1x128x128xf32>
    %17 = vector.shape_cast %16 : vector<1x128x128xf32> to vector<128x128xf32>
    %cst = arith.constant dense<0.000000e+00> : vector<64x128xf32>
    %18 = tpu.matmul %11, %17, %cst {dimension_numbers = #tpu.dot_dimension_numbers<[1], [0], [0], [1], [0, 0, 1, 1], [], []>} : vector<64x128xf32>, vector<128x128xf32>, vector<64x128xf32> -> vector<64x128xf32>
    %c0_19 = arith.constant 0 : index
    %c0_20 = arith.constant 0 : index
    %c0_21 = arith.constant 0 : index
    %19 = vector.load %arg10[%c0_19, %c0_20, %c0_21] : memref<1x1x128xf32, #tpu.memory_space<vmem>>, vector<1x1x128xf32>
    %20 = vector.shape_cast %19 : vector<1x1x128xf32> to vector<1x128xf32>
    %21 = vector.broadcast %20 : vector<1x128xf32> to vector<64x128xf32>
    %22 = arith.addf %18, %21 : vector<64x128xf32>
    %23 = vector.broadcast %13 : vector<1x128xf32> to vector<64x128xf32>
    %24 = arith.addf %7, %23 : vector<64x128xf32>
    %25 = arith.addf %24, %22 : vector<64x128xf32>
    %26 = vector.broadcast %15 : vector<1x128xf32> to vector<64x128xf32>
    %27 = arith.addf %25, %26 : vector<64x128xf32>
    %28 = tpu.iota {dimensions = array<i32: 0>} : vector<64x1xi32>
    %c0_i32_22 = arith.constant 0 : i32
    %29 = vector.broadcast %c0_i32_22 : i32 to vector<64x1xi32>
    %30 = arith.cmpi eq, %28, %29 : vector<64x1xi32>
    %c1_i32 = arith.constant 1 : i32
    %31 = tpu.dynamic_rotate %27 by %c1_i32 dim 0 : vector<64x128xf32>, i32 -> vector<64x128xf32>
    %cst_23 = arith.constant 0.000000e+00 : f32
    %32 = vector.shape_cast %30 : vector<64x1xi1> to vector<64x1xi1>
    %33 = vector.broadcast %32 : vector<64x1xi1> to vector<64x128xi1>
    %34 = vector.broadcast %cst_23 : f32 to vector<64x128xf32>
    %35 = arith.select %33, %34, %31 : vector<64x128xi1>, vector<64x128xf32>
    %c63_i32 = arith.constant 63 : i32
    %36 = vector.broadcast %c63_i32 : i32 to vector<64x1xi32>
    %37 = arith.cmpi eq, %28, %36 : vector<64x1xi32>
    %c63_i32_24 = arith.constant 63 : i32
    %38 = tpu.dynamic_rotate %27 by %c63_i32_24 dim 0 : vector<64x128xf32>, i32 -> vector<64x128xf32>
    %cst_25 = arith.constant 0.000000e+00 : f32
    %39 = vector.shape_cast %37 : vector<64x1xi1> to vector<64x1xi1>
    %40 = vector.broadcast %39 : vector<64x1xi1> to vector<64x128xi1>
    %41 = vector.broadcast %cst_25 : f32 to vector<64x128xf32>
    %42 = arith.select %40, %41, %38 : vector<64x128xi1>, vector<64x128xf32>
    %43 = tpu.concatenate %35, %27, %42 in 1 : vector<64x128xf32>, vector<64x128xf32>, vector<64x128xf32> -> vector<64x384xf32>
    %c0_26 = arith.constant 0 : index
    %c0_27 = arith.constant 0 : index
    %c0_28 = arith.constant 0 : index
    %44 = vector.load %arg11[%c0_26, %c0_27, %c0_28] : memref<1x384x256xf32, #tpu.memory_space<vmem>>, vector<1x384x256xf32>
    %45 = vector.shape_cast %44 : vector<1x384x256xf32> to vector<384x256xf32>
    %cst_29 = arith.constant dense<0.000000e+00> : vector<64x256xf32>
    %46 = tpu.matmul %43, %45, %cst_29 {dimension_numbers = #tpu.dot_dimension_numbers<[1], [0], [0], [1], [0, 0, 1, 1], [], []>} : vector<64x384xf32>, vector<384x256xf32>, vector<64x256xf32> -> vector<64x256xf32>
    %c0_30 = arith.constant 0 : index
    %c0_31 = arith.constant 0 : index
    %c0_32 = arith.constant 0 : index
    %47 = vector.load %arg12[%c0_30, %c0_31, %c0_32] : memref<1x1x256xf32, #tpu.memory_space<vmem>>, vector<1x1x256xf32>
    %48 = vector.shape_cast %47 : vector<1x1x256xf32> to vector<1x256xf32>
    %49 = vector.broadcast %48 : vector<1x256xf32> to vector<64x256xf32>
    %50 = arith.addf %46, %49 : vector<64x256xf32>
    %51 = vector.extract_strided_slice %50 {offsets = [0, 0], sizes = [64, 128], strides = [1, 1]} : vector<64x256xf32> to vector<64x128xf32>
    %52 = vector.extract_strided_slice %50 {offsets = [0, 128], sizes = [64, 128], strides = [1, 1]} : vector<64x256xf32> to vector<64x128xf32>
    %53 = arith.negf %51 : vector<64x128xf32>
    %54 = math.exp %53 : vector<64x128xf32>
    %cst_33 = arith.constant 1.000000e+00 : f32
    %55 = vector.broadcast %cst_33 : f32 to vector<64x128xf32>
    %56 = arith.addf %55, %54 : vector<64x128xf32>
    %57 = arith.divf %55, %56 : vector<64x128xf32>
    %58 = math.tanh %52 : vector<64x128xf32>
    %59 = arith.mulf %57, %58 : vector<64x128xf32>
    %c0_34 = arith.constant 0 : index
    %c0_35 = arith.constant 0 : index
    %c0_36 = arith.constant 0 : index
    %60 = vector.load %arg13[%c0_34, %c0_35, %c0_36] : memref<1x128x256xf32, #tpu.memory_space<vmem>>, vector<1x128x256xf32>
    %61 = vector.shape_cast %60 : vector<1x128x256xf32> to vector<128x256xf32>
    %cst_37 = arith.constant dense<0.000000e+00> : vector<64x256xf32>
    %62 = tpu.matmul %59, %61, %cst_37 {dimension_numbers = #tpu.dot_dimension_numbers<[1], [0], [0], [1], [0, 0, 1, 1], [], []>} : vector<64x128xf32>, vector<128x256xf32>, vector<64x256xf32> -> vector<64x256xf32>
    %c0_38 = arith.constant 0 : index
    %c0_39 = arith.constant 0 : index
    %c0_40 = arith.constant 0 : index
    %63 = vector.load %arg14[%c0_38, %c0_39, %c0_40] : memref<1x1x256xf32, #tpu.memory_space<vmem>>, vector<1x1x256xf32>
    %64 = vector.shape_cast %63 : vector<1x1x256xf32> to vector<1x256xf32>
    %65 = vector.broadcast %64 : vector<1x256xf32> to vector<64x256xf32>
    %66 = arith.addf %62, %65 : vector<64x256xf32>
    %67 = vector.extract_strided_slice %66 {offsets = [0, 0], sizes = [64, 128], strides = [1, 1]} : vector<64x256xf32> to vector<64x128xf32>
    %68 = arith.addf %67, %24 : vector<64x128xf32>
    %cst_41 = arith.constant 0.707106769 : f32
    %69 = vector.broadcast %cst_41 : f32 to vector<64x128xf32>
    %70 = arith.mulf %68, %69 : vector<64x128xf32>
    %c0_42 = arith.constant 0 : index
    %c0_43 = arith.constant 0 : index
    %71 = vector.load %arg20[%c0_42, %c0_43] : memref<64x128xf32, #tpu.memory_space<vmem>>, vector<64x128xf32>
    tpu.vector_store %arg20[%c0_42, %c0_43], %70 {strides = array<i32>} : memref<64x128xf32, #tpu.memory_space<vmem>>, vector<64x128xf32>,
    %c0_44 = arith.constant 0 : index
    %c0_45 = arith.constant 0 : index
    %72 = vector.load %arg21[%c0_44, %c0_45] : memref<64x128xf32, #tpu.memory_space<vmem>>, vector<64x128xf32>
    %73 = vector.extract_strided_slice %66 {offsets = [0, 128], sizes = [64, 128], strides = [1, 1]} : vector<64x256xf32> to vector<64x128xf32>
    %74 = arith.addf %72, %73 : vector<64x128xf32>
    %c0_46 = arith.constant 0 : index
    %c0_47 = arith.constant 0 : index
    %75 = vector.load %arg21[%c0_46, %c0_47] : memref<64x128xf32, #tpu.memory_space<vmem>>, vector<64x128xf32>
    tpu.vector_store %arg21[%c0_46, %c0_47], %74 {strides = array<i32>} : memref<64x128xf32, #tpu.memory_space<vmem>>, vector<64x128xf32>,
    %c2_i32 = arith.constant 2 : i32
    %76 = arith.cmpi eq, %arg1, %c2_i32 : i32
    %77 = arith.extui %76 : i1 to i32
    %c0_i32_48 = arith.constant 0 : i32
    %78 = arith.cmpi ne, %77, %c0_i32_48 : i32
    scf.if %78 {
      %c0_49 = arith.constant 0 : index
      %c0_50 = arith.constant 0 : index
      %79 = vector.load %arg21[%c0_49, %c0_50] : memref<64x128xf32, #tpu.memory_space<vmem>>, vector<64x128xf32>
      %cst_51 = arith.constant 0.577350259 : f32
      %80 = vector.broadcast %cst_51 : f32 to vector<64x128xf32>
      %81 = arith.mulf %79, %80 : vector<64x128xf32>
      %c0_52 = arith.constant 0 : index
      %c0_53 = arith.constant 0 : index
      %82 = vector.load %arg15[%c0_52, %c0_53] : memref<128x128xf32, #tpu.memory_space<vmem>>, vector<128x128xf32>
      %cst_54 = arith.constant dense<0.000000e+00> : vector<64x128xf32>
      %83 = tpu.matmul %81, %82, %cst_54 {dimension_numbers = #tpu.dot_dimension_numbers<[1], [0], [0], [1], [0, 0, 1, 1], [], []>} : vector<64x128xf32>, vector<128x128xf32>, vector<64x128xf32> -> vector<64x128xf32>
      %c0_55 = arith.constant 0 : index
      %c0_56 = arith.constant 0 : index
      %84 = vector.load %arg16[%c0_55, %c0_56] : memref<1x128xf32, #tpu.memory_space<vmem>>, vector<1x128xf32>
      %85 = vector.broadcast %84 : vector<1x128xf32> to vector<64x128xf32>
      %86 = arith.addf %83, %85 : vector<64x128xf32>
      %cst_57 = arith.constant 1.500000e+01 : f32
      %87 = vector.broadcast %cst_57 : f32 to vector<64x128xf32>
      %88 = arith.minimumf %86, %87 : vector<64x128xf32>
      %89 = math.exp %88 : vector<64x128xf32>
      %cst_58 = arith.constant 2.000000e+00 : f32
      %90 = vector.broadcast %cst_58 : f32 to vector<64x128xf32>
      %91 = arith.addf %89, %90 : vector<64x128xf32>
      %92 = arith.mulf %89, %91 : vector<64x128xf32>
      %cst_59 = arith.constant 1.500000e+01 : f32
      %93 = vector.broadcast %cst_59 : f32 to vector<64x128xf32>
      %94 = arith.cmpf ogt, %86, %93 : vector<64x128xf32>
      %95 = arith.mulf %86, %92 : vector<64x128xf32>
      %cst_60 = arith.constant 2.000000e+00 : f32
      %96 = vector.broadcast %cst_60 : f32 to vector<64x128xf32>
      %97 = arith.addf %92, %96 : vector<64x128xf32>
      %98 = arith.divf %95, %97 : vector<64x128xf32>
      %99 = arith.select %94, %86, %98 : vector<64x128xi1>, vector<64x128xf32>
      %c0_61 = arith.constant 0 : index
      %c0_62 = arith.constant 0 : index
      %100 = vector.load %arg17[%c0_61, %c0_62] : memref<128x1xf32, #tpu.memory_space<vmem>>, vector<128x1xf32>
      %cst_63 = arith.constant dense<0.000000e+00> : vector<64x1xf32>
      %101 = tpu.matmul %99, %100, %cst_63 {dimension_numbers = #tpu.dot_dimension_numbers<[1], [0], [0], [1], [0, 0, 1, 1], [], []>} : vector<64x128xf32>, vector<128x1xf32>, vector<64x1xf32> -> vector<64x1xf32>
      %c0_64 = arith.constant 0 : index
      %c0_65 = arith.constant 0 : index
      %102 = vector.load %arg18[%c0_64, %c0_65] : memref<1x1xf32, #tpu.memory_space<vmem>>, vector<1x1xf32>
      %103 = vector.broadcast %102 : vector<1x1xf32> to vector<64x1xf32>
      %104 = arith.addf %101, %103 : vector<64x1xf32>
      %105 = arith.mulf %104, %4 : vector<64x1xf32>
      %c0_66 = arith.constant 0 : index
      %c0_67 = arith.constant 0 : index
      %c0_68 = arith.constant 0 : index
      %106 = vector.load %arg19[%c0_66, %c0_67, %c0_68] : memref<1x64x1xf32, #tpu.memory_space<vmem>>, vector<1x64x1xf32>
      %107 = vector.shape_cast %106 : vector<1x64x1xf32> to vector<64x1xf32>
      %108 = vector.shape_cast %105 : vector<64x1xf32> to vector<1x64x1xf32>
      tpu.vector_store %arg19[%c0_66, %c0_67, %c0_68], %108 {strides = array<i32>} : memref<1x64x1xf32, #tpu.memory_space<vmem>>, vector<1x64x1xf32>,
    } else {
    }
    return
  }
  func.func @transform_0(%arg0: i32, %arg1: i32) -> (i32, i32, i32) {
    %c0_i32 = arith.constant 0 : i32
    %c0_i32_0 = arith.constant 0 : i32
    %c0_i32_1 = arith.constant 0 : i32
    return %arg0, %c0_i32, %c0_i32_0 : i32, i32, i32
  }
  func.func @transform_1(%arg0: i32, %arg1: i32) -> (i32, i32, i32) {
    %c0_i32 = arith.constant 0 : i32
    %c0_i32_0 = arith.constant 0 : i32
    %c0_i32_1 = arith.constant 0 : i32
    return %arg0, %c0_i32, %c0_i32_0 : i32, i32, i32
  }
  func.func @transform_2(%arg0: i32, %arg1: i32) -> (i32, i32, i32) {
    %c0_i32 = arith.constant 0 : i32
    %c0_i32_0 = arith.constant 0 : i32
    %c0_i32_1 = arith.constant 0 : i32
    return %arg0, %c0_i32, %c0_i32_0 : i32, i32, i32
  }
  func.func @transform_3(%arg0: i32, %arg1: i32) -> (i32, i32, i32, i32) {
    %c0_i32 = arith.constant 0 : i32
    %c0_i32_0 = arith.constant 0 : i32
    %c0_i32_1 = arith.constant 0 : i32
    return %arg0, %arg1, %c0_i32, %c0_i32_0 : i32, i32, i32, i32
  }
  func.func @transform_4(%arg0: i32, %arg1: i32) -> (i32, i32, i32, i32) {
    %c0_i32 = arith.constant 0 : i32
    %c0_i32_0 = arith.constant 0 : i32
    %c0_i32_1 = arith.constant 0 : i32
    return %arg0, %arg1, %c0_i32, %c0_i32_0 : i32, i32, i32, i32
  }
  func.func @transform_5(%arg0: i32, %arg1: i32) -> (i32, i32) {
    %c0_i32 = arith.constant 0 : i32
    %c0_i32_0 = arith.constant 0 : i32
    %c0_i32_1 = arith.constant 0 : i32
    return %c0_i32, %c0_i32_0 : i32, i32
  }
  func.func @transform_6(%arg0: i32, %arg1: i32) -> (i32, i32) {
    %c0_i32 = arith.constant 0 : i32
    %c0_i32_0 = arith.constant 0 : i32
    %c0_i32_1 = arith.constant 0 : i32
    return %c0_i32, %c0_i32_0 : i32, i32
  }
  func.func @transform_7(%arg0: i32, %arg1: i32) -> (i32, i32, i32) {
    %c0_i32 = arith.constant 0 : i32
    %c0_i32_0 = arith.constant 0 : i32
    %c0_i32_1 = arith.constant 0 : i32
    return %arg1, %c0_i32, %c0_i32_0 : i32, i32, i32
  }
  func.func @transform_8(%arg0: i32, %arg1: i32) -> (i32, i32, i32) {
    %c0_i32 = arith.constant 0 : i32
    %c0_i32_0 = arith.constant 0 : i32
    %c0_i32_1 = arith.constant 0 : i32
    return %arg1, %c0_i32, %c0_i32_0 : i32, i32, i32
  }
  func.func @transform_9(%arg0: i32, %arg1: i32) -> (i32, i32, i32) {
    %c0_i32 = arith.constant 0 : i32
    %c0_i32_0 = arith.constant 0 : i32
    %c0_i32_1 = arith.constant 0 : i32
    return %arg1, %c0_i32, %c0_i32_0 : i32, i32, i32
  }
  func.func @transform_10(%arg0: i32, %arg1: i32) -> (i32, i32, i32) {
    %c0_i32 = arith.constant 0 : i32
    %c0_i32_0 = arith.constant 0 : i32
    %c0_i32_1 = arith.constant 0 : i32
    return %arg1, %c0_i32, %c0_i32_0 : i32, i32, i32
  }
  func.func @transform_11(%arg0: i32, %arg1: i32) -> (i32, i32, i32) {
    %c0_i32 = arith.constant 0 : i32
    %c0_i32_0 = arith.constant 0 : i32
    %c0_i32_1 = arith.constant 0 : i32
    return %arg1, %c0_i32, %c0_i32_0 : i32, i32, i32
  }
  func.func @transform_12(%arg0: i32, %arg1: i32) -> (i32, i32, i32) {
    %c0_i32 = arith.constant 0 : i32
    %c0_i32_0 = arith.constant 0 : i32
    %c0_i32_1 = arith.constant 0 : i32
    return %arg1, %c0_i32, %c0_i32_0 : i32, i32, i32
  }
  func.func @transform_13(%arg0: i32, %arg1: i32) -> (i32, i32) {
    %c0_i32 = arith.constant 0 : i32
    %c0_i32_0 = arith.constant 0 : i32
    %c0_i32_1 = arith.constant 0 : i32
    return %c0_i32, %c0_i32_0 : i32, i32
  }
  func.func @transform_14(%arg0: i32, %arg1: i32) -> (i32, i32) {
    %c0_i32 = arith.constant 0 : i32
    %c0_i32_0 = arith.constant 0 : i32
    %c0_i32_1 = arith.constant 0 : i32
    return %c0_i32, %c0_i32_0 : i32, i32
  }
  func.func @transform_15(%arg0: i32, %arg1: i32) -> (i32, i32) {
    %c0_i32 = arith.constant 0 : i32
    %c0_i32_0 = arith.constant 0 : i32
    %c0_i32_1 = arith.constant 0 : i32
    return %c0_i32, %c0_i32_0 : i32, i32
  }
  func.func @transform_16(%arg0: i32, %arg1: i32) -> (i32, i32) {
    %c0_i32 = arith.constant 0 : i32
    %c0_i32_0 = arith.constant 0 : i32
    %c0_i32_1 = arith.constant 0 : i32
    return %c0_i32, %c0_i32_0 : i32, i32
  }
  func.func @transform_17(%arg0: i32, %arg1: i32) -> (i32, i32, i32) {
    %c0_i32 = arith.constant 0 : i32
    %c0_i32_0 = arith.constant 0 : i32
    %c0_i32_1 = arith.constant 0 : i32
    return %arg0, %c0_i32, %c0_i32_0 : i32, i32, i32
  }
}

</mosaic_0001>

<bundles_post_ra>
// kernel: tpu_custom_call.1
= control target key start
LH: loop header
LB: loop body
LE: loop exit
PB: predicated region body
PF: predicated region fallthrough
CT: control target
= control target key end

     0   :  { %s5622_s0 = inlined_call_operand.vmem [shape: f32[2,64,1], index: 0, kind: input, shape index: {}]   ;;  %s5623_s1 = inlined_call_operand.hbm [shape: f32[2,64,128], index: 1, kind: input, shape index: {}]   ;;  %s5624_s2 = inlined_call_operand.vmem [shape: f32[2,64,1], index: 2, kind: input, shape index: {}]   ;;  %s5625_s3 = inlined_call_operand.hbm [shape: f32[2,3,1,128], index: 3, kind: input, shape index: {}]   ;;  %s5626_s4 = inlined_call_operand.hbm [shape: f32[2,3,1,128], index: 4, kind: input, shape index: {}]   ;;  %s5627_s5 = inlined_call_operand.hbm [shape: f32[1,128], index: 5, kind: input, shape index: {}]   ;;  %s5628_s6 = inlined_call_operand.hbm [shape: f32[1,128], index: 6, kind: input, shape index: {}]   ;;  %s5629_s7 = inlined_call_operand.hbm [shape: f32[3,128,128], index: 7, kind: input, shape index: {}]   ;;  %s5630_s8 = inlined_call_operand.hbm [shape: f32[3,1,128], index: 8, kind: input, shape index: {}]   ;;  %s5631_s9 = inlined_call_operand.hbm [shape: f32[3,384,256], index: 9, kind: input, shape index: {}]   ;;  %s5632_s10 = inlined_call_operand.hbm [shape: f32[3,1,256], index: 10, kind: input, shape index: {}]   ;;  %s5633_s11 = inlined_call_operand.hbm [shape: f32[3,128,256], index: 11, kind: input, shape index: {}]   ;;  %s5634_s12 = inlined_call_operand.hbm [shape: f32[3,1,256], index: 12, kind: input, shape index: {}]   ;;  %s5635_s13 = inlined_call_operand.hbm [shape: f32[128,128], index: 13, kind: input, shape index: {}]   ;;  %s5636_s14 = inlined_call_operand.hbm [shape: f32[1,128], index: 14, kind: input, shape index: {}]   ;;  %s5637_s15 = inlined_call_operand.vmem [shape: f32[128,1], index: 15, kind: input, shape index: {}]   ;;  %s5638_s16 = inlined_call_operand.<no memory space> [shape: f32[1,1], index: 16, kind: input, shape index: {}]   ;;  %s5639_s17 = inlined_call_operand.vmem [shape: f32[2,64,1], index: 17, kind: output, shape index: {}]  }
   0x1   :  { %5698 = sst [smem:[#allocation49_spill]] %s5622_s0  ;;  %v22_v0 = vstv %s5638_s16 }
   0x2   :  { %5699 = sst [smem:[#allocation50_spill]] %s5623_s1  ;;  %23 = vst [vmem:[#allocation4] sm:$0x1] %v22_v0 }
   0x3   :  { %5700 = sst [smem:[#allocation51_spill]] %s5624_s2 }
   0x4   :  { %5701 = sst [smem:[#allocation52_spill]] %s5625_s3 }
   0x5   :  { %5702 = sst [smem:[#allocation53_spill]] %s5626_s4 }
   0x6   :  { %5703 = sst [smem:[#allocation54_spill]] %s5627_s5 }
   0x7   :  { %5704 = sst [smem:[#allocation55_spill]] %s5628_s6 }
   0x8   :  { %5705 = sst [smem:[#allocation56_spill]] %s5629_s7 }
   0x9   :  { %5706 = sst [smem:[#allocation57_spill]] %s5630_s8 }
   0xa   :  { %5707 = sst [smem:[#allocation58_spill]] %s5631_s9 }
   0xb   :  { %5708 = sst [smem:[#allocation59_spill]] %s5632_s10 }
   0xc   :  { %5709 = sst [smem:[#allocation60_spill]] %s5634_s12 }
   0xd   :  { %5710 = sst [smem:[#allocation61_spill]] %s5635_s13 }
   0xe   :  { %5711 = sst [smem:[#allocation62_spill]] %s5636_s14 }
   0xf   :  { %5712 = sst [smem:[#allocation63_spill]] %s5637_s15 }
  0x10   :  { %5713 = sst [smem:[#allocation64_spill]] %s5639_s17 }
  0x11   :  { %24 = vsyncpa [#allocation6], 0 }
  0x12   :  { %26 = vsyncpa [#allocation6 + $0x1], 0 }
  0x13   :  { %27 = vsyncpa [#allocation8], 0 }
  0x14   :  { %29 = vsyncpa [#allocation8 + $0x1], 0 }
  0x15   :  { %30 = vsyncpa [#allocation11], 0 }
  0x16   :  { %31 = vsyncpa [#allocation14], 0 }
  0x17   :  { %33 = vsyncpa [#allocation14 + $0x1], 0 }
  0x18   :  { %34 = vsyncpa [#allocation17], 0 }
  0x19   :  { %36 = vsyncpa [#allocation17 + $0x1], 0 }
  0x1a   :  { %37 = vsyncpa [#allocation20], 0 }
  0x1b   :  { %39 = vsyncpa [#allocation20 + $0x1], 0 }
  0x1c   :  { %40 = vsyncpa [#allocation23], 0  ;;  %s4308_s26 = smov 0   ;;  %s4310_s27 = smov 0  }
  0x1d   :  { %s4312_s28 = smov 0   ;;  %s4314_s16 = smov 0  }
  0x1e   :  { %s4316_s29 = smov 0   ;;  %s4318_s0 = smov 0  }
  0x1f   :  { %s4320_s30 = smov 0   ;;  %s4322_s18 = smov 0  }
  0x20   :  { %s4324_s19 = smov 0   ;;  %s4326_s1 = smov 0  }
  0x21   :  { %s4328_s20 = smov 0   ;;  %s4330_s21 = smov 0  }
  0x22   :  { %s4332_s22 = smov 0   ;;  %s4334_s23 = smov 0  }
  0x23 LB: > { %5714 = sst [smem:[#allocation32_spill]] %s4144_s27  ;;  %s5643_s24 = sadd.s32 4294967295, %s4192_s23   ;;  %s4192_s23 = sphi %s4334_s23, %s46_s23   ;;  %s4188_s22 = sphi %s4332_s22, %s5824_s22   ;;  %s4184_s21 = sphi %s4330_s21, %s5823_s21   ;;  %s4180_s20 = sphi %s4328_s20, %s5822_s20   ;;  %s4176_s1 = sphi %s4326_s1, %s5821_s1   ;;  %s4172_s19 = sphi %s4324_s19, %s5820_s19   ;;  %s4168_s18 = sphi %s4322_s18, %s5815_s18   ;;  %s4164_s30 = sphi %s4320_s30, %s5814_s30   ;;  %s4160_s0 = sphi %s4318_s0, %s5819_s0   ;;  %s4156_s29 = sphi %s4316_s29, %s5818_s29   ;;  %s4152_s16 = sphi %s4314_s16, %s5812_s16   ;;  %s4148_s28 = sphi %s4312_s28, %s5811_s28   ;;  %s4144_s27 = sphi %s4310_s27, %s5810_s27   ;;  %s4140_s26 = sphi %s4308_s26, %s5809_s26  }
  0x24   : > { %5715 = sst [smem:[#allocation33_spill]] %s4148_s28  ;;  %p2809_p0 = scmp.ge.s32.totalorder %s4192_s23, 1 }
  0x25   : > { %5716 = sst [smem:[#allocation34_spill]] %s4156_s29  ;;  %p4382_p1 = scmp.eq.s32.totalorder %s5643_s24, 0 }
  0x26   : > { %5717 = sst [smem:[#allocation35_spill]] %s4164_s30  ;;  %p505_p2 = scmp.lt.s32.totalorder %s4192_s23, 7 }
  0x27   : > { %5718 = sst [smem:[#allocation36_spill]] %s4168_s18  ;;  %s4195_s2 = smov [#allocation22]  }
  0x28   : > { %5719 = sst [smem:[#allocation37_spill]] %s4172_s19  ;;  %p4387_p3 = pnand %p2809_p0, %p505_p2 }
  0x29   : > { %5720 = sst [smem:[#allocation38_spill]] %s4176_s1  ;;  %s4194_s1 = smov [#allocation10]  }
  0x2a   : > { %5721 = sst [smem:[#allocation39_spill]] %s4180_s20  ;;  %s518_s17 = sshll.u32 %s4194_s1, 4  ;;  %s519_s17 = int_to_ptr.vmem [resolvable:$true] %s518_s17 }
  0x2b   : > { %s5722_s25 = scalar_select %p4382_p1, 1, 0 }
  0x2c   : > { %s5723_s15 = scalar_select %p4387_p3, 1, 0 }
  0x2d   : > { %p3382_p4 = pneg %p4387_p3  ;;  %s539_s20 = sshll.u32 %s4195_s2, 4  ;;  %s4399_s20 = int_to_ptr.vmem [resolvable:$true] %s539_s20 }
  0x2e   : > { %5724 = sst [smem:[#allocation40_spill]] %s5723_s15  ;;  %s5726_s5 = sld [smem:[#allocation54_spill]] }
  0x2f   : > { %p4395_p5 = pnand %p3382_p4, %p4382_p1 }
  0x31   : > { %s5725_s24 = scalar_select %p4395_p5, 1, 0 }
  0x32   : > { %p4409_p7 = pneg %p4395_p5 }
  0x34   : > { %s3672_s8 = scalar_lea.hbm %s5726_s5, 16 }
  0x35   : > { %p3673_p6 = scmp.ne.s32.totalorder %s5726_s5, %s3672_s8  ;;  %p3679_p10 = scmp.lt.u32.totalorder %s3672_s8, %s5726_s5 }
  0x36   : > { %s5727_s1 = scalar_select %p4409_p7, 1, 0 }
  0x37   : > { %p3675_p8 = pnand %p4409_p7, %p3673_p6 }
  0x39   : > { %p3676_p9 = pneg %p3675_p8 }
  0x3b   : > { %p3681_p11 = pnand %p3679_p10, %p3676_p9 }
  0x3d   : > { %3684 = shalt.err (!%p3681_p11)
}
  0x3e   : > { %s3685_s10 = scalar_lea.vmem %s519_s17, 16  ;;  %s3692_s12 = scalar_lea.vmem %s519_s17, 32 }
  0x3f   : > { %p3686_p12 = scmp.ne.s32.totalorder %s519_s17, %s3685_s10  ;;  %p3693_p2 = scmp.lt.s32.totalorder %s519_s17, %s519_s17 }
  0x40   : > { %p3694_p4 = scmp.lt.s32.totalorder %s3692_s12, %s3685_s10 }
  0x41   : > { %p3688_p13 = pnand %p3686_p12, %p4409_p7 }
  0x42   : > { %p3695_p3 = por %p3694_p4, %p3693_p2 }
  0x43   : > { %p3689_p0 = pneg %p3688_p13 }
  0x45   : > { %p3696_p1 = pnand %p3695_p3, %p3689_p0 }
  0x47   : > { %3699 = shalt.err (!%p3696_p1)
}
  0x48   : > { %3385 = dma.hbm_to_vmem [thread:$0]  (!%p4395_p5), %s5726_s5, 16, %s519_s17, [#allocation11]  }
  0x49   : > { %s5728_s13 = sld [smem:[#allocation61_spill]] }
  0x4f   : > { %s3700_s2 = scalar_lea.hbm %s5728_s13, 2048 }
  0x50   : > { %p3701_p6 = scmp.ne.s32.totalorder %s5728_s13, %s3700_s2  ;;  %p3707_p1 = scmp.lt.u32.totalorder %s3700_s2, %s5728_s13 }
  0x52   : > { %p3703_p8 = pnand %p3701_p6, %p4409_p7 }
  0x54   : > { %p3704_p9 = pneg %p3703_p8 }
  0x56   : > { %p3709_p3 = pnand %p3707_p1, %p3704_p9 }
  0x58   : > { %3712 = shalt.err (!%p3709_p3)
}
  0x59   : > { %s3713_s17 = scalar_lea.vmem %s4399_s20, 2048  ;;  %p3721_p13 = scmp.lt.s32.totalorder %s4399_s20, %s4399_s20 }
  0x5a   : > { %p3714_p10 = scmp.ne.s32.totalorder %s4399_s20, %s3713_s17  ;;  %p3722_p0 = scmp.lt.s32.totalorder %s3713_s17, %s3713_s17 }
  0x5c   : > { %p3716_p11 = pnand %p3714_p10, %p4409_p7  ;;  %p3723_p2 = por %p3722_p0, %p3721_p13 }
  0x5e   : > { %p3717_p12 = pneg %p3716_p11 }
  0x60   : > { %p3724_p4 = pnand %p3723_p2, %p3717_p12 }
  0x62   : > { %3727 = shalt.err (!%p3724_p4)
}
  0x63   : > { %s5655_s14 = smov 128   ;;  %s5657_s19 = smov 8  }
  0x64   : > { %3391 = dma.hbm_to_vmem [thread:$0]  (!%p4395_p5), %s5728_s13, 2048, %s4399_s20, [#allocation23], %s5655_s14, %s5655_s14, %s5657_s19  }
  0x65   : > { %s55_s8 = sadd.s32 1, %s4184_s21  ;;  %s58_s15 = sadd.s32 1, %s4188_s22 }
  0x66   : > { %p56_p6 = scmp.ge.s32.totalorder %s55_s8, 3  ;;  %p5667_p8 = scmp.eq.s32.totalorder %s4192_s23, 0 }
  0x67   : > { %s145_s2 = sadd.s32 1, %s4160_s0  ;;  %p152_p9 = scmp.ne.s32.totalorder %s4160_s0, %s4156_s29 }
  0x68   : > { %s5826_s8 = smov (%p56_p6, %s55_s8), 0  ;;  %s5828_s15 = smov (!%p56_p6, %s58_s15), %s4188_s22 }
  0x69   : > { %5729 = sst [smem:[#allocation41_spill]] %s5826_s8  ;;  %s141_s10 = ssub.s32 %s4184_s21, %s5826_s8 }
  0x6a   : > { %p4464_p1 = por %p152_p9, %p5667_p8  ;;  %p60_p3 = scmp.ge.s32.totalorder %s5828_s15, 2 }
  0x6b   : > { %p158_p10 = scmp.ne.s32.totalorder %s4156_s29, %s4152_s16  ;;  %p239_p11 = scmp.eq.s32.totalorder %s141_s10, 0 }
  0x6c   : > { %s241_s12 = sadd.s32 1, %s4148_s28  ;;  %s5830_s15 = smov (%p60_p3, %s5828_s15), 0 }
  0x6d   : > { %5731 = sst [smem:[#allocation42_spill]] %s5830_s15  ;;  %p5732_p12 = scmp.ne.s32.totalorder %s5722_s25, 0 }
  0x6e   : > { %p248_p0 = scmp.ne.s32.totalorder %s4148_s28, %s4144_s27  ;;  %s4483_s30 = ssub.s32 %s4188_s22, %s5830_s15 }
  0x6f   : > { %p4475_p13 = por %p158_p10, %p5732_p12  ;;  %p254_p2 = scmp.ne.s32.totalorder %s4144_s27, %s4140_s26 }
  0x70   : > { %s142_s16 = sor.u32 %s141_s10, %s4483_s30  ;;  %p4491_p9 = por %p248_p0, %p5667_p8 }
  0x71   : > { %s5733_s17 = scalar_select %p4475_p13, 1, 0 }
  0x72   : > { %p143_p6 = scmp.eq.s32.totalorder %s142_s16, 0  ;;  %p4503_p3 = por %p254_p2, %p5732_p12 }
  0x73   : > { %5734 = sst [smem:[#allocation43_spill]] %s5733_s17  ;;  %p5668_p10 = scmp.lt.s32.totalorder %s4192_s23, 6 }
  0x74   : > { %s4496_s14 = scalar_select %p239_p11, %s4148_s28, %s241_s12  }
  0x75   : > { %s4499_s19 = scalar_select %p143_p6, %s4160_s0, %s145_s2  }
  0x76   : > { %5736 = sst [smem:[#allocation44_spill]] %s4496_s14  ;;  %s4509_s26 = sand.u32 1, %s4192_s23  }
  0x77   : > { %5737 = sst [smem:[#allocation45_spill]] %s4499_s19  ;;  %s5664_s10 = sand.u32 1, %s4160_s0  }
  0x78   : > { %s5738_s5 = scalar_select %p4503_p3, 1, 0 }
  0x79   : > { %s3343_s16 = smul.u32 3, %s4188_s22  ;;  %s610_s13 = scalar_lea.vmem [#allocation7], %s5664_s10 }
  0x7a   : > { %5739 = sst [smem:[#allocation46_spill]] %s5738_s5  ;;  %s619_s15 = sshll.u32 %s610_s13, 4  ;;  %s4515_s15 = int_to_ptr.vmem [resolvable:$true] %s619_s15 }
  0x7b   : > { %p4521_p11 = pnand %p5668_p10, %p4464_p1  ;;  %s615_s12 = sadd.s32 %s4184_s21, %s3343_s16 }
  0x7c   : > { %s2818_s8 = sshll.u32 %s615_s12, 4  ;;  %s5742_s3 = sld [smem:[#allocation52_spill]] }
  0x7d   : > { %s5740_s2 = scalar_select %p4521_p11, 1, 0 }
  0x7e   : > { %s5743_s4 = sld [smem:[#allocation53_spill]]  ;;  %s5676_s20 = scalar_lea.sflag [#allocation8], %s4509_s26 }
  0x7f   : > { %5741 = sst [smem:[#allocation47_spill]] %s5740_s2  ;;  %p5677_p0 = pneg %p4521_p11 }
  0x82   : > { %s4529_s5 = scalar_lea.hbm %s5742_s3, %s2818_s8  ;;  %s3733_s16 = scalar_lea.hbm %s5742_s3, 96 }
  0x83   : > { %s3728_s17 = scalar_lea.hbm %s4529_s5, 16  ;;  %p3734_p8 = scmp.lt.u32.totalorder %s4529_s5, %s5742_s3 }
  0x84   : > { %s4534_s13 = scalar_lea.hbm %s5743_s4, %s2818_s8  ;;  %p3729_p1 = scmp.ne.s32.totalorder %s4529_s5, %s3728_s17 }
  0x85   : > { %5744 = sst [smem:[#allocation48_spill]] %s4534_s13  ;;  %p3735_p4 = scmp.lt.u32.totalorder %s3733_s16, %s3728_s17 }
  0x86   : > { %p3731_p2 = pnand %p5677_p0, %p3729_p1  ;;  %p3737_p3 = scmp.lt.u32.totalorder %s3728_s17, %s4529_s5 }
  0x87   : > { %p3736_p10 = por %p3735_p4, %p3734_p8 }
  0x88   : > { %p3732_p6 = pneg %p3731_p2 }
  0x89   : > { %p3738_p13 = por %p3737_p3, %p3736_p10 }
  0x8b   : > { %p3739_p12 = pnand %p3738_p13, %p3732_p6 }
  0x8d   : > { %3742 = shalt.err (!%p3739_p12)
}
  0x8e   : > { %s3743_s8 = scalar_lea.vmem %s4515_s15, 16  ;;  %s4198_s12 = smov [#allocation7]  }
  0x8f   : > { %p3744_p1 = scmp.ne.s32.totalorder %s4515_s15, %s3743_s8  ;;  %s3748_s14 = sshll.u32 %s4198_s12, 4  ;;  %s3749_s14 = int_to_ptr.vmem [resolvable:$false] %s3748_s14 }
  0x90   : > { %s3750_s19 = scalar_lea.vmem %s3749_s14, 32  ;;  %p3751_p7 = scmp.lt.s32.totalorder %s4515_s15, %s3749_s14 }
  0x91   : > { %p3746_p2 = pnand %p3744_p1, %p5677_p0  ;;  %p3752_p8 = scmp.lt.s32.totalorder %s3750_s19, %s3743_s8 }
  0x93   : > { %p3747_p5 = pneg %p3746_p2  ;;  %p3753_p4 = por %p3752_p8, %p3751_p7 }
  0x95   : > { %p3754_p3 = pnand %p3753_p4, %p3747_p5 }
  0x97   : > { %3757 = shalt.err (!%p3754_p3)
}
  0x98   : > { %3401 = dma.hbm_to_vmem [thread:$0]  (!%p4521_p11), %s4529_s5, 16, %s4515_s15, %s5676_s20  }
  0x99   : > { %p5745_p12 = scmp.lt.s32.totalorder %s4192_s23, 6  ;;  %s4573_s16 = sand.u32 1, %s4148_s28  }
  0x9a   : > { %s2874_s27 = sshll.u32 %s4184_s21, 11  ;;  %s2820_s10 = sshll.u32 %s4573_s16, 7 }
  0x9b   : > { %p4568_p13 = pnand %p5745_p12, %p4491_p9  ;;  %s5747_s7 = sld [smem:[#allocation56_spill]] }
  0x9c   : > { %s649_s5 = scalar_lea.vmem [#allocation13], %s2820_s10  ;;  %s5683_s19 = scalar_lea.sflag [#allocation14], %s4509_s26 }
  0x9d   : > { %s5746_s17 = scalar_select %p4568_p13, 1, 0 }
  0x9e   : > { %s656_s15 = sshll.u32 %s649_s5, 4  ;;  %p4590_p7 = pneg %p4568_p13  ;;  %s4582_s15 = int_to_ptr.vmem [resolvable:$true] %s656_s15 }
  0xa0   : > { %s5748_s3 = scalar_select %p4590_p7, 1, 0 }
  0xa1   : > { %s4580_s14 = scalar_lea.hbm %s5747_s7, %s2874_s27  ;;  %s3763_s10 = scalar_lea.hbm %s5747_s7, 6144 }
  0xa2   : > { %s3758_s20 = scalar_lea.hbm %s4580_s14, 2048  ;;  %p3764_p6 = scmp.lt.u32.totalorder %s4580_s14, %s5747_s7 }
  0xa3   : > { %p3759_p5 = scmp.ne.s32.totalorder %s4580_s14, %s3758_s20  ;;  %p3765_p1 = scmp.lt.u32.totalorder %s3763_s10, %s3758_s20 }
  0xa4   : > { %p3767_p8 = scmp.lt.u32.totalorder %s3758_s20, %s4580_s14 }
  0xa5   : > { %p3761_p9 = pnand %p4590_p7, %p3759_p5  ;;  %p3766_p2 = por %p3765_p1, %p3764_p6 }
  0xa7   : > { %p3762_p10 = pneg %p3761_p9  ;;  %p3768_p4 = por %p3767_p8, %p3766_p2 }
  0xa9   : > { %p3769_p3 = pnand %p3768_p4, %p3762_p10 }
  0xab   : > { %3772 = shalt.err (!%p3769_p3)
}
  0xac   : > { %s3773_s18 = scalar_lea.vmem %s4582_s15, 2048  ;;  %s4199_s27 = smov [#allocation13]  }
  0xad   : > { %p3774_p12 = scmp.ne.s32.totalorder %s4582_s15, %s3773_s18  ;;  %s3778_s8 = sshll.u32 %s4199_s27, 4  ;;  %s3779_s8 = int_to_ptr.vmem [resolvable:$false] %s3778_s8 }
  0xae   : > { %s3780_s12 = scalar_lea.vmem %s3779_s8, 4096  ;;  %p3781_p0 = scmp.lt.s32.totalorder %s4582_s15, %s3779_s8 }
  0xaf   : > { %p3776_p5 = pnand %p3774_p12, %p4590_p7  ;;  %p3782_p11 = scmp.lt.s32.totalorder %s3780_s12, %s3773_s18 }
  0xb1   : > { %p3777_p9 = pneg %p3776_p5  ;;  %p3783_p6 = por %p3782_p11, %p3781_p0 }
  0xb3   : > { %p3784_p1 = pnand %p3783_p6, %p3777_p9 }
  0xb5   : > { %3787 = shalt.err (!%p3784_p1)
}
  0xb6   : > { %s5749_s20 = smov 8   ;;  %s5750_s10 = smov 128  }
  0xb7   : > { %3407 = dma.hbm_to_vmem [thread:$0]  (!%p4568_p13), %s4580_s14, 2048, %s4582_s15, %s5683_s19, %s5750_s10, %s5750_s10, %s5749_s20  }
  0xb8   : > { %s3346_s5 = smul.u32 12288, %s4184_s21  ;;  %s5752_s9 = sld [smem:[#allocation58_spill]] }
  0xb9   : > { %s5751_s27 = smul.u32 768, %s4573_s16  ;;  %s5687_s29 = scalar_lea.sflag [#allocation17], %s4509_s26 }
  0xbb   : > { %s687_s18 = scalar_lea.vmem [#allocation16], %s5751_s27 }
  0xbc   : > { %s694_s8 = sshll.u32 %s687_s18, 4  ;;  %s4626_s8 = int_to_ptr.vmem [resolvable:$true] %s694_s8 }
  0xbe   : > { %s4624_s28 = scalar_lea.hbm %s5752_s9, %s3346_s5  ;;  %s3793_s27 = scalar_lea.hbm %s5752_s9, 36864 }
  0xbf   : > { %s3788_s4 = scalar_lea.hbm %s4624_s28, 12288  ;;  %p3794_p2 = scmp.lt.u32.totalorder %s4624_s28, %s5752_s9 }
  0xc0   : > { %p3789_p11 = scmp.ne.s32.totalorder %s4624_s28, %s3788_s4  ;;  %p3795_p8 = scmp.lt.u32.totalorder %s3793_s27, %s3788_s4 }
  0xc1   : > { %p3797_p3 = scmp.lt.u32.totalorder %s3788_s4, %s4624_s28 }
  0xc2   : > { %p3791_p0 = pnand %p3789_p11, %p4590_p7  ;;  %p3796_p4 = por %p3795_p8, %p3794_p2 }
  0xc4   : > { %p3792_p10 = pneg %p3791_p0  ;;  %p3798_p12 = por %p3797_p3, %p3796_p4 }
  0xc6   : > { %p3799_p5 = pnand %p3798_p12, %p3792_p10 }
  0xc8   : > { %3802 = shalt.err (!%p3799_p5)
}
  0xc9   : > { %s3803_s5 = scalar_lea.vmem %s4626_s8, 12288  ;;  %s4200_s12 = smov [#allocation16]  }
  0xca   : > { %p3804_p9 = scmp.ne.s32.totalorder %s4626_s8, %s3803_s5  ;;  %s3808_s14 = sshll.u32 %s4200_s12, 4  ;;  %s3809_s14 = int_to_ptr.vmem [resolvable:$false] %s3808_s14 }
  0xcb   : > { %s3810_s15 = scalar_lea.vmem %s3809_s14, 24576  ;;  %p3811_p11 = scmp.lt.s32.totalorder %s4626_s8, %s3809_s14 }
  0xcc   : > { %p3806_p6 = pnand %p3804_p9, %p4590_p7  ;;  %p3812_p0 = scmp.lt.s32.totalorder %s3810_s15, %s3803_s5 }
  0xce   : > { %p3807_p1 = pneg %p3806_p6  ;;  %p3813_p2 = por %p3812_p0, %p3811_p11 }
  0xd0   : > { %p3814_p8 = pnand %p3813_p2, %p3807_p1 }
  0xd2   : > { %3817 = shalt.err (!%p3814_p8)
}
  0xd3   : > { %s4201_s4 = smov 256   ;;  %s4202_s27 = smov 16  }
  0xd4   : > { %3413 = dma.hbm_to_vmem [thread:$0]  (!%p4568_p13), %s4624_s28, 12288, %s4626_s8, %s5687_s29, %s4201_s4, %s4201_s4, %s4202_s27  }
  0xd5   : > { %s2828_s18 = sshll.u32 %s4573_s16, 8  ;;  %s2876_s7 = sshll.u32 %s4184_s21, 12 }
  0xd6   : > { %s4660_s14 = scalar_lea.hbm %s5633_s11, %s2876_s7  ;;  %s727_s15 = scalar_lea.vmem [#allocation19], %s2828_s18 }
  0xd7   : > { %s734_s19 = sshll.u32 %s727_s15, 4  ;;  %s4203_s9 = smov [#allocation12]   ;;  %s4662_s19 = int_to_ptr.vmem [resolvable:$true] %s734_s19 }
  0xd8   : > { %s4664_s2 = sshll.u32 %s4203_s9, 4  ;;  %s5692_s13 = scalar_lea.sflag [#allocation20], %s4509_s26  ;;  %s530_s2 = int_to_ptr.vmem [resolvable:$true] %s4664_s2 }
  0xd9   : > { %s3818_s28 = scalar_lea.hbm %s4660_s14, 4096  ;;  %s3823_s5 = scalar_lea.hbm %s5633_s11, 12288 }
  0xda   : > { %p3819_p10 = scmp.ne.s32.totalorder %s4660_s14, %s3818_s28  ;;  %p3824_p12 = scmp.lt.u32.totalorder %s4660_s14, %s5633_s11 }
  0xdb   : > { %p3825_p5 = scmp.lt.u32.totalorder %s3823_s5, %s3818_s28  ;;  %p3827_p6 = scmp.lt.u32.totalorder %s3818_s28, %s4660_s14 }
  0xdc   : > { %p3821_p4 = pnand %p3819_p10, %p4590_p7 }
  0xdd   : > { %p3826_p9 = por %p3825_p5, %p3824_p12 }
  0xde   : > { %p3822_p3 = pneg %p3821_p4 }
  0xdf   : > { %p3828_p1 = por %p3827_p6, %p3826_p9 }
  0xe1   : > { %p3829_p11 = pnand %p3828_p1, %p3822_p3 }
  0xe3   : > { %3832 = shalt.err (!%p3829_p11)
}
  0xe4   : > { %s3833_s9 = scalar_lea.vmem %s4662_s19, 4096  ;;  %s4204_s18 = smov [#allocation19]  }
  0xe5   : > { %p3834_p0 = scmp.ne.s32.totalorder %s4662_s19, %s3833_s9  ;;  %s3838_s15 = sshll.u32 %s4204_s18, 4  ;;  %s3839_s15 = int_to_ptr.vmem [resolvable:$false] %s3838_s15 }
  0xe6   : > { %s3840_s29 = scalar_lea.vmem %s3839_s15, 8192  ;;  %p3841_p10 = scmp.lt.s32.totalorder %s4662_s19, %s3839_s15 }
  0xe7   : > { %p3836_p2 = pnand %p3834_p0, %p4590_p7  ;;  %p3842_p4 = scmp.lt.s32.totalorder %s3840_s29, %s3833_s9 }
  0xe9   : > { %p3837_p8 = pneg %p3836_p2  ;;  %p3843_p12 = por %p3842_p4, %p3841_p10 }
  0xeb   : > { %p3844_p5 = pnand %p3843_p12, %p3837_p8 }
  0xed   : > { %3847 = shalt.err (!%p3844_p5)
}
  0xee   : > { %3419 = dma.hbm_to_vmem [thread:$0]  (!%p4568_p13), %s4660_s14, 4096, %s4662_s19, %s5692_s13, %s4201_s4, %s4201_s4, %s4202_s27  }
  0xef   : > { %s5753_s6 = sld [smem:[#allocation55_spill]]  ;;  %p5754_p9 = scmp.ne.s32.totalorder %s5727_s1, 0 }
  0xf5   : > { %s3848_s7 = scalar_lea.hbm %s5753_s6, 16 }
  0xf6   : > { %p3849_p3 = scmp.ne.s32.totalorder %s5753_s6, %s3848_s7  ;;  %p3855_p11 = scmp.lt.u32.totalorder %s3848_s7, %s5753_s6 }
  0xf8   : > { %p3851_p6 = pnand %p3849_p3, %p5754_p9 }
  0xfa   : > { %p3852_p1 = pneg %p3851_p6 }
  0xfc   : > { %p3857_p0 = pnand %p3855_p11, %p3852_p1 }
  0xfe   : > { %3860 = shalt.err (!%p3857_p0)
}
  0xff   : > { %s3861_s15 = scalar_lea.vmem %s530_s2, 16  ;;  %s3868_s19 = scalar_lea.vmem %s530_s2, 32 }
 0x100   : > { %p3862_p2 = scmp.ne.s32.totalorder %s530_s2, %s3861_s15  ;;  %p3869_p4 = scmp.lt.s32.totalorder %s530_s2, %s530_s2 }
 0x101   : > { %p3870_p12 = scmp.lt.s32.totalorder %s3868_s19, %s3861_s15 }
 0x102   : > { %p3864_p8 = pnand %p3862_p2, %p5754_p9 }
 0x103   : > { %p3871_p5 = por %p3870_p12, %p3869_p4 }
 0x104   : > { %p3865_p10 = pneg %p3864_p8 }
 0x106   : > { %p3872_p13 = pnand %p3871_p5, %p3865_p10 }
 0x108   : > { %3875 = shalt.err (!%p3872_p13)
}
 0x109   : > { %p5755_p3 = scmp.ne.s32.totalorder %s5725_s24, 0  ;;  %s4205_s14 = smov [#allocation24]  }
 0x10a   : > { %s553_s29 = sshll.u32 %s4205_s14, 4  ;;  %s5756_s7 = sld [smem:[#allocation62_spill]]  ;;  %s554_s29 = int_to_ptr.vmem [resolvable:$true] %s553_s29 }
 0x10b   : > { %3388 = dma.hbm_to_vmem [thread:$0]  (!%p5755_p3), %s5753_s6, 16, %s530_s2, [#allocation11]  }
 0x110   : > { %s3876_s5 = scalar_lea.hbm %s5756_s7, 16 }
 0x111   : > { %p3877_p6 = scmp.ne.s32.totalorder %s5756_s7, %s3876_s5  ;;  %p3883_p11 = scmp.lt.u32.totalorder %s3876_s5, %s5756_s7 }
 0x113   : > { %p3879_p13 = pnand %p3877_p6, %p5754_p9 }
 0x115   : > { %p3880_p1 = pneg %p3879_p13 }
 0x117   : > { %p3885_p0 = pnand %p3883_p11, %p3880_p1 }
 0x119   : > { %3888 = shalt.err (!%p3885_p0)
}
 0x11a   : > { %s3889_s2 = scalar_lea.vmem %s554_s29, 16  ;;  %s3896_s19 = scalar_lea.vmem %s554_s29, 32 }
 0x11b   : > { %p3890_p2 = scmp.ne.s32.totalorder %s554_s29, %s3889_s2  ;;  %p3897_p4 = scmp.lt.s32.totalorder %s554_s29, %s554_s29 }
 0x11c   : > { %p3898_p12 = scmp.lt.s32.totalorder %s3896_s19, %s3889_s2 }
 0x11d   : > { %p3892_p8 = pnand %p3890_p2, %p5754_p9 }
 0x11e   : > { %p3899_p5 = por %p3898_p12, %p3897_p4 }
 0x11f   : > { %p3893_p10 = pneg %p3892_p8 }
 0x121   : > { %p3900_p7 = pnand %p3899_p5, %p3893_p10 }
 0x123   : > { %3903 = shalt.err (!%p3900_p7)
}
 0x124   : > { %s5757_s14 = sld [smem:[#allocation37_spill]]  ;;  %s5758_s28 = sld [smem:[#allocation36_spill]] }
 0x125   : > { %s5759_s1 = sld [smem:[#allocation35_spill]]  ;;  %p5760_p9 = scmp.eq.s32.totalorder %s4483_s30, 0 }
 0x126   : > { %3394 = dma.hbm_to_vmem [thread:$0]  (!%p5755_p3), %s5756_s7, 16, %s554_s29, [#allocation23]  }
 0x127   : > { %p5761_p6 = scmp.eq.s32.totalorder %s4192_s23, 0  ;;  %s2873_s12 = sshll.u32 %s4188_s22, 10 }
 0x128   : > { %p5762_p11 = scmp.ne.s32.totalorder %s5722_s25, 0  ;;  %s5764_s19 = sld [smem:[#allocation50_spill]] }
 0x129   : > { %p5766_p3 = scmp.lt.s32.totalorder %s4192_s23, 6 }
 0x12a   : > { %s91_s8 = sadd.s32 1, %s5757_s14  ;;  %p98_p7 = scmp.ne.s32.totalorder %s5757_s14, %s5758_s28 }
 0x12b   : > { %s4736_s24 = scalar_select %p5760_p9, %s5757_s14, %s91_s8  }
 0x12c   : > { %p100_p13 = por %p5761_p6, %p98_p7  ;;  %p104_p1 = scmp.ne.s32.totalorder %s5758_s28, %s5759_s1 }
 0x12d   : > { %s578_s5 = sand.u32 1, %s5757_s14   ;;  %s5768_s28 = sand.u32 1, %s4160_s0  }
 0x12e   : > { %p4746_p0 = por %p5762_p11, %p104_p1  ;;  %s2815_s18 = sshll.u32 %s578_s5, 6 }
 0x12f   : > { %s5765_s4 = smov %s5764_s19  ;;  %s4753_s29 = scalar_lea.hbm %s5764_s19, %s2873_s12 }
 0x130   : > { %s5763_s9 = scalar_select %p4746_p0, 1, 0 }
 0x131   : > { %p4757_p2 = pnand %p5766_p3, %p100_p13  ;;  %s582_s27 = scalar_lea.vmem [#allocation5], %s2815_s18 }
 0x132   : > { %s589_s14 = sshll.u32 %s582_s27, 4  ;;  %s4763_s1 = scalar_lea.vmem [#allocation9], %s5768_s28  ;;  %s4766_s14 = int_to_ptr.vmem [resolvable:$true] %s589_s14 }
 0x133   : > { %s638_s8 = sshll.u32 %s4763_s1, 4  ;;  %s4768_s12 = scalar_lea.sflag [#allocation6], %s578_s5  ;;  %s639_s8 = int_to_ptr.vmem [resolvable:$true] %s638_s8 }
 0x134   : > { %s3904_s15 = scalar_lea.hbm %s4753_s29, 1024  ;;  %p3906_p10 = pneg %p4757_p2 }
 0x135   : > { %p3905_p8 = scmp.ne.s32.totalorder %s4753_s29, %s3904_s15  ;;  %s3909_s19 = scalar_lea.hbm %s5765_s4, 2048 }
 0x136   : > { %p3910_p5 = scmp.lt.u32.totalorder %s4753_s29, %s5765_s4  ;;  %p3911_p7 = scmp.lt.u32.totalorder %s3909_s19, %s3904_s15 }
 0x137   : > { %p3907_p4 = pnand %p3906_p10, %p3905_p8  ;;  %p3913_p6 = scmp.lt.u32.totalorder %s3904_s15, %s4753_s29 }
 0x138   : > { %p3912_p9 = por %p3911_p7, %p3910_p5 }
 0x139   : > { %p3908_p12 = pneg %p3907_p4 }
 0x13a   : > { %p3914_p13 = por %p3913_p6, %p3912_p9 }
 0x13c   : > { %p3915_p1 = pnand %p3914_p13, %p3908_p12 }
 0x13e   : > { %3918 = shalt.err (!%p3915_p1)
}
 0x13f   : > { %s3919_s5 = scalar_lea.vmem %s4766_s14, 1024  ;;  %s4206_s2 = smov [#allocation5]  }
 0x140   : > { %p3920_p11 = scmp.ne.s32.totalorder %s4766_s14, %s3919_s5  ;;  %s3924_s18 = sshll.u32 %s4206_s2, 4  ;;  %s3925_s18 = int_to_ptr.vmem [resolvable:$false] %s3924_s18 }
 0x141   : > { %s3926_s27 = scalar_lea.vmem %s3925_s18, 2048  ;;  %p3927_p4 = scmp.lt.s32.totalorder %s4766_s14, %s3925_s18 }
 0x142   : > { %p3922_p3 = pnand %p3920_p11, %p3906_p10  ;;  %p3928_p5 = scmp.lt.s32.totalorder %s3926_s27, %s3919_s5 }
 0x144   : > { %p3923_p8 = pneg %p3922_p3  ;;  %p3929_p7 = por %p3928_p5, %p3927_p4 }
 0x146   : > { %p3930_p9 = pnand %p3929_p7, %p3923_p8 }
 0x148   : > { %3933 = shalt.err (!%p3930_p9)
}
 0x149   : > { %s5769_s15 = sld [smem:[#allocation48_spill]]  ;;  %s5770_s19 = sld [smem:[#allocation47_spill]] }
 0x14a   : > { %3398 = dma.hbm_to_vmem [thread:$0]  (!%p4757_p2), %s4753_s29, 1024, %s4766_s14, %s4768_s12, %s5750_s10, %s5750_s10, %s5749_s20  }
 0x14b   : > { %s5773_s2 = sld [smem:[#allocation53_spill]] }
 0x14f   : > { %s3934_s28 = scalar_lea.hbm %s5769_s15, 16  ;;  %p5771_p12 = scmp.ne.s32.totalorder %s5770_s19, 0 }
 0x150   : > { %p3935_p10 = scmp.ne.s32.totalorder %s5769_s15, %s3934_s28  ;;  %p3943_p4 = scmp.lt.u32.totalorder %s3934_s28, %s5769_s15 }
 0x151   : > { %p5772_p6 = pneg %p5771_p12  ;;  %s3939_s18 = scalar_lea.hbm %s5773_s2, 96 }
 0x152   : > { %p3940_p11 = scmp.lt.u32.totalorder %s5769_s15, %s5773_s2  ;;  %p3941_p3 = scmp.lt.u32.totalorder %s3939_s18, %s3934_s28 }
 0x153   : > { %p3937_p13 = pnand %p3935_p10, %p5772_p6 }
 0x154   : > { %p3942_p8 = por %p3941_p3, %p3940_p11 }
 0x155   : > { %p3938_p1 = pneg %p3937_p13 }
 0x156   : > { %p3944_p2 = por %p3943_p4, %p3942_p8 }
 0x158   : > { %p3945_p5 = pnand %p3944_p2, %p3938_p1 }
 0x15a   : > { %3948 = shalt.err (!%p3945_p5)
}
 0x15b   : > { %s3949_s20 = scalar_lea.vmem %s639_s8, 16  ;;  %p5774_p9 = pmov %p5772_p6 }
 0x15c   : > { %p3950_p7 = scmp.ne.s32.totalorder %s639_s8, %s3949_s20  ;;  %s4207_s10 = smov [#allocation9]  }
 0x15d   : > { %s3954_s29 = sshll.u32 %s4207_s10, 4  ;;  %s3955_s29 = int_to_ptr.vmem [resolvable:$false] %s3954_s29 }
 0x15e   : > { %p3952_p10 = pnand %p3950_p7, %p5774_p9  ;;  %s3956_s14 = scalar_lea.vmem %s3955_s29, 32 }
 0x15f   : > { %p3957_p13 = scmp.lt.s32.totalorder %s639_s8, %s3955_s29  ;;  %p3958_p0 = scmp.lt.s32.totalorder %s3956_s14, %s3949_s20 }
 0x160   : > { %p3953_p6 = pneg %p3952_p10 }
 0x161   : > { %p3959_p3 = por %p3958_p0, %p3957_p13 }
 0x163   : > { %p3960_p11 = pnand %p3959_p3, %p3953_p6 }
 0x165   : > { %3963 = shalt.err (!%p3960_p11)
}
 0x166   : > { %s5775_s13 = scalar_lea.sflag [#allocation8], %s4509_s26  ;;  %s2823_s1 = sshll.u32 %s4184_s21, 4 }
 0x167   : > { %3404 = dma.hbm_to_vmem [thread:$0]  (!%p5771_p12), %s5769_s15, 16, %s639_s8, %s5775_s13  }
 0x168   : > { %s669_s12 = scalar_lea.vmem [#allocation15], %s4573_s16  ;;  %s5776_s2 = sld [smem:[#allocation57_spill]] }
 0x169   : > { %s676_s28 = sshll.u32 %s669_s12, 4  ;;  %p5777_p1 = scmp.ne.s32.totalorder %s5748_s3, 0  ;;  %s677_s28 = int_to_ptr.vmem [resolvable:$true] %s676_s28 }
 0x16e   : > { %s674_s18 = scalar_lea.hbm %s5776_s2, %s2823_s1  ;;  %s3969_s10 = scalar_lea.hbm %s5776_s2, 48 }
 0x16f   : > { %s3964_s27 = scalar_lea.hbm %s674_s18, 16  ;;  %p3970_p12 = scmp.lt.u32.totalorder %s674_s18, %s5776_s2 }
 0x170   : > { %p3965_p0 = scmp.ne.s32.totalorder %s674_s18, %s3964_s27  ;;  %p3971_p2 = scmp.lt.u32.totalorder %s3969_s10, %s3964_s27 }
 0x171   : > { %p3973_p7 = scmp.lt.u32.totalorder %s3964_s27, %s674_s18 }
 0x172   : > { %p3967_p8 = pnand %p3965_p0, %p5777_p1  ;;  %p3972_p5 = por %p3971_p2, %p3970_p12 }
 0x174   : > { %p3968_p4 = pneg %p3967_p8  ;;  %p3974_p9 = por %p3973_p7, %p3972_p5 }
 0x176   : > { %p3975_p10 = pnand %p3974_p9, %p3968_p4 }
 0x178   : > { %3978 = shalt.err (!%p3975_p10)
}
 0x179   : > { %s3979_s8 = scalar_lea.vmem %s677_s28, 16  ;;  %s4208_s15 = smov [#allocation15]  }
 0x17a   : > { %p3980_p6 = scmp.ne.s32.totalorder %s677_s28, %s3979_s8  ;;  %s3984_s13 = sshll.u32 %s4208_s15, 4  ;;  %s3985_s13 = int_to_ptr.vmem [resolvable:$false] %s3984_s13 }
 0x17b   : > { %s3986_s1 = scalar_lea.vmem %s3985_s13, 32  ;;  %p3987_p11 = scmp.lt.s32.totalorder %s677_s28, %s3985_s13 }
 0x17c   : > { %p3982_p13 = pnand %p3980_p6, %p5777_p1  ;;  %p3988_p0 = scmp.lt.s32.totalorder %s3986_s1, %s3979_s8 }
 0x17e   : > { %p3983_p3 = pneg %p3982_p13  ;;  %p3989_p8 = por %p3988_p0, %p3987_p11 }
 0x180   : > { %p3990_p2 = pnand %p3989_p8, %p3983_p3 }
 0x182   : > { %3993 = shalt.err (!%p3990_p2)
}
 0x183   : > { %p5778_p12 = scmp.ne.s32.totalorder %s5746_s17, 0  ;;  %s5779_s12 = scalar_lea.sflag [#allocation14], %s4509_s26 }
 0x184   : > { %s2825_s30 = sshll.u32 %s4573_s16, 1  ;;  %s2875_s5 = sshll.u32 %s4184_s21, 5 }
 0x185   : > { %3410 = dma.hbm_to_vmem [thread:$0]  (!%p5778_p12), %s674_s18, 16, %s677_s28, %s5779_s12  }
 0x186   : > { %s5780_s20 = sld [smem:[#allocation59_spill]]  ;;  %s708_s14 = scalar_lea.vmem [#allocation18], %s2825_s30 }
 0x187   : > { %s716_s8 = sshll.u32 %s708_s14, 4  ;;  %s5782_s1 = sld [smem:[#allocation60_spill]]  ;;  %s717_s8 = int_to_ptr.vmem [resolvable:$true] %s716_s8 }
 0x18c   : > { %s5781_s10 = smov %s5780_s20  ;;  %s4846_s29 = scalar_lea.hbm %s5780_s20, %s2875_s5 }
 0x18d   : > { %s5783_s2 = smov %s5782_s1  ;;  %s4853_s4 = scalar_lea.hbm %s5782_s1, %s2875_s5 }
 0x18e   : > { %s3994_s28 = scalar_lea.hbm %s4846_s29, 32  ;;  %s3999_s27 = scalar_lea.hbm %s5781_s10, 96 }
 0x18f   : > { %p3995_p4 = scmp.ne.s32.totalorder %s4846_s29, %s3994_s28  ;;  %p4000_p9 = scmp.lt.u32.totalorder %s4846_s29, %s5781_s10 }
 0x190   : > { %p4001_p10 = scmp.lt.u32.totalorder %s3999_s27, %s3994_s28  ;;  %p4003_p13 = scmp.lt.u32.totalorder %s3994_s28, %s4846_s29 }
 0x191   : > { %p3997_p5 = pnand %p3995_p4, %p5777_p1 }
 0x192   : > { %p4002_p6 = por %p4001_p10, %p4000_p9 }
 0x193   : > { %p3998_p7 = pneg %p3997_p5 }
 0x194   : > { %p4004_p3 = por %p4003_p13, %p4002_p6 }
 0x196   : > { %p4005_p11 = pnand %p4004_p3, %p3998_p7 }
 0x198   : > { %4008 = shalt.err (!%p4005_p11)
}
 0x199   : > { %s4009_s5 = scalar_lea.vmem %s717_s8, 32  ;;  %s4209_s14 = smov [#allocation18]  }
 0x19a   : > { %p4010_p0 = scmp.ne.s32.totalorder %s717_s8, %s4009_s5  ;;  %s4014_s15 = sshll.u32 %s4209_s14, 4  ;;  %s4015_s15 = int_to_ptr.vmem [resolvable:$false] %s4014_s15 }
 0x19b   : > { %s4016_s13 = scalar_lea.vmem %s4015_s15, 64  ;;  %p4017_p4 = scmp.lt.s32.totalorder %s717_s8, %s4015_s15 }
 0x19c   : > { %p4012_p8 = pnand %p4010_p0, %p5777_p1  ;;  %p4018_p5 = scmp.lt.s32.totalorder %s4016_s13, %s4009_s5 }
 0x19e   : > { %p4013_p2 = pneg %p4012_p8  ;;  %p4019_p12 = por %p4018_p5, %p4017_p4 }
 0x1a0   : > { %p4020_p9 = pnand %p4019_p12, %p4013_p2 }
 0x1a2   : > { %4023 = shalt.err (!%p4020_p9)
}
 0x1a3   : > { %p5784_p10 = scmp.ne.s32.totalorder %s5746_s17, 0  ;;  %s5785_s1 = scalar_lea.sflag [#allocation17], %s4509_s26 }
 0x1a4   : > { %s748_s28 = scalar_lea.vmem [#allocation21], %s2825_s30  ;;  %s4024_s12 = scalar_lea.hbm %s4853_s4, 32 }
 0x1a5   : > { %3416 = dma.hbm_to_vmem [thread:$0]  (!%p5784_p10), %s4846_s29, 32, %s717_s8, %s5785_s1  }
 0x1a6   : > { %s756_s18 = sshll.u32 %s748_s28, 4  ;;  %p4025_p7 = scmp.ne.s32.totalorder %s4853_s4, %s4024_s12  ;;  %s757_s18 = int_to_ptr.vmem [resolvable:$true] %s756_s18 }
 0x1a7   : > { %s4029_s20 = scalar_lea.hbm %s5783_s2, 96  ;;  %p4030_p13 = scmp.lt.u32.totalorder %s4853_s4, %s5783_s2 }
 0x1a8   : > { %p4027_p12 = pnand %p4025_p7, %p5777_p1  ;;  %p4031_p3 = scmp.lt.u32.totalorder %s4029_s20, %s4024_s12 }
 0x1a9   : > { %p4033_p0 = scmp.lt.u32.totalorder %s4024_s12, %s4853_s4 }
 0x1aa   : > { %p4028_p6 = pneg %p4027_p12  ;;  %p4032_p11 = por %p4031_p3, %p4030_p13 }
 0x1ac   : > { %p4034_p8 = por %p4033_p0, %p4032_p11 }
 0x1ae   : > { %p4035_p2 = pnand %p4034_p8, %p4028_p6 }
 0x1b0   : > { %4038 = shalt.err (!%p4035_p2)
}
 0x1b1   : > { %s4039_s16 = scalar_lea.vmem %s757_s18, 32  ;;  %s4210_s30 = smov [#allocation21]  }
 0x1b2   : > { %p4040_p4 = scmp.ne.s32.totalorder %s757_s18, %s4039_s16  ;;  %s4044_s29 = sshll.u32 %s4210_s30, 4  ;;  %s4045_s29 = int_to_ptr.vmem [resolvable:$false] %s4044_s29 }
 0x1b3   : > { %s4046_s8 = scalar_lea.vmem %s4045_s29, 64  ;;  %p4047_p7 = scmp.lt.s32.totalorder %s757_s18, %s4045_s29 }
 0x1b4   : > { %p4042_p5 = pnand %p4040_p4, %p5777_p1  ;;  %p4048_p12 = scmp.lt.s32.totalorder %s4046_s8, %s4039_s16 }
 0x1b6   : > { %p4043_p9 = pneg %p4042_p5  ;;  %p4049_p10 = por %p4048_p12, %p4047_p7 }
 0x1b8   : > { %p4050_p3 = pnand %p4049_p10, %p4043_p9 }
 0x1ba   : > { %4053 = shalt.err (!%p4050_p3)
}
 0x1bb   : > { %p5786_p13 = scmp.ne.s32.totalorder %s5746_s17, 0  ;;  %s5787_s15 = scalar_lea.sflag [#allocation20], %s4509_s26 }
 0x1bc   : > { %s5788_s13 = sld [smem:[#allocation40_spill]] }
 0x1bd   : > { %3422 = dma.hbm_to_vmem [thread:$0]  (!%p5786_p13), %s4853_s4, 32, %s757_s18, %s5787_s15  }
 0x1c2   : > { %p5789_p6 = scmp.ne.s32.totalorder %s5788_s13, 0 }
 0x1c3   : > { %s5790_s3 = sld [smem:[#allocation36_spill]] (!%p5789_p6)  ;;  %p5791_p1 = scmp.ne.s32.totalorder (!%p5789_p6), %s5763_s9, 0 }
 0x1c4   : > { %765 = sbr.rel (%p5789_p6) target bundleno = 2086 (0x826), region = 88 }
 0x1c9   : > { %s767_s1 = sand.u32 (!%p5789_p6), 1, %s5790_s3  }
 0x1ca   : > { %s2835_s28 = sshll.u32 (!%p5789_p6), %s767_s1, 6  ;;  %s768_s12 = scalar_lea.sflag (!%p5789_p6), [#allocation6], %s767_s1 }
 0x1cb   : > { %s4898_s27 = scalar_lea.vmem [#allocation5], %s2835_s28 }
 0x1cc   : > { %4111 = dma.done.wait (%p5791_p1), %s768_s12, 1024  }
 0x1cd   : > { %4113 = vsyncadd (%p5791_p1), %s768_s12, 4294966272  ;;  %s5792_s17 = sadd.s32 4294967295, %s4192_s23   ;;  %s5793_s26 = sld [smem:[#allocation34_spill]] }
 0x1ce   : > { %s5794_s19 = sld [smem:[#allocation43_spill]]  ;;  %s776_s4 = sand.u32 1, %s5792_s17  }
 0x1cf   : > { %s777_s20 = scalar_lea.sflag [#allocation8], %s776_s4 }
 0x1d3   : > { %s778_s18 = sand.u32 1, %s5793_s26  }
 0x1d4   : > { %s4907_s5 = scalar_lea.vmem [#allocation7], %s778_s18  ;;  %p5795_p10 = scmp.ne.s32.totalorder %s5794_s19, 0 }
 0x1d6   : > { %4115 = dma.done.wait (%p5795_p10), %s777_s20, 32  }
 0x1d7   : > { %4117 = vsyncadd (%p5795_p10), %s777_s20, 4294967264  ;;  %s4913_s14 = scalar_lea.vmem [#allocation9], %s778_s18  ;;  %p5796_p11 = scmp.ne.s32.totalorder %s5722_s25, 0 }
 0x1d9   : > { %4119 = dma.done.wait (%p5796_p11), [#allocation11], 32  }
 0x1da   : > { %4121 = vsyncadd (%p5796_p11), [#allocation11], 4294967264  ;;  %s5797_s9 = sld [smem:[#allocation32_spill]]  ;;  %s5798_s16 = sld [smem:[#allocation46_spill]] }
 0x1db   : > { %s801_s8 = scalar_lea.sflag [#allocation14], %s776_s4 }
 0x1e0   : > { %s4920_s30 = sand.u32 1, %s5797_s9   ;;  %p5799_p0 = scmp.ne.s32.totalorder %s5798_s16, 0 }
 0x1e1   : > { %s2838_s29 = sshll.u32 %s4920_s30, 7 }
 0x1e2   : > { %s4923_s15 = scalar_lea.vmem [#allocation13], %s2838_s29 }
 0x1e3   : > { %4123 = dma.done.wait (%p5799_p0), %s801_s8, 2064  }
 0x1e4   : > { %4125 = vsyncadd (%p5799_p0), %s801_s8, 4294965232  ;;  %s3347_s13 = smul.u32 768, %s4920_s30  ;;  %s818_s1 = scalar_lea.sflag [#allocation17], %s776_s4 }
 0x1e6   : > { %s4931_s28 = scalar_lea.vmem [#allocation16], %s3347_s13 }
 0x1e7   : > { %4127 = dma.done.wait (%p5799_p0), %s818_s1, 12320  }
 0x1e8   : > { %4129 = vsyncadd (%p5799_p0), %s818_s1, 4294954976  ;;  %s2839_s12 = sshll.u32 %s4920_s30, 1  ;;  %s2840_s17 = sshll.u32 %s4920_s30, 8 }
 0x1e9   : > { %s4939_s26 = scalar_lea.vmem [#allocation18], %s2839_s12  ;;  %s836_s19 = scalar_lea.sflag [#allocation20], %s776_s4 }
 0x1ea   : > { %s4941_s18 = scalar_lea.vmem [#allocation19], %s2840_s17 }
 0x1eb   : > { %4131 = dma.done.wait (%p5799_p0), %s836_s19, 4128  }
 0x1ec   : > { %4133 = vsyncadd (%p5799_p0), %s836_s19, 4294963168  ;;  %s4947_s20 = scalar_lea.vmem [#allocation21], %s2839_s12 }
 0x1ed   : > { %4135 = dma.done.wait (%p5796_p11), [#allocation23], 2064  }
 0x1ee   : > { %4137 = vsyncadd (%p5796_p11), [#allocation23], 4294965232  ;;  %s5800_s9 = sld [smem:[#allocation39_spill]]  ;;  %s5801_s13 = sld [smem:[#allocation49_spill]] }
 0x1ef   : > { %s5802_s19 = sld [smem:[#allocation51_spill]]  ;;  %s5803_s6 = sld [smem:[#allocation64_spill]] }
 0x1f0   : > { %s5804_s25 = sld [smem:[#allocation38_spill]] }
 0x1f4   : > { %p954_p8 = scmp.lt.s32.totalorder %s5800_s9, 1 }
 0x1f6   : > { %s5832_s9 = smov (!%p954_p8, %s5800_s9), 1  ;;  %p2850_p2 = scmp.ne.s32.totalorder %s5804_s25, 0 }
 0x1f7   : > { %s2878_s4 = sshll.u32 %s5832_s9, 6  ;;  %v4211_v4 = vmov (!%p2850_p2), 0   ;;  %v4212_v18 = vmov (!%p2850_p2), 0.0   ;;  %v2851_v19 = vld [vmem:[#allocation10] ss:$0 sm:$0xff] (!%p2850_p2) }
 0x1f8   : > { %s958_s1 = scalar_lea.vmem %s5801_s13, %s2878_s4  ;;  %s4961_s3 = scalar_lea.vmem %s5802_s19, %s2878_s4  ;;  %3557 = vset.pattern.permute.xlu1 (!%p2850_p2), %v4211_v4  ;;  %3556 = vset.pattern.permute.xlu0 (!%p2850_p2), %v4211_v4  ;;  %1155 = vst [vmem:[#allocation3] sm:$0xff] (!%p2850_p2), %v4212_v18  ;;  %1156 = vst [vmem:[#allocation3 + $0x8] sm:$0xff] (!%p2850_p2), %v4212_v18  ;;  %v2852_v20 = vld [vmem:[#allocation12] ss:$0 sm:$0xff] (!%p2850_p2) }
 0x1f9   : > { %s4966_s7 = scalar_lea.vmem %s5803_s6, %s2878_s4  ;;  %972 = sbr.rel (%p2850_p2) target bundleno = 689 (0x2b1), region = 144  ;;  %v975_v1 = vld [vmem:[%s958_s1 + $0x10] sm:$0xff] (!%p2850_p2)  ;;  %v973_v2 = vld [vmem:[%s958_s1] sm:$0xff] (!%p2850_p2)  ;;  %v976_v3 = vld [vmem:[%s958_s1 + $0x18] sm:$0xff] (!%p2850_p2)  ;;  %1157 = vst [vmem:[#allocation3 + $0x10] sm:$0xff] (!%p2850_p2), %v4212_v18 }
 0x1fa   : > { %v983_v5 = vmul.f32 (!%p2850_p2), 0.00125, %v975_v1  ;;  %v981_v6 = vmul.f32 (!%p2850_p2), 0.00125, %v973_v2  ;;  %v974_v7 = vld [vmem:[%s958_s1 + $0x8] sm:$0xff] (!%p2850_p2)  ;;  %v977_v11 = vld [vmem:[%s958_s1 + $0x20] sm:$0xff] (!%p2850_p2) }
 0x1fb   : > { %v984_v8 = vmul.f32 (!%p2850_p2), 0.00125, %v976_v3  ;;  %v982_v9 = vmul.f32 (!%p2850_p2), 0.00125, %v974_v7  ;;  %v978_v10 = vld [vmem:[%s958_s1 + $0x28] sm:$0xff] (!%p2850_p2)  ;;  %v980_v14 = vld [vmem:[%s958_s1 + $0x38] sm:$0xff] (!%p2850_p2) }
 0x1fc   : > { %1002 = vperm.xlu1 (!%p2850_p2), %3557, %v983_v5   ;;  %992 = vperm.xlu0 (!%p2850_p2), %3556, %v981_v6   ;;  %v986_v12 = vmul.f32 (!%p2850_p2), 0.00125, %v978_v10  ;;  %v985_v13 = vmul.f32 (!%p2850_p2), 0.00125, %v977_v11  ;;  %v979_v15 = vld [vmem:[%s958_s1 + $0x30] sm:$0xff] (!%p2850_p2)  ;;  %1158 = vst [vmem:[#allocation3 + $0x18] sm:$0xff] (!%p2850_p2), %v4212_v18 }
 0x1fd   : > { %v988_v16 = vmul.f32 (!%p2850_p2), 0.00125, %v980_v14  ;;  %v987_v17 = vmul.f32 (!%p2850_p2), 0.00125, %v979_v15  ;;  %1159 = vst [vmem:[#allocation3 + $0x20] sm:$0xff] (!%p2850_p2), %v4212_v18  ;;  %1160 = vst [vmem:[#allocation3 + $0x28] sm:$0xff] (!%p2850_p2), %v4212_v18 }
 0x1fe   : > { %1161 = vst [vmem:[#allocation3 + $0x30] sm:$0xff] (!%p2850_p2), %v4212_v18  ;;  %1162 = vst [vmem:[#allocation3 + $0x38] sm:$0xff] (!%p2850_p2), %v4212_v18 }
 0x200   : > { %1007 = vperm.xlu1 %3557, %v984_v8   ;;  %997 = vperm.xlu0 %3556, %v982_v9  }
 0x204   : > { %1017 = vperm.xlu1 %3557, %v986_v12   ;;  %1012 = vperm.xlu0 %3556, %v985_v13  }
 0x208   : > { %1027 = vperm.xlu1 %3557, %v988_v16   ;;  %1022 = vperm.xlu0 %3556, %v987_v17  }
 0x27b   : > { %v1003_v21 = vpop.permute.xlu1 %1002  ;;  %v993_v22 = vpop.permute.xlu0 %992 }
 0x27c   : > { %v1038_v23 = vmul.f32 %v2851_v19, %v1003_v21  ;;  %v1036_v24 = vmul.f32 %v2851_v19, %v993_v22 }
 0x27e   : > { %v4969_v25 = vadd.f32 %v2852_v20, %v1038_v23  ;;  %v4971_v26 = vadd.f32 %v2852_v20, %v1036_v24 }
 0x27f   : > { %v1008_v27 = vpop.permute.xlu1 %1007  ;;  %v998_v28 = vpop.permute.xlu0 %997 }
 0x280   : > { %v1061_v29 = vmin.f32 %v4969_v25, 15.0  ;;  %v1059_v30 = vmin.f32 %v4971_v26, 15.0  ;;  %v1039_v31 = vmul.f32 %v2851_v19, %v1008_v27  ;;  %v1037_v32 = vmul.f32 %v2851_v19, %v998_v28 }
 0x281   : > { %vm1101_vm0 = vcmp.gt.f32.partialorder %v4969_v25, 15.0  ;;  %vm1099_vm1 = vcmp.gt.f32.partialorder %v4971_v26, 15.0 }
 0x282   : > { %v1071_v33 = vmul.f32 1.442695, %v1061_v29  ;;  %v1067_v34 = vmul.f32 1.442695, %v1059_v30  ;;  %v4975_v35 = vadd.f32 %v2852_v20, %v1039_v31  ;;  %v4977_v36 = vadd.f32 %v2852_v20, %v1037_v32 }
 0x283   : > { %v1018_v37 = vpop.permute.xlu1 %1017  ;;  %v1013_v38 = vpop.permute.xlu0 %1012 }
 0x284   : > { %3558 = vpow2.f32 %v1071_v33  ;;  %v1041_v39 = vmul.f32 %v2851_v19, %v1018_v37  ;;  %v1040_v40 = vmul.f32 %v2851_v19, %v1013_v38  ;;  %v1062_v41 = vmin.f32 %v4975_v35, 15.0 }
 0x285   : > { %3560 = vpow2.f32 %v1067_v34  ;;  %v1060_v42 = vmin.f32 %v4977_v36, 15.0  ;;  %vm1102_vm2 = vcmp.gt.f32.partialorder %v4975_v35, 15.0  ;;  %vm1100_vm3 = vcmp.gt.f32.partialorder %v4977_v36, 15.0 }
 0x286   : > { %v4981_v43 = vadd.f32 %v2852_v20, %v1041_v39  ;;  %v4983_v44 = vadd.f32 %v2852_v20, %v1040_v40  ;;  %v1073_v45 = vmul.f32 1.442695, %v1062_v41 }
 0x287   : > { %v1069_v46 = vmul.f32 1.442695, %v1060_v42  ;;  %v1028_v47 = vpop.permute.xlu1 %1027  ;;  %v1023_v48 = vpop.permute.xlu0 %1022 }
 0x288   : > { %v1064_v49 = vmin.f32 %v4981_v43, 15.0  ;;  %v1063_v50 = vmin.f32 %v4983_v44, 15.0  ;;  %3562 = vpow2.f32 %v1073_v45  ;;  %v1043_v51 = vmul.f32 %v2851_v19, %v1028_v47 }
 0x289   : > { %v1042_v52 = vmul.f32 %v2851_v19, %v1023_v48  ;;  %3564 = vpow2.f32 %v1069_v46  ;;  %vm1104_vm4 = vcmp.gt.f32.partialorder %v4981_v43, 15.0  ;;  %vm1103_vm5 = vcmp.gt.f32.partialorder %v4983_v44, 15.0 }
 0x28a   : > { %v1077_v53 = vmul.f32 1.442695, %v1064_v49  ;;  %v1075_v54 = vmul.f32 1.442695, %v1063_v50  ;;  %v4987_v55 = vadd.f32 %v2852_v20, %v1043_v51 }
 0x28b   : > { %v4989_v56 = vadd.f32 %v2852_v20, %v1042_v52 }
 0x28c   : > { %3566 = vpow2.f32 %v1077_v53  ;;  %v1066_v57 = vmin.f32 %v4987_v55, 15.0  ;;  %vm1106_vm6 = vcmp.gt.f32.partialorder %v4987_v55, 15.0 }
 0x28d   : > { %3568 = vpow2.f32 %v1075_v54  ;;  %v1065_v58 = vmin.f32 %v4989_v56, 15.0  ;;  %vm1105_vm7 = vcmp.gt.f32.partialorder %v4989_v56, 15.0 }
 0x28e   : > { %v3559_v59 = vpop.eup %3558  ;;  %v1081_v62 = vmul.f32 1.442695, %v1066_v57 }
 0x28f   : > { %v3561_v60 = vpop.eup %3560  ;;  %v1085_v61 = vadd.f32 2.0, %v3559_v59  ;;  %v1079_v63 = vmul.f32 1.442695, %v1065_v58 }
 0x290   : > { %v1083_v0 = vadd.f32 2.0, %v3561_v60  ;;  %3570 = vpow2.f32 %v1081_v62 }
 0x291   : > { %v1093_v1 = vmul.f32 %v3559_v59, %v1085_v61  ;;  %3572 = vpow2.f32 %v1079_v63 }
 0x292   : > { %v1091_v2 = vmul.f32 %v3561_v60, %v1083_v0  ;;  %v3563_v3 = vpop.eup %3562 }
 0x293   : > { %v1117_v4 = vadd.f32 2.0, %v1093_v1  ;;  %v3565_v5 = vpop.eup %3564  ;;  %v1086_v7 = vadd.f32 2.0, %v3563_v3  ;;  %v1109_v27 = vmul.f32 %v1093_v1, %v4969_v25 }
 0x294   : > { %v1115_v6 = vadd.f32 2.0, %v1091_v2  ;;  %v1084_v8 = vadd.f32 2.0, %v3565_v5  ;;  %v1107_v30 = vmul.f32 %v1091_v2, %v4971_v26 }
 0x295   : > { %3574 = vrcp.f32 %v1117_v4  ;;  %v1094_v10 = vmul.f32 %v3563_v3, %v1086_v7 }
 0x296   : > { %v3567_v9 = vpop.eup %3566  ;;  %3576 = vrcp.f32 %v1115_v6  ;;  %v1092_v12 = vmul.f32 %v3565_v5, %v1084_v8 }
 0x297   : > { %v3569_v11 = vpop.eup %3568  ;;  %v1088_v13 = vadd.f32 2.0, %v3567_v9  ;;  %v1118_v14 = vadd.f32 2.0, %v1094_v10  ;;  %v1110_v41 = vmul.f32 %v1094_v10, %v4975_v35 }
 0x298   : > { %v1087_v15 = vadd.f32 2.0, %v3569_v11  ;;  %v1116_v16 = vadd.f32 2.0, %v1092_v12  ;;  %v1108_v45 = vmul.f32 %v1092_v12, %v4977_v36 }
 0x299   : > { %v1096_v17 = vmul.f32 %v3567_v9, %v1088_v13  ;;  %3578 = vrcp.f32 %v1118_v14 }
 0x29a   : > { %v1095_v18 = vmul.f32 %v3569_v11, %v1087_v15  ;;  %v3571_v19 = vpop.eup %3570  ;;  %3580 = vrcp.f32 %v1116_v16 }
 0x29b   : > { %v1120_v20 = vadd.f32 2.0, %v1096_v17  ;;  %v3573_v21 = vpop.eup %3572  ;;  %v1090_v23 = vadd.f32 2.0, %v3571_v19 }
 0x29c   : > { %v1119_v22 = vadd.f32 2.0, %v1095_v18  ;;  %v1089_v24 = vadd.f32 2.0, %v3573_v21 }
 0x29d   : > { %3582 = vrcp.f32 %v1120_v20  ;;  %v1098_v28 = vmul.f32 %v3571_v19, %v1090_v23 }
 0x29e   : > { %3584 = vrcp.f32 %v1119_v22  ;;  %v1097_v31 = vmul.f32 %v3573_v21, %v1089_v24 }
 0x29f   : > { %v3575_v29 = vpop.eup %3574  ;;  %v1122_v34 = vadd.f32 2.0, %v1098_v28  ;;  %v1114_v58 = vmul.f32 %v1098_v28, %v4987_v55 }
 0x2a0   : > { %v3577_v32 = vpop.eup %3576  ;;  %v1128_v33 = vmul.f32 %v3575_v29, %v1109_v27  ;;  %v1121_v38 = vadd.f32 2.0, %v1097_v31  ;;  %v1113_v60 = vmul.f32 %v1097_v31, %v4989_v56 }
 0x2a1   : > { %v1124_v37 = vmul.f32 %v3577_v32, %v1107_v30  ;;  %3586 = vrcp.f32 %v1122_v34 }
 0x2a2   : > { %v1141_v39 = vsel %vm1101_vm0, %v4969_v25, %v1128_v33  ;;  %3588 = vrcp.f32 %v1121_v38  ;;  %v1112_v25 = vmul.f32 %v1096_v17, %v4981_v43 }
 0x2a3   : > { %1149 = vst [vmem:[#allocation2 + $0x10] sm:$0xff] %v1141_v39  ;;  %v1139_v40 = vsel %vm1099_vm1, %v4971_v26, %v1124_v37  ;;  %v3579_v42 = vpop.eup %3578  ;;  %v1111_v26 = vmul.f32 %v1095_v18, %v4983_v44 }
 0x2a4   : > { %1147 = vst [vmem:[#allocation2] sm:$0xff] %v1139_v40  ;;  %v3581_v46 = vpop.eup %3580  ;;  %v1130_v47 = vmul.f32 %v3579_v42, %v1110_v41 }
 0x2a5   : > { %v1126_v48 = vmul.f32 %v3581_v46, %v1108_v45 }
 0x2a6   : > { %v1142_v50 = vsel %vm1102_vm2, %v4975_v35, %v1130_v47 }
 0x2a7   : > { %v3583_v49 = vpop.eup %3582  ;;  %1150 = vst [vmem:[#allocation2 + $0x18] sm:$0xff] %v1142_v50  ;;  %v1140_v52 = vsel %vm1100_vm3, %v4977_v36, %v1126_v48 }
 0x2a8   : > { %v3585_v51 = vpop.eup %3584  ;;  %v1134_v53 = vmul.f32 %v3583_v49, %v1112_v25  ;;  %1148 = vst [vmem:[#allocation2 + $0x8] sm:$0xff] %v1140_v52 }
 0x2a9   : > { %v1132_v54 = vmul.f32 %v3585_v51, %v1111_v26 }
 0x2aa   : > { %v1144_v57 = vsel %vm1104_vm4, %v4981_v43, %v1134_v53 }
 0x2ab   : > { %1152 = vst [vmem:[#allocation2 + $0x28] sm:$0xff] %v1144_v57  ;;  %v1143_v35 = vsel %vm1103_vm5, %v4983_v44, %v1132_v54  ;;  %v3587_v59 = vpop.eup %3586 }
 0x2ac   : > { %1151 = vst [vmem:[#allocation2 + $0x20] sm:$0xff] %v1143_v35  ;;  %v3589_v61 = vpop.eup %3588  ;;  %v1138_v36 = vmul.f32 %v3587_v59, %v1114_v58 }
 0x2ad   : > { %v1136_v62 = vmul.f32 %v3589_v61, %v1113_v60 }
 0x2ae   : > { %v1146_v63 = vsel %vm1106_vm6, %v4987_v55, %v1138_v36 }
 0x2af   : > { %1154 = vst [vmem:[#allocation2 + $0x38] sm:$0xff] %v1146_v63  ;;  %v1145_v43 = vsel %vm1105_vm7, %v4989_v56, %v1136_v62 }
 0x2b0   : > { %1153 = vst [vmem:[#allocation2 + $0x30] sm:$0xff] %v1145_v43 }
 0x2b1 PF: > { %v5018_v44 = vld [vmem:[%s4961_s3 + $0x10] sm:$0xff]  ;;  %v5021_v0 = vld [vmem:[%s4961_s3] sm:$0xff]  ;;  %v4213_v55 = vmov 0   ;;  %v5026_v56 = vld [vmem:[%s4961_s3 + $0x18] sm:$0xff]  ;;  %s5805_s6 = scalar_lea.vmem [#allocation15], %s4920_s30  ;;  %s5806_s2 = sld [smem:[#allocation38_spill]] }
 0x2b2   : > { %3591 = vset.pattern.permute.xlu1 %v4213_v55  ;;  %3590 = vset.pattern.permute.xlu0 %v4213_v55  ;;  %v5029_v1 = vld [vmem:[%s4961_s3 + $0x8] sm:$0xff]  ;;  %v1246_v3 = vld [vmem:[%s4923_s15 + $0x8] sm:$0xff]  ;;  %v1247_v4 = vld [vmem:[%s4923_s15 + $0x10] sm:$0xff] }
 0x2b3   : > { %1191 = vperm.xlu1 %3591, %v5018_v44   ;;  %1181 = vperm.xlu0 %3590, %v5021_v0   ;;  %v1245_v2 = vld [vmem:[%s4923_s15] sm:$0xff]  ;;  %v1248_v5 = vld [vmem:[%s4923_s15 + $0x18] sm:$0xff]  ;;  %v1250_v9 = vld [vmem:[%s4923_s15 + $0x28] sm:$0xff] }
 0x2b4   : > { %v3087_v6 = vpack.c.bf16 %v1246_v3, %v1245_v2  ;;  %v3091_v7 = vpack.c.bf16 %v1248_v5, %v1247_v4  ;;  %v1249_v8 = vld [vmem:[%s4923_s15 + $0x20] sm:$0xff]  ;;  %v5043_v11 = vld [vmem:[%s4961_s3 + $0x20] sm:$0xff]  ;;  %v5050_v15 = vld [vmem:[%s4961_s3 + $0x38] sm:$0xff] }
 0x2b5   : > { %v5040_v10 = vld [vmem:[%s4961_s3 + $0x28] sm:$0xff]  ;;  %v3095_v12 = vpack.c.bf16 %v1250_v9, %v1249_v8  ;;  %v1251_v13 = vld [vmem:[%s4923_s15 + $0x30] sm:$0xff]  ;;  %v5053_v16 = vld [vmem:[%s4961_s3 + $0x30] sm:$0xff] }
 0x2b6   : > { %3088 = vmatprep.subr.bf16.mxu0 %v3087_v6  ;;  %v1252_v14 = vld [vmem:[%s4923_s15 + $0x38] sm:$0xff]  ;;  %v1253_v18 = vld [vmem:[%s4923_s15 + $0x40] sm:$0xff]  ;;  %v1254_v19 = vld [vmem:[%s4923_s15 + $0x48] sm:$0xff] }
 0x2b7   : > { %1196 = vperm.xlu1 %3591, %v5026_v56   ;;  %1186 = vperm.xlu0 %3590, %v5029_v1   ;;  %v3099_v17 = vpack.c.bf16 %v1252_v14, %v1251_v13  ;;  %v3103_v20 = vpack.c.bf16 %v1254_v19, %v1253_v18  ;;  %v1255_v21 = vld [vmem:[%s4923_s15 + $0x50] sm:$0xff]  ;;  %v1256_v22 = vld [vmem:[%s4923_s15 + $0x58] sm:$0xff]  ;;  %v1257_v23 = vld [vmem:[%s4923_s15 + $0x60] sm:$0xff]  ;;  %p2868_p4 = scmp.ne.s32.totalorder %s5806_s2, 2 }
 0x2b8   : > { %3090 = vmatpush3.bf16.msra.mxu0 %v3087_v6  ;;  %v1258_v24 = vld [vmem:[%s4923_s15 + $0x68] sm:$0xff]  ;;  %v1519_v28 = vld [vmem:[%s4931_s28 + $0x18] sm:$0xff]  ;;  %v3107_v30 = vpack.c.bf16 %v1256_v22, %v1255_v21  ;;  %v1518_v32 = vld [vmem:[%s4931_s28 + $0x10] sm:$0xff]  ;;  %vm2491_vm4 = vcmask (!%p2868_p4), 7168  }
 0x2b9   : > { %3092 = vmatprep.subr.bf16.mxu0 %v3091_v7  ;;  %v1517_v27 = vld [vmem:[%s4931_s28 + $0x8] sm:$0xff]  ;;  %v1516_v29 = vld [vmem:[%s4931_s28] sm:$0xff]  ;;  %v1523_v34 = vld [vmem:[%s4931_s28 + $0x38] sm:$0xff]  ;;  %v3111_v46 = vpack.c.bf16 %v1258_v24, %v1257_v23 }
 0x2ba   : > { %v3119_v31 = vpack.c.bf16 %v1519_v28, %v1517_v27  ;;  %v1521_v33 = vld [vmem:[%s4931_s28 + $0x28] sm:$0xff]  ;;  %v3121_v37 = vpack.c.bf16 %v1518_v32, %v1516_v29  ;;  %v1520_v39 = vld [vmem:[%s4931_s28 + $0x20] sm:$0xff]  ;;  %v1522_v40 = vld [vmem:[%s4931_s28 + $0x30] sm:$0xff] }
 0x2bb   : > { %1206 = vperm.xlu1 %3591, %v5040_v10   ;;  %1201 = vperm.xlu0 %3590, %v5043_v11   ;;  %v3123_v38 = vpack.c.bf16 %v1523_v34, %v1521_v33  ;;  %v1525_v41 = vld [vmem:[%s4931_s28 + $0x48] sm:$0xff]  ;;  %v1527_v42 = vld [vmem:[%s4931_s28 + $0x58] sm:$0xff]  ;;  %v3125_v45 = vpack.c.bf16 %v1522_v40, %v1520_v39  ;;  %v1524_v25 = vld [vmem:[%s4931_s28 + $0x40] sm:$0xff] }
 0x2bc   : > { %3094 = vmatpush3.bf16.msra.mxu0 %v3091_v7  ;;  %3120 = vmatprep.subr.bf16.mxu1 %v3119_v31  ;;  %v1259_v47 = vld [vmem:[%s4923_s15 + $0x70] sm:$0xff]  ;;  %v3127_v48 = vpack.c.bf16 %v1527_v42, %v1525_v41  ;;  %v1260_v50 = vld [vmem:[%s4923_s15 + $0x78] sm:$0xff]  ;;  %v1528_v57 = vld [vmem:[%s4931_s28 + $0x60] sm:$0xff] }
 0x2bd   : > { %3096 = vmatprep.subr.bf16.mxu0 %v3095_v12  ;;  %3122 = vmatpush1.bf16.msra.mxu1 %v3121_v37  ;;  %v1526_v49 = vld [vmem:[%s4931_s28 + $0x50] sm:$0xff]  ;;  %v1529_v26 = vld [vmem:[%s4931_s28 + $0x68] sm:$0xff]  ;;  %v1531_v51 = vld [vmem:[%s4931_s28 + $0x78] sm:$0xff]  ;;  %v3115_v53 = vpack.c.bf16 %v1260_v50, %v1259_v47 }
 0x2be   : > { %3124 = vmatprep.subr.bf16.mxu1 %v3123_v38  ;;  %v3129_v52 = vpack.c.bf16 %v1526_v49, %v1524_v25  ;;  %v3131_v54 = vpack.c.bf16 %v1531_v51, %v1529_v26  ;;  %v1530_v35 = vld [vmem:[%s4931_s28 + $0x70] sm:$0xff]  ;;  %v1533_v58 = vld [vmem:[%s4931_s28 + $0x88] sm:$0xff]  ;;  %v1535_v59 = vld [vmem:[%s4931_s28 + $0x98] sm:$0xff] }
 0x2bf   : > { %1216 = vperm.xlu1 %3591, %v5050_v15   ;;  %1211 = vperm.xlu0 %3590, %v5053_v16   ;;  %v3133_v60 = vpack.c.bf16 %v1530_v35, %v1528_v57  ;;  %v3135_v61 = vpack.c.bf16 %v1535_v59, %v1533_v58  ;;  %v1532_v36 = vld [vmem:[%s4931_s28 + $0x80] sm:$0xff]  ;;  %v1534_v62 = vld [vmem:[%s4931_s28 + $0x90] sm:$0xff]  ;;  %v1537_v63 = vld [vmem:[%s4931_s28 + $0xa8] sm:$0xff] }
 0x2c0   : > { %3098 = vmatpush3.bf16.msra.mxu0 %v3095_v12  ;;  %v1539_v43 = vld [vmem:[%s4931_s28 + $0xb8] sm:$0xff]  ;;  %v3137_v55 = vpack.c.bf16 %v1534_v62, %v1532_v36  ;;  %v1536_v3 = vld [vmem:[%s4931_s28 + $0xa0] sm:$0xff]  ;;  %v1538_v4 = vld [vmem:[%s4931_s28 + $0xb0] sm:$0xff] }
 0x2c1   : > { %3100 = vmatprep.subr.bf16.mxu0 %v3099_v17  ;;  %3126 = vmatpush1.bf16.msra.mxu1 %v3125_v45  ;;  %v3139_v2 = vpack.c.bf16 %v1539_v43, %v1537_v63  ;;  %v1541_v5 = vld [vmem:[%s4931_s28 + $0xc8] sm:$0xff]  ;;  %v1543_v6 = vld [vmem:[%s4931_s28 + $0xd8] sm:$0xff]  ;;  %v3141_v7 = vpack.c.bf16 %v1538_v4, %v1536_v3  ;;  %v1540_v9 = vld [vmem:[%s4931_s28 + $0xc0] sm:$0xff] }
 0x2c2   : > { %3128 = vmatprep.subr.bf16.mxu1 %v3127_v48  ;;  %v3143_v8 = vpack.c.bf16 %v1543_v6, %v1541_v5  ;;  %v1542_v12 = vld [vmem:[%s4931_s28 + $0xd0] sm:$0xff]  ;;  %v1545_v13 = vld [vmem:[%s4931_s28 + $0xe8] sm:$0xff]  ;;  %v1547_v14 = vld [vmem:[%s4931_s28 + $0xf8] sm:$0xff] }
 0x2c3   : > { %v3147_v18 = vpack.c.bf16 %v1547_v14, %v1545_v13  ;;  %v1544_v19 = vld [vmem:[%s4931_s28 + $0xe0] sm:$0xff]  ;;  %v1549_v21 = vld [vmem:[%s4931_s28 + $0x108] sm:$0xff]  ;;  %v1551_v22 = vld [vmem:[%s4931_s28 + $0x118] sm:$0xff] }
 0x2c4   : > { %3102 = vmatpush3.bf16.msra.mxu0 %v3099_v17  ;;  %v3145_v17 = vpack.c.bf16 %v1542_v12, %v1540_v9  ;;  %v3151_v24 = vpack.c.bf16 %v1551_v22, %v1549_v21  ;;  %v1548_v27 = vld [vmem:[%s4931_s28 + $0x100] sm:$0xff]  ;;  %v1550_v28 = vld [vmem:[%s4931_s28 + $0x110] sm:$0xff]  ;;  %v1553_v29 = vld [vmem:[%s4931_s28 + $0x128] sm:$0xff] }
 0x2c5   : > { %3104 = vmatprep.subr.bf16.mxu0 %v3103_v20  ;;  %3130 = vmatpush1.bf16.msra.mxu1 %v3129_v52  ;;  %v3153_v31 = vpack.c.bf16 %v1550_v28, %v1548_v27  ;;  %v1552_v33 = vld [vmem:[%s4931_s28 + $0x120] sm:$0xff]  ;;  %v1554_v34 = vld [vmem:[%s4931_s28 + $0x130] sm:$0xff]  ;;  %v1557_v37 = vld [vmem:[%s4931_s28 + $0x148] sm:$0xff] }
 0x2c6   : > { %3132 = vmatprep.subr.bf16.mxu1 %v3131_v54  ;;  %v1559_v38 = vld [vmem:[%s4931_s28 + $0x158] sm:$0xff]  ;;  %v3157_v39 = vpack.c.bf16 %v1554_v34, %v1552_v33  ;;  %v1556_v41 = vld [vmem:[%s4931_s28 + $0x140] sm:$0xff]  ;;  %v1558_v42 = vld [vmem:[%s4931_s28 + $0x150] sm:$0xff] }
 0x2c7   : > { %v3159_v40 = vpack.c.bf16 %v1559_v38, %v1557_v37  ;;  %v3161_v45 = vpack.c.bf16 %v1558_v42, %v1556_v41  ;;  %v1229_v25 = vld [vmem:[%s4898_s27 + $0x10] sm:$0xff]  ;;  %v1228_v50 = vld [vmem:[%s4898_s27 + $0x8] sm:$0xff]  ;;  %v1230_v54 = vld [vmem:[%s4898_s27 + $0x18] sm:$0xff] }
 0x2c8   : > { %3106 = vmatpush3.bf16.msra.mxu0 %v3103_v20  ;;  %v1546_v20 = vld [vmem:[%s4931_s28 + $0xf0] sm:$0xff]  ;;  %v1233_v36 = vld [vmem:[%s4898_s27 + $0x30] sm:$0xff]  ;;  %v1563_v5 = vld [vmem:[%s4931_s28 + $0x178] sm:$0xff] }
 0x2c9   : > { %3108 = vmatprep.subr.bf16.mxu0 %v3107_v30  ;;  %3134 = vmatpush1.bf16.msra.mxu1 %v3133_v60  ;;  %v3149_v23 = vpack.c.bf16 %v1546_v20, %v1544_v19  ;;  %v1231_v57 = vld [vmem:[%s4898_s27 + $0x20] sm:$0xff]  ;;  %v1561_v4 = vld [vmem:[%s4931_s28 + $0x168] sm:$0xff] }
 0x2ca   : > { %3136 = vmatprep.subr.bf16.mxu1 %v3135_v61  ;;  %v1232_v61 = vld [vmem:[%s4898_s27 + $0x28] sm:$0xff]  ;;  %v3163_v6 = vpack.c.bf16 %v1563_v5, %v1561_v4  ;;  %v1565_v12 = vld [vmem:[%s4931_s28 + $0x188] sm:$0xff] }
 0x2cb   : > { %v1567_v13 = vld [vmem:[%s4931_s28 + $0x198] sm:$0xff]  ;;  %v1569_v20 = vld [vmem:[%s4931_s28 + $0x1a8] sm:$0xff] }
 0x2cc   : > { %3110 = vmatpush3.bf16.msra.mxu0 %v3107_v30  ;;  %v1555_v30 = vld [vmem:[%s4931_s28 + $0x138] sm:$0xff]  ;;  %v3167_v14 = vpack.c.bf16 %v1567_v13, %v1565_v12  ;;  %v1573_v28 = vld [vmem:[%s4931_s28 + $0x1c8] sm:$0xff]  ;;  %v5179_v13 = vld [vmem:[%s4913_s14] ss:$0 sm:$0xff]  ;;  %s5807_s14 = sld [smem:[#allocation63_spill]] (!%p2868_p4) }
 0x2cd   : > { %3112 = vmatprep.subr.bf16.mxu0 %v3111_v46  ;;  %3138 = vmatpush1.bf16.msra.mxu1 %v3137_v55  ;;  %v3155_v32 = vpack.c.bf16 %v1555_v30, %v1553_v29  ;;  %v1234_v55 = vld [vmem:[%s4898_s27 + $0x38] sm:$0xff]  ;;  %v1571_v21 = vld [vmem:[%s4931_s28 + $0x1b8] sm:$0xff] }
 0x2ce   : > { %3140 = vmatprep.subr.bf16.mxu1 %v3139_v2  ;;  %v3171_v22 = vpack.c.bf16 %v1571_v21, %v1569_v20  ;;  %v1575_v29 = vld [vmem:[%s4931_s28 + $0x1d8] sm:$0xff]  ;;  %v1577_v34 = vld [vmem:[%s4931_s28 + $0x1e8] sm:$0xff] }
 0x2cf   : > { %v3175_v30 = vpack.c.bf16 %v1575_v29, %v1573_v28  ;;  %v1579_v37 = vld [vmem:[%s4931_s28 + $0x1f8] sm:$0xff]  ;;  %v1581_v42 = vld [vmem:[%s4931_s28 + $0x208] sm:$0xff] }
 0x2d0   : > { %3114 = vmatpush3.bf16.msra.mxu0 %v3111_v46  ;;  %v1227_v46 = vld [vmem:[%s4898_s27] sm:$0xff]  ;;  %v3179_v38 = vpack.c.bf16 %v1579_v37, %v1577_v34 }
 0x2d1   : > { %3116 = vmatprep.subr.bf16.mxu0 %v3115_v53  ;;  %3142 = vmatpush1.bf16.msra.mxu1 %v3141_v7  ;;  %v1560_v7 = vld [vmem:[%s4931_s28 + $0x160] sm:$0xff] }
 0x2d2   : > { %3144 = vmatprep.subr.bf16.mxu1 %v3143_v8  ;;  %v1562_v8 = vld [vmem:[%s4931_s28 + $0x170] sm:$0xff] }
 0x2d3   : > { %v3165_v9 = vpack.c.bf16 %v1562_v8, %v1560_v7  ;;  %v1175_v7 = vld [vmem:[#allocation2 + $0x20] sm:$0xff] }
 0x2d4   : > { %3118 = vmatpush3.bf16.msra.mxu0 %v3115_v53 }
 0x2d5   : > { %3146 = vmatpush1.bf16.msra.mxu1 %v3145_v17  ;;  %v1564_v17 = vld [vmem:[%s4931_s28 + $0x180] sm:$0xff] }
 0x2d6   : > { %3148 = vmatprep.subr.bf16.mxu1 %v3147_v18  ;;  %v1566_v18 = vld [vmem:[%s4931_s28 + $0x190] sm:$0xff] }
 0x2d7   : > { %v3169_v19 = vpack.c.bf16 %v1566_v18, %v1564_v17 }
 0x2d9   : > { %3150 = vmatpush1.bf16.msra.mxu1 %v3149_v23  ;;  %v1568_v23 = vld [vmem:[%s4931_s28 + $0x1a0] sm:$0xff] }
 0x2da   : > { %3152 = vmatprep.subr.bf16.mxu1 %v3151_v24  ;;  %v1570_v24 = vld [vmem:[%s4931_s28 + $0x1b0] sm:$0xff] }
 0x2db   : > { %v3173_v27 = vpack.c.bf16 %v1570_v24, %v1568_v23  ;;  %v1178_v24 = vld [vmem:[#allocation2 + $0x38] sm:$0xff] }
 0x2dd   : > { %3154 = vmatpush1.bf16.msra.mxu1 %v3153_v31  ;;  %v1572_v31 = vld [vmem:[%s4931_s28 + $0x1c0] sm:$0xff] }
 0x2de   : > { %3156 = vmatprep.subr.bf16.mxu1 %v3155_v32  ;;  %v1574_v32 = vld [vmem:[%s4931_s28 + $0x1d0] sm:$0xff] }
 0x2df   : > { %v3177_v33 = vpack.c.bf16 %v1574_v32, %v1572_v31 }
 0x2e1   : > { %3158 = vmatpush1.bf16.msra.mxu1 %v3157_v39  ;;  %v1576_v39 = vld [vmem:[%s4931_s28 + $0x1e0] sm:$0xff] }
 0x2e2   : > { %3160 = vmatprep.subr.bf16.mxu1 %v3159_v40  ;;  %v1578_v40 = vld [vmem:[%s4931_s28 + $0x1f0] sm:$0xff] }
 0x2e3   : > { %v3181_v41 = vpack.c.bf16 %v1578_v40, %v1576_v39 }
 0x2e5   : > { %3162 = vmatpush1.bf16.msra.mxu1 %v3161_v45  ;;  %v1583_v45 = vld [vmem:[%s4931_s28 + $0x218] sm:$0xff] }
 0x2e6   : > { %3164 = vmatprep.subr.bf16.mxu1 %v3163_v6 }
 0x2e9   : > { %3166 = vmatpush1.bf16.msra.mxu1 %v3165_v9 }
 0x2ea   : > { %3168 = vmatprep.subr.bf16.mxu1 %v3167_v14 }
 0x2ed   : > { %3170 = vmatpush1.bf16.msra.mxu1 %v3169_v19 }
 0x2ee   : > { %3172 = vmatprep.subr.bf16.mxu1 %v3171_v22 }
 0x2f1   : > { %3174 = vmatpush1.bf16.msra.mxu1 %v3173_v27  ;;  %v1177_v27 = vld [vmem:[#allocation2 + $0x30] sm:$0xff] }
 0x2f2   : > { %3176 = vmatprep.subr.bf16.mxu1 %v3175_v30 }
 0x2f5   : > { %3178 = vmatpush1.bf16.msra.mxu1 %v3177_v33 }
 0x2f6   : > { %3180 = vmatprep.subr.bf16.mxu1 %v3179_v38 }
 0x2f9   : > { %3182 = vmatpush1.bf16.msra.mxu1 %v3181_v41 }
 0x332   : > { %v5110_v47 = vpop.permute.xlu1 %1191  ;;  %v5112_v48 = vpop.permute.xlu0 %1181 }
 0x333   : > { %v1235_v49 = vmul.f32 %v1227_v46, %v5112_v48  ;;  %v1237_v26 = vmul.f32 %v1229_v25, %v5110_v47  ;;  %v3183_v46 = vpack.c.bf16 %v1583_v45, %v1581_v42  ;;  %v4214_v25 = vmov 0.0  }
 0x335   : > { %2987 = vmatprep.mubr.f32.mxu0 %v1235_v49  ;;  %3184 = vmatprep.subr.bf16.mxu1 %v3183_v46  ;;  %v1915_v49 = vld [vmem:[%s4941_s18 + $0x8] sm:$0xff] }
 0x336   : > { %v5118_v51 = vpop.permute.xlu1 %1196  ;;  %v5120_v52 = vpop.permute.xlu0 %1186 }
 0x337   : > { %v1236_v53 = vmul.f32 %v1228_v50, %v5120_v52  ;;  %v1238_v59 = vmul.f32 %v1230_v54, %v5118_v51  ;;  %v1917_v50 = vld [vmem:[%s4941_s18 + $0x18] sm:$0xff] }
 0x338   : > { %v1171_v54 = vld [vmem:[#allocation2] sm:$0xff] }
 0x339   : > { %2988 = vmatmul.mubr.f32.vlgmr.msra.gmra.mrb[0].mxu0 %v1236_v53  ;;  %v1172_v53 = vld [vmem:[#allocation2 + $0x8] sm:$0xff] }
 0x33a   : > { %v5125_v35 = vpop.permute.xlu1 %1206  ;;  %2990 = vmatprep.mubr.f32.mxu0 %v1237_v26  ;;  %v5127_v58 = vpop.permute.xlu0 %1201  ;;  %v3215_v26 = vpack.c.bf16 %v1917_v50, %v1915_v49 }
 0x33b   : > { %v1239_v60 = vmul.f32 %v1231_v57, %v5127_v58  ;;  %v1240_v63 = vmul.f32 %v1232_v61, %v5125_v35  ;;  %v1220_v57 = vmul.f32 %v5120_v52, %v1172_v53  ;;  %v1174_v61 = vld [vmem:[#allocation2 + $0x18] sm:$0xff] }
 0x33c   : > { %3216 = vmatprep.subr.bf16.mxu0 %v3215_v26  ;;  %v1222_v5 = vmul.f32 %v5118_v51, %v1174_v61 }
 0x33d   : > { %2991 = vmatmul.mubr.f32.gmra.mrb[2].mxu0 %v1238_v59  ;;  %v1173_v59 = vld [vmem:[#allocation2 + $0x10] sm:$0xff] }
 0x33e   : > { %2993 = vmatprep.mubr.f32.mxu0 %v1239_v60  ;;  %v5133_v62 = vpop.permute.xlu0 %1211  ;;  %v5138_v2 = vpop.permute.xlu1 %1216  ;;  %v1219_v60 = vmul.f32 %v5112_v48, %v1171_v54  ;;  %v1221_v4 = vmul.f32 %v5110_v47, %v1173_v59  ;;  %v1223_v47 = vmul.f32 %v5127_v58, %v1175_v7 }
 0x33f   : > { %v1241_v43 = vmul.f32 %v1233_v36, %v5133_v62  ;;  %v1242_v3 = vmul.f32 %v1234_v55, %v5138_v2  ;;  %v2853_v36 = vld [vmem:[%s5805_s6] ss:$0 sm:$0xff]  ;;  %v1176_v55 = vld [vmem:[#allocation2 + $0x28] sm:$0xff]  ;;  %v1226_v39 = vmul.f32 %v5138_v2, %v1178_v24  ;;  %v1225_v40 = vmul.f32 %v5133_v62, %v1177_v27  ;;  %v1585_v27 = vld [vmem:[%s4931_s28 + $0x228] sm:$0xff] }
 0x340   : > { %v1224_v48 = vmul.f32 %v5125_v35, %v1176_v55 }
 0x341   : > { %2994 = vmatmul.mubr.f32.gmra.mrb[4].mxu0 %v1240_v63  ;;  %v1409_v63 = vlaneseq }
 0x342   : > { %2996 = vmatprep.mubr.f32.mxu0 %v1241_v43  ;;  %v2854_v43 = vld [vmem:[%s4907_s5] ss:$0 sm:$0xff] }
 0x343   : > { %v5173_v6 = vadd.f32 %v2854_v43, %v1220_v57  ;;  %v5175_v9 = vadd.f32 %v2854_v43, %v1219_v60  ;;  %v5181_v14 = vshrl.u32 %v1409_v63, 7  ;;  %v5186_v19 = vadd.f32 %v2854_v43, %v1221_v4 }
 0x344   : > { %v5188_v20 = vadd.f32 %v2854_v43, %v1222_v5  ;;  %v5193_v23 = vadd.f32 %v2854_v43, %v1224_v48  ;;  %v5203_v32 = vadd.f32 %v2854_v43, %v1223_v47  ;;  %v5231_v61 = vadd.f32 %v2854_v43, %v1226_v39  ;;  %v1580_v47 = vld [vmem:[%s4931_s28 + $0x200] sm:$0xff] }
 0x345   : > { %2997 = vmatmul.mubr.f32.gmra.mrb[6].mxu0 %v1242_v3  ;;  %vm1434_vm8 = vcmp.lt.s32.totalorder %v5181_v14, 1  ;;  %vm1483_vm9 = vcmp.lt.s32.totalorder %v5181_v14, 7  ;;  %v5233_v63 = vadd.f32 %v2854_v43, %v1225_v40  ;;  %vm2881_vm10 = vcmp.ne.s32.totalorder %v5181_v14, 0 }
 0x346   : > { %2022 = vmatprep.mubr.f32.mxu0 %v4214_v25 }
 0x40c   : > { %v2989_v3 = vpop.f32.mrb[0].mxu0 }
 0x40d   : > { %v1340_v8 = vadd.f32 %v2989_v3, %v2853_v36  ;;  %v1334_v52 = vpop.f32.mrb[1].mxu0 }
 0x40e   : > { %v1335_v12 = vadd.f32 %v2853_v36, %v1334_v52 }
 0x40f   : > { %v1388_v17 = vadd.f32 %v5173_v6, %v1340_v8 }
 0x410   : > { %v1387_v51 = vadd.f32 %v5175_v9, %v1335_v12  ;;  %v2992_v18 = vpop.f32.mrb[2].mxu0 }
 0x411   : > { %v1350_v21 = vadd.f32 %v2992_v18, %v2853_v36  ;;  %v1344_v22 = vpop.f32.mrb[3].mxu0  ;;  %v5191_v35 = vadd.f32 %v5179_v13, %v1388_v17 }
 0x412   : > { %v1345_v28 = vadd.f32 %v2853_v36, %v1344_v22  ;;  %v5196_v29 = vadd.f32 %v5179_v13, %v1387_v51  ;;  %v1582_v51 = vld [vmem:[%s4931_s28 + $0x210] sm:$0xff] }
 0x413   : > { %v1390_v58 = vadd.f32 %v5188_v20, %v1350_v21  ;;  %v1476_v30 = vrot.slane %v5191_v35, 1  ;;  %v1427_v31 = vrot.slane %v5191_v35, 7 }
 0x414   : > { %v1389_v33 = vadd.f32 %v5186_v19, %v1345_v28  ;;  %v2995_v34 = vpop.f32.mrb[4].mxu0  ;;  %v1475_v37 = vrot.slane %v5196_v29, 1  ;;  %1688 = vmatprep.mubr.f32.mxu1 %v5196_v29  ;;  %v1426_v38 = vrot.slane %v5196_v29, 7  ;;  %v1587_v28 = vld [vmem:[%s4931_s28 + $0x238] sm:$0xff] }
 0x415   : > { %v1360_v41 = vadd.f32 %v2995_v34, %v2853_v36  ;;  %v1354_v42 = vpop.f32.mrb[5].mxu0  ;;  %v5212_v45 = vadd.f32 %v5179_v13, %v1390_v58  ;;  %v3185_v34 = vpack.c.bf16 %v1582_v51, %v1580_v47  ;;  %v1592_v51 = vld [vmem:[%s4931_s28 + $0x260] sm:$0xff] }
 0x416   : > { %v1355_v46 = vadd.f32 %v2853_v36, %v1354_v42  ;;  %v5216_v49 = vsel %vm1434_vm8, %v1426_v38, %v1427_v31  ;;  %v5219_v50 = vadd.f32 %v5179_v13, %v1389_v33  ;;  %v5223_v26 = vsel %vm1483_vm9, %v1475_v37, %v1476_v30  ;;  %v1584_v42 = vld [vmem:[%s4931_s28 + $0x220] sm:$0xff] }
 0x417   : > { %v1392_v2 = vadd.f32 %v5193_v23, %v1360_v41  ;;  %v1429_v62 = vrot.slane %v5212_v45, 7  ;;  %v1478_v53 = vrot.slane %v5212_v45, 1  ;;  %v3187_v41 = vpack.c.bf16 %v1587_v28, %v1585_v27  ;;  %v1596_v27 = vld [vmem:[%s4931_s28 + $0x280] sm:$0xff]  ;;  %v1598_v28 = vld [vmem:[%s4931_s28 + $0x290] sm:$0xff] }
 0x418   : > { %v1391_v54 = vadd.f32 %v5203_v32, %v1355_v46  ;;  %v2998_v57 = vpop.f32.mrb[6].mxu0  ;;  %v1428_v59 = vrot.slane %v5219_v50, 7  ;;  %v1477_v60 = vrot.slane %v5219_v50, 1  ;;  %v1586_v46 = vld [vmem:[%s4931_s28 + $0x230] sm:$0xff] }
 0x419   : > { %v1370_v55 = vadd.f32 %v2998_v57, %v2853_v36  ;;  %v1364_v3 = vpop.f32.mrb[7].mxu0  ;;  %v5236_v4 = vadd.f32 %v5179_v13, %v1392_v2 }
 0x41a   : > { %v1365_v5 = vadd.f32 %v2853_v36, %v1364_v3  ;;  %v1440_v7 = vsel %vm1434_vm8, %v1427_v31, %v1428_v59  ;;  %v5242_v8 = vsel %vm1434_vm8, %v1428_v59, %v1429_v62  ;;  %v5245_v52 = vadd.f32 %v5179_v13, %v1391_v54  ;;  %v1591_v54 = vld [vmem:[%s4931_s28 + $0x258] sm:$0xff] }
 0x41b   : > { %v1394_v43 = vadd.f32 %v5231_v61, %v1370_v55  ;;  %v1431_v48 = vrot.slane %v5236_v4, 7  ;;  %v5251_v12 = vsel %vm1483_vm9, %v1476_v30, %v1477_v60  ;;  %v5255_v36 = vsel %vm1483_vm9, %v1477_v60, %v1478_v53 }
 0x41c   : > { %v1393_v17 = vadd.f32 %v5233_v63, %v1365_v5  ;;  %v1430_v18 = vrot.slane %v5245_v52, 7  ;;  %v1479_v21 = vrot.slane %v5245_v52, 1  ;;  %v1480_v22 = vrot.slane %v5236_v4, 1  ;;  %v1588_v5 = vld [vmem:[%s4931_s28 + $0x240] sm:$0xff] }
 0x41d   : > { %v5264_v24 = vadd.f32 %v5179_v13, %v1394_v43  ;;  %v1590_v43 = vld [vmem:[%s4931_s28 + $0x250] sm:$0xff] }
 0x41e   : > { %v1438_v29 = vsel %vm1434_vm8, %v1429_v62, %v1430_v18  ;;  %v5273_v58 = vsel %vm1434_vm8, %v1430_v18, %v1431_v48  ;;  %v5276_v30 = vadd.f32 %v5179_v13, %v1393_v17  ;;  %v5280_v31 = vsel %vm1483_vm9, %v1478_v53, %v1479_v21  ;;  %v1589_v53 = vld [vmem:[%s4931_s28 + $0x248] sm:$0xff]  ;;  %v1595_v17 = vld [vmem:[%s4931_s28 + $0x278] sm:$0xff]  ;;  %v1594_v18 = vld [vmem:[%s4931_s28 + $0x270] sm:$0xff] }
 0x41f   : > { %v1433_v33 = vrot.slane %v5264_v24, 7  ;;  %v5285_v39 = vsel %vm1483_vm9, %v1479_v21, %v1480_v22  ;;  %v1482_v40 = vrot.slane %v5264_v24, 1  ;;  %v3191_v3 = vpack.c.bf16 %v1591_v54, %v1589_v53  ;;  %v1597_v21 = vld [vmem:[%s4931_s28 + $0x288] sm:$0xff]  ;;  %v1611_v53 = vld [vmem:[%s4931_s28 + $0x2f8] sm:$0xff] }
 0x420   : > { %v1432_v2 = vrot.slane %v5276_v30, 7  ;;  %v1481_v13 = vrot.slane %v5276_v30, 1  ;;  %v3193_v47 = vpack.c.bf16 %v1590_v43, %v1588_v5  ;;  %v1922_v5 = vld [vmem:[%s4941_s18 + $0x40] sm:$0xff]  ;;  %v1924_v43 = vld [vmem:[%s4941_s18 + $0x50] sm:$0xff] }
 0x421   : > { %v1442_v62 = vsel %vm1434_vm8, %v1433_v33, %v1426_v38  ;;  %v5298_v57 = vsel %vm1483_vm9, %v1482_v40, %v1475_v37  ;;  %v3189_v37 = vpack.c.bf16 %v1586_v46, %v1584_v42  ;;  %v1605_v42 = vld [vmem:[%s4931_s28 + $0x2c8] sm:$0xff]  ;;  %v1607_v46 = vld [vmem:[%s4931_s28 + $0x2d8] sm:$0xff] }
 0x422   : > { %2857 = vmatmul.mubr.msk.f32.vlgmr.msra.gmra.mrb[0].mxu1 %vm2881_vm10, %v1442_v62  ;;  %v1436_v59 = vsel %vm1434_vm8, %v1431_v48, %v1432_v2  ;;  %v5306_v60 = vsel %vm1434_vm8, %v1432_v2, %v1433_v33  ;;  %v5310_v38 = vsel %vm1483_vm9, %v1480_v22, %v1481_v13  ;;  %v5314_v55 = vsel %vm1483_vm9, %v1481_v13, %v1482_v40  ;;  %v1593_v48 = vld [vmem:[%s4931_s28 + $0x268] sm:$0xff]  ;;  %v1599_v22 = vld [vmem:[%s4931_s28 + $0x298] sm:$0xff]  ;;  %v1600_v40 = vld [vmem:[%s4931_s28 + $0x2a0] sm:$0xff] }
 0x423   : > { %3186 = vmatpush1.bf16.msra.mxu1 %v3185_v34  ;;  %1694 = vmatprep.mubr.f32.mxu1 %v5191_v35  ;;  %v3195_v35 = vpack.c.bf16 %v1595_v17, %v1593_v48  ;;  %v1601_v33 = vld [vmem:[%s4931_s28 + $0x2a8] sm:$0xff]  ;;  %v1603_v34 = vld [vmem:[%s4931_s28 + $0x2b8] sm:$0xff]  ;;  %v3207_v2 = vpack.c.bf16 %v1607_v46, %v1605_v42  ;;  %v1604_v13 = vld [vmem:[%s4931_s28 + $0x2c0] sm:$0xff]  ;;  %v3225_v48 = vpack.c.bf16 %v1924_v43, %v1922_v5 }
 0x424   : > { %3188 = vmatprep.subr.bf16.mxu1 %v3187_v41  ;;  %v1602_v41 = vld [vmem:[%s4931_s28 + $0x2b0] sm:$0xff]  ;;  %v1609_v62 = vld [vmem:[%s4931_s28 + $0x2e8] sm:$0xff] }
 0x425   : > { %v1927_v17 = vld [vmem:[%s4941_s18 + $0x68] sm:$0xff] }
 0x426   : > { %1695 = vmatmul.mubr.f32.gmra.mrb[2].mxu1 %v5216_v49  ;;  %v3197_v49 = vpack.c.bf16 %v1594_v18, %v1592_v51  ;;  %v1926_v51 = vld [vmem:[%s4941_s18 + $0x60] sm:$0xff]  ;;  %v1928_v18 = vld [vmem:[%s4941_s18 + $0x70] sm:$0xff]  ;;  %v1939_v46 = vld [vmem:[%s4941_s18 + $0xc8] sm:$0xff] }
 0x427   : > { %3190 = vmatpush1.bf16.msra.mxu1 %v3189_v37  ;;  %1700 = vmatprep.mubr.f32.mxu1 %v5219_v50  ;;  %v3199_v50 = vpack.c.bf16 %v1599_v22, %v1597_v21  ;;  %v1608_v37 = vld [vmem:[%s4931_s28 + $0x2e0] sm:$0xff]  ;;  %v3229_v21 = vpack.c.bf16 %v1928_v18, %v1926_v51  ;;  %v1931_v22 = vld [vmem:[%s4941_s18 + $0x88] sm:$0xff] }
 0x428   : > { %3192 = vmatprep.subr.bf16.mxu1 %v3191_v3  ;;  %v1610_v3 = vld [vmem:[%s4931_s28 + $0x2f0] sm:$0xff] }
 0x42a   : > { %1701 = vmatmul.mubr.f32.gmra.mrb[4].mxu1 %v1440_v7  ;;  %v3201_v7 = vpack.c.bf16 %v1598_v28, %v1596_v27  ;;  %v1930_v27 = vld [vmem:[%s4941_s18 + $0x80] sm:$0xff]  ;;  %v1932_v28 = vld [vmem:[%s4941_s18 + $0x90] sm:$0xff] }
 0x42b   : > { %3194 = vmatpush1.bf16.msra.mxu1 %v3193_v47  ;;  %1706 = vmatprep.mubr.f32.mxu1 %v5212_v45  ;;  %v3203_v45 = vpack.c.bf16 %v1603_v34, %v1601_v33  ;;  %v1929_v47 = vld [vmem:[%s4941_s18 + $0x78] sm:$0xff]  ;;  %v3233_v33 = vpack.c.bf16 %v1932_v28, %v1930_v27  ;;  %v1935_v34 = vld [vmem:[%s4941_s18 + $0xa8] sm:$0xff] }
 0x42c   : > { %3196 = vmatprep.subr.bf16.mxu1 %v3195_v35  ;;  %v3227_v35 = vpack.c.bf16 %v1929_v47, %v1927_v17 }
 0x42e   : > { %1707 = vmatmul.mubr.f32.gmra.mrb[6].mxu1 %v5242_v8  ;;  %v3205_v8 = vpack.c.bf16 %v1602_v41, %v1600_v40  ;;  %v1934_v40 = vld [vmem:[%s4941_s18 + $0xa0] sm:$0xff]  ;;  %v1936_v41 = vld [vmem:[%s4941_s18 + $0xb0] sm:$0xff] }
 0x42f   : > { %3198 = vmatpush1.bf16.msra.mxu1 %v3197_v49  ;;  %1712 = vmatprep.mubr.f32.mxu1 %v5245_v52  ;;  %v1606_v52 = vld [vmem:[%s4931_s28 + $0x2d0] sm:$0xff]  ;;  %v1933_v49 = vld [vmem:[%s4941_s18 + $0x98] sm:$0xff]  ;;  %v3237_v42 = vpack.c.bf16 %v1936_v41, %v1934_v40 }
 0x430   : > { %3200 = vmatprep.subr.bf16.mxu1 %v3199_v50  ;;  %v3209_v54 = vpack.c.bf16 %v1606_v52, %v1604_v13  ;;  %v3231_v50 = vpack.c.bf16 %v1933_v49, %v1931_v22  ;;  %v1938_v13 = vld [vmem:[%s4941_s18 + $0xc0] sm:$0xff]  ;;  %v1940_v52 = vld [vmem:[%s4941_s18 + $0xd0] sm:$0xff] }
 0x432   : > { %1713 = vmatmul.mubr.f32.gmra.mrb[8].mxu1 %v1438_v29  ;;  %v3211_v29 = vpack.c.bf16 %v1611_v53, %v1609_v62  ;;  %v3241_v62 = vpack.c.bf16 %v1940_v52, %v1938_v13  ;;  %v1943_v53 = vld [vmem:[%s4941_s18 + $0xe8] sm:$0xff] }
 0x433   : > { %3202 = vmatpush1.bf16.msra.mxu1 %v3201_v7  ;;  %1718 = vmatprep.mubr.f32.mxu1 %v5236_v4  ;;  %v3213_v4 = vpack.c.bf16 %v1610_v3, %v1608_v37  ;;  %v1937_v7 = vld [vmem:[%s4941_s18 + $0xb8] sm:$0xff]  ;;  %v1942_v37 = vld [vmem:[%s4941_s18 + $0xe0] sm:$0xff]  ;;  %v1944_v3 = vld [vmem:[%s4941_s18 + $0xf0] sm:$0xff] }
 0x434   : > { %3204 = vmatprep.subr.bf16.mxu1 %v3203_v45  ;;  %v3235_v45 = vpack.c.bf16 %v1937_v7, %v1935_v34 }
 0x436   : > { %1719 = vmatmul.mubr.f32.gmra.mrb[10].mxu1 %v5273_v58  ;;  %v1919_v58 = vld [vmem:[%s4941_s18 + $0x28] sm:$0xff] }
 0x437   : > { %3206 = vmatpush1.bf16.msra.mxu1 %v3205_v8  ;;  %1724 = vmatprep.mubr.f32.mxu1 %v5276_v30  ;;  %v1921_v30 = vld [vmem:[%s4941_s18 + $0x38] sm:$0xff] }
 0x438   : > { %3208 = vmatprep.subr.bf16.mxu1 %v3207_v2  ;;  %v1941_v8 = vld [vmem:[%s4941_s18 + $0xd8] sm:$0xff] }
 0x439   : > { %v3239_v2 = vpack.c.bf16 %v1941_v8, %v1939_v46 }
 0x43a   : > { %1725 = vmatmul.mubr.f32.gmra.mrb[12].mxu1 %v1436_v59  ;;  %v1920_v59 = vld [vmem:[%s4941_s18 + $0x30] sm:$0xff] }
 0x43b   : > { %3210 = vmatpush1.bf16.msra.mxu1 %v3209_v54  ;;  %1730 = vmatprep.mubr.f32.mxu1 %v5264_v24  ;;  %v1945_v54 = vld [vmem:[%s4941_s18 + $0xf8] sm:$0xff] }
 0x43c   : > { %3212 = vmatprep.subr.bf16.mxu1 %v3211_v29  ;;  %v3243_v29 = vpack.c.bf16 %v1945_v54, %v1943_v53 }
 0x43e   : > { %1731 = vmatmul.mubr.f32.gmra.mrb[14].mxu1 %v5306_v60 }
 0x43f   : > { %3214 = vmatpush1.bf16.msra.mxu1 %v3213_v4  ;;  %1801 = vmatprep.mubr.f32.mxu1 %v4214_v25  ;;  %v3245_v4 = vpack.c.bf16 %v1944_v3, %v1942_v37 }
 0x442   : > { %1802 = vmatmul.mubr.f32.vlgmr.msra.gmra.mrb[0].mxu1 %v5223_v26  ;;  %v1417_v26 = vadd.s32 56, %v5181_v14 }
 0x443   : > { %1807 = vmatprep.mubr.f32.mxu1 %v4214_v25 }
 0x444   : > { %vm2882_vm11 = vcmp.ne.s32.totalorder %v1417_v26, 63  ;;  %v1616_v26 = vsub.s32 0, %v5181_v14 }
 0x446   : > { %1808 = vmatmul.mubr.f32.gmra.mrb[2].mxu1 %v5251_v12  ;;  %v1914_v12 = vld [vmem:[%s4941_s18] sm:$0xff] }
 0x447   : > { %1813 = vmatprep.mubr.f32.mxu1 %v4214_v25 }
 0x44a   : > { %1814 = vmatmul.mubr.f32.gmra.mrb[4].mxu1 %v5255_v36  ;;  %v1916_v36 = vld [vmem:[%s4941_s18 + $0x10] sm:$0xff] }
 0x44b   : > { %1819 = vmatprep.mubr.f32.mxu1 %v4214_v25  ;;  %v3217_v24 = vpack.c.bf16 %v1916_v36, %v1914_v12  ;;  %v1612_v12 = vld [vmem:[%s4939_s26] sm:$0x3] }
 0x44c   : > { %v1617_v36 = vrot.slane %v1612_v12, %v1616_v26 }
 0x44d   : > { %3218 = vmatpush1.bf16.msra.mxu0 %v3217_v24 }
 0x44e   : > { %1820 = vmatmul.mubr.f32.gmra.mrb[6].mxu1 %v5280_v31  ;;  %v3219_v31 = vpack.c.bf16 %v1921_v30, %v1919_v58 }
 0x44f   : > { %1825 = vmatprep.mubr.f32.mxu1 %v4214_v25 }
 0x450   : > { %3220 = vmatprep.subr.bf16.mxu0 %v3219_v31 }
 0x452   : > { %1826 = vmatmul.mubr.f32.gmra.mrb[8].mxu1 %v5285_v39  ;;  %v1918_v39 = vld [vmem:[%s4941_s18 + $0x20] sm:$0xff] }
 0x453   : > { %1831 = vmatprep.mubr.f32.mxu1 %v4214_v25  ;;  %v3221_v60 = vpack.c.bf16 %v1920_v59, %v1918_v39  ;;  %v1620_v39 = vsub.s32 1, %v5181_v14 }
 0x455   : > { %3222 = vmatpush1.bf16.msra.mxu0 %v3221_v60 }
 0x456   : > { %1832 = vmatmul.mubr.f32.gmra.mrb[10].mxu1 %v5310_v38  ;;  %v1923_v38 = vld [vmem:[%s4941_s18 + $0x48] sm:$0xff] }
 0x457   : > { %1837 = vmatprep.mubr.f32.mxu1 %v4214_v25 }
 0x45a   : > { %1838 = vmatmul.mubr.f32.gmra.mrb[12].mxu1 %v5314_v55 }
 0x45b   : > { %1843 = vmatprep.mubr.f32.mxu1 %v4214_v25 }
 0x45e   : > { %2859 = vmatmul.mubr.msk.f32.gmra.mrb[14].mxu1 %vm2882_vm11, %v5298_v57  ;;  %v1925_v57 = vld [vmem:[%s4941_s18 + $0x58] sm:$0xff] }
 0x45f   : > { %v3223_v55 = vpack.c.bf16 %v1925_v57, %v1923_v38 }
 0x461   : > { %3224 = vmatprep.subr.bf16.mxu0 %v3223_v55  ;;  %v5403_v55 = vrot.slane %v1612_v12, %v1620_v39 }
 0x462   : > { %3226 = vmatpush1.bf16.msra.mxu0 %v3225_v48 }
 0x463   : > { %3228 = vmatprep.subr.bf16.mxu0 %v3227_v35 }
 0x466   : > { %3230 = vmatpush1.bf16.msra.mxu0 %v3229_v21 }
 0x467   : > { %3232 = vmatprep.subr.bf16.mxu0 %v3231_v50 }
 0x46a   : > { %3234 = vmatpush1.bf16.msra.mxu0 %v3233_v33 }
 0x46b   : > { %3236 = vmatprep.subr.bf16.mxu0 %v3235_v45 }
 0x46e   : > { %3238 = vmatpush1.bf16.msra.mxu0 %v3237_v42 }
 0x46f   : > { %3240 = vmatprep.subr.bf16.mxu0 %v3239_v2 }
 0x472   : > { %3242 = vmatpush1.bf16.msra.mxu0 %v3241_v62 }
 0x473   : > { %3244 = vmatprep.subr.bf16.mxu0 %v3243_v29 }
 0x476   : > { %3246 = vmatpush1.bf16.msra.mxu0 %v3245_v4 }
 0x515   : > { %v1803_v24 = vpop.f32.mrb[0].mxu1 }
 0x516   : > { %v3311_v58 = vadd.f32 %v1803_v24, %v1617_v36  ;;  %v1805_v30 = vpop.f32.mrb[1].mxu1 }
 0x517   : > { %v3312_v47 = vadd.f32 %v1805_v30, %v5403_v55 }
 0x518   : > { %v2860_v31 = vmul.f32 -1.442695, %v3311_v58 }
 0x519   : > { %v1809_v59 = vpop.f32.mrb[2].mxu1 }
 0x51a   : > { %3592 = vpow2.f32 %v2860_v31  ;;  %v3313_v60 = vadd.f32 %v1809_v59, %v1617_v36  ;;  %v1811_v38 = vpop.f32.mrb[3].mxu1 }
 0x51b   : > { %v3314_v50 = vadd.f32 %v1811_v38, %v5403_v55 }
 0x51c   : > { %v2861_v57 = vmul.f32 -1.442695, %v3313_v60 }
 0x51d   : > { %v1815_v5 = vpop.f32.mrb[4].mxu1 }
 0x51e   : > { %3594 = vpow2.f32 %v2861_v57  ;;  %v3315_v43 = vadd.f32 %v1815_v5, %v1617_v36  ;;  %v1817_v48 = vpop.f32.mrb[5].mxu1 }
 0x51f   : > { %v3316_v40 = vadd.f32 %v1817_v48, %v5403_v55 }
 0x520   : > { %v2862_v17 = vmul.f32 -1.442695, %v3315_v43 }
 0x521   : > { %v1821_v35 = vpop.f32.mrb[6].mxu1 }
 0x522   : > { %3596 = vpow2.f32 %v2862_v17  ;;  %v3317_v51 = vadd.f32 %v1821_v35, %v1617_v36  ;;  %v1823_v18 = vpop.f32.mrb[7].mxu1 }
 0x523   : > { %3598 = vtanh.f32 %v3312_v47  ;;  %v3318_v52 = vadd.f32 %v1823_v18, %v5403_v55 }
 0x524   : > { %v3593_v21 = vpop.eup %3592  ;;  %v2863_v22 = vmul.f32 -1.442695, %v3317_v51 }
 0x525   : > { %v1874_v49 = vadd.f32 1.0, %v3593_v21  ;;  %v1827_v27 = vpop.f32.mrb[8].mxu1 }
 0x526   : > { %3600 = vpow2.f32 %v2863_v22  ;;  %v3319_v28 = vadd.f32 %v1827_v27, %v1617_v36  ;;  %v1829_v33 = vpop.f32.mrb[9].mxu1 }
 0x527   : > { %3602 = vrcp.f32 %v1874_v49  ;;  %v3320_v24 = vadd.f32 %v1829_v33, %v5403_v55 }
 0x528   : > { %v3595_v34 = vpop.eup %3594  ;;  %v2864_v7 = vmul.f32 -1.442695, %v3319_v28  ;;  %3604 = vtanh.f32 %v3314_v50 }
 0x529   : > { %v1875_v45 = vadd.f32 1.0, %v3595_v34  ;;  %v1833_v41 = vpop.f32.mrb[10].mxu1 }
 0x52a   : > { %3606 = vpow2.f32 %v2864_v7  ;;  %v3321_v42 = vadd.f32 %v1833_v41, %v1617_v36  ;;  %v1835_v46 = vpop.f32.mrb[11].mxu1 }
 0x52b   : > { %3608 = vrcp.f32 %v1875_v45  ;;  %v3322_v48 = vadd.f32 %v1835_v46, %v5403_v55 }
 0x52c   : > { %v3597_v8 = vpop.eup %3596  ;;  %v2865_v2 = vmul.f32 -1.442695, %v3321_v42  ;;  %3610 = vtanh.f32 %v3316_v40 }
 0x52d   : > { %v1876_v13 = vadd.f32 1.0, %v3597_v8  ;;  %v1839_v62 = vpop.f32.mrb[12].mxu1  ;;  %v3599_v29 = vpop.eup %3598 }
 0x52e   : > { %3612 = vpow2.f32 %v2865_v2  ;;  %v3323_v53 = vadd.f32 %v1839_v62, %v1617_v36  ;;  %v1841_v54 = vpop.f32.mrb[13].mxu1 }
 0x52f   : > { %3614 = vrcp.f32 %v1876_v13  ;;  %v3324_v18 = vadd.f32 %v1841_v54, %v5403_v55  ;;  %v1946_v54 = vld [vmem:[%s4947_s20] sm:$0x3] }
 0x530   : > { %v3601_v37 = vpop.eup %3600  ;;  %v2866_v3 = vmul.f32 -1.442695, %v3323_v53  ;;  %3616 = vtanh.f32 %v3318_v52 }
 0x531   : > { %v3603_v4 = vpop.eup %3602  ;;  %v1877_v12 = vadd.f32 1.0, %v3601_v37  ;;  %v1845_v58 = vpop.f32.mrb[14].mxu1  ;;  %v5427_v37 = vrot.slane %v1946_v54, %v1620_v39 }
 0x532   : > { %3618 = vpow2.f32 %v2866_v3  ;;  %v3325_v30 = vadd.f32 %v1845_v58, %v1617_v36  ;;  %v1847_v31 = vpop.f32.mrb[15].mxu1  ;;  %v1906_v59 = vmul.f32 %v3603_v4, %v3599_v29  ;;  %v3605_v60 = vpop.eup %3604  ;;  %v5423_v29 = vrot.slane %v1946_v54, %v1616_v26 }
 0x533   : > { %3620 = vrcp.f32 %v1877_v12  ;;  %v3326_v28 = vadd.f32 %v1847_v31, %v5403_v55 }
 0x534   : > { %v3607_v38 = vpop.eup %3606  ;;  %v2867_v57 = vmul.f32 -1.442695, %v3325_v30  ;;  %2023 = vmatmul.mubr.f32.vlgmr.msra.gmra.mrb[8].mxu0 %v1906_v59  ;;  %3622 = vtanh.f32 %v3320_v24  ;;  %v2095_v24 = vld [vmem:[#allocation3] sm:$0xff] }
 0x535   : > { %v3609_v5 = vpop.eup %3608  ;;  %v1878_v43 = vadd.f32 1.0, %v3607_v38  ;;  %2028 = vmatprep.mubr.f32.mxu0 %v4214_v25  ;;  %v2096_v38 = vld [vmem:[#allocation3 + $0x8] sm:$0xff] }
 0x536   : > { %3624 = vpow2.f32 %v2867_v57  ;;  %v1907_v17 = vmul.f32 %v3609_v5, %v3605_v60  ;;  %v3611_v47 = vpop.eup %3610 }
 0x537   : > { %3626 = vrcp.f32 %v1878_v43 }
 0x538   : > { %v3613_v35 = vpop.eup %3612  ;;  %2029 = vmatmul.mubr.f32.gmra.mrb[10].mxu0 %v1907_v17  ;;  %3628 = vtanh.f32 %v3322_v48 }
 0x539   : > { %v3615_v36 = vpop.eup %3614  ;;  %v1879_v51 = vadd.f32 1.0, %v3613_v35  ;;  %2034 = vmatprep.mubr.f32.mxu0 %v4214_v25 }
 0x53a   : > { %v1908_v21 = vmul.f32 %v3615_v36, %v3611_v47  ;;  %v3617_v22 = vpop.eup %3616 }
 0x53b   : > { %3630 = vrcp.f32 %v1879_v51 }
 0x53c   : > { %v3619_v49 = vpop.eup %3618  ;;  %2035 = vmatmul.mubr.f32.gmra.mrb[12].mxu0 %v1908_v21  ;;  %3632 = vtanh.f32 %v3324_v18 }
 0x53d   : > { %v3621_v50 = vpop.eup %3620  ;;  %v1880_v27 = vadd.f32 1.0, %v3619_v49  ;;  %2040 = vmatprep.mubr.f32.mxu0 %v4214_v25 }
 0x53e   : > { %v1909_v33 = vmul.f32 %v3621_v50, %v3617_v22  ;;  %v3623_v34 = vpop.eup %3622 }
 0x53f   : > { %3634 = vrcp.f32 %v1880_v27 }
 0x540   : > { %v3625_v7 = vpop.eup %3624  ;;  %2041 = vmatmul.mubr.f32.gmra.mrb[14].mxu0 %v1909_v33  ;;  %3636 = vtanh.f32 %v3326_v28 }
 0x541   : > { %v3627_v45 = vpop.eup %3626  ;;  %v1881_v40 = vadd.f32 1.0, %v3625_v7  ;;  %2046 = vmatprep.mubr.f32.mxu0 %v4214_v25 }
 0x542   : > { %v1910_v41 = vmul.f32 %v3627_v45, %v3623_v34  ;;  %v3629_v42 = vpop.eup %3628 }
 0x543   : > { %3638 = vrcp.f32 %v1881_v40 }
 0x544   : > { %2047 = vmatmul.mubr.f32.gmra.mrb[16].mxu0 %v1910_v41 }
 0x545   : > { %v3631_v46 = vpop.eup %3630  ;;  %2052 = vmatprep.mubr.f32.mxu0 %v4214_v25 }
 0x546   : > { %v1911_v8 = vmul.f32 %v3631_v46, %v3629_v42  ;;  %v3633_v55 = vpop.eup %3632 }
 0x548   : > { %2053 = vmatmul.mubr.f32.gmra.mrb[18].mxu0 %v1911_v8 }
 0x549   : > { %v3635_v2 = vpop.eup %3634  ;;  %2058 = vmatprep.mubr.f32.mxu0 %v4214_v25 }
 0x54a   : > { %v1912_v13 = vmul.f32 %v3635_v2, %v3633_v55  ;;  %v3637_v52 = vpop.eup %3636 }
 0x54c   : > { %2059 = vmatmul.mubr.f32.gmra.mrb[20].mxu0 %v1912_v13 }
 0x54d   : > { %v3639_v62 = vpop.eup %3638  ;;  %2064 = vmatprep.mubr.f32.mxu0 %v4214_v25 }
 0x54e   : > { %v1913_v53 = vmul.f32 %v3639_v62, %v3637_v52 }
 0x550   : > { %2065 = vmatmul.mubr.f32.gmra.mrb[22].mxu0 %v1913_v53 }
 0x607   : > { %v2024_v3 = vpop.f32.mrb[8].mxu0 }
 0x608   : > { %v2025_v4 = vadd.f32 %v2024_v3, %v5423_v29  ;;  %v2026_v12 = vpop.f32.mrb[9].mxu0 }
 0x609   : > { %v2027_v58 = vadd.f32 %v2026_v12, %v5427_v37 }
 0x60a   : > { %v2071_v25 = vadd.f32 %v2025_v4, %v5175_v9  ;;  %v2097_v9 = vld [vmem:[#allocation3 + $0x10] sm:$0xff] }
 0x60b   : > { %v2103_v30 = vadd.f32 %v2095_v24, %v2027_v58  ;;  %v2030_v31 = vpop.f32.mrb[10].mxu0 }
 0x60c   : > { %v2079_v59 = vmul.f32 0.70710677, %v2071_v25  ;;  %v2031_v60 = vadd.f32 %v2030_v31, %v5423_v29  ;;  %v2032_v26 = vpop.f32.mrb[11].mxu0 }
 0x60d   : > { %2111 = vst [vmem:[#allocation3] sm:$0xff] %v2103_v30  ;;  %v2033_v14 = vadd.f32 %v2032_v26, %v5427_v37 }
 0x60e   : > { %2087 = vst [vmem:[#allocation2] sm:$0xff] %v2079_v59  ;;  %v2072_v39 = vadd.f32 %v2031_v60, %v5173_v6  ;;  %v2098_v6 = vld [vmem:[#allocation3 + $0x18] sm:$0xff] }
 0x60f   : > { %v2104_v57 = vadd.f32 %v2096_v38, %v2033_v14  ;;  %v2036_v5 = vpop.f32.mrb[12].mxu0  ;;  %v2140_v14 = vld [vmem:[#allocation22 + $0x8] sm:$0xff] (!%p2868_p4) }
 0x610   : > { %v2080_v43 = vmul.f32 0.70710677, %v2072_v39  ;;  %v2037_v48 = vadd.f32 %v2036_v5, %v5423_v29  ;;  %v2038_v17 = vpop.f32.mrb[13].mxu0  ;;  %v2141_v39 = vld [vmem:[#allocation22 + $0x10] sm:$0xff] (!%p2868_p4) }
 0x611   : > { %2112 = vst [vmem:[#allocation3 + $0x8] sm:$0xff] %v2104_v57  ;;  %v2039_v47 = vadd.f32 %v2038_v17, %v5427_v37  ;;  %v2145_v17 = vld [vmem:[#allocation22 + $0x30] sm:$0xff] (!%p2868_p4) }
 0x612   : > { %2088 = vst [vmem:[#allocation2 + $0x8] sm:$0xff] %v2080_v43  ;;  %v2073_v35 = vadd.f32 %v2037_v48, %v5186_v19  ;;  %v2099_v19 = vld [vmem:[#allocation3 + $0x20] sm:$0xff]  ;;  %v2143_v43 = vld [vmem:[#allocation22 + $0x20] sm:$0xff] (!%p2868_p4) }
 0x613   : > { %v2105_v36 = vadd.f32 %v2097_v9, %v2039_v47  ;;  %v2042_v51 = vpop.f32.mrb[14].mxu0  ;;  %v2144_v48 = vld [vmem:[#allocation22 + $0x28] sm:$0xff] (!%p2868_p4)  ;;  %v2146_v9 = vld [vmem:[#allocation22 + $0x38] sm:$0xff] (!%p2868_p4) }
 0x614   : > { %v2081_v18 = vmul.f32 0.70710677, %v2073_v35  ;;  %v2043_v21 = vadd.f32 %v2042_v51, %v5423_v29  ;;  %v2044_v22 = vpop.f32.mrb[15].mxu0  ;;  %v3259_v35 = vpack.c.bf16 (!%p2868_p4), %v2146_v9, %v2145_v17  ;;  %v2148_v51 = vld [vmem:[#allocation22 + $0x48] sm:$0xff] (!%p2868_p4) }
 0x615   : > { %2113 = vst [vmem:[#allocation3 + $0x10] sm:$0xff] %v2105_v36  ;;  %v2045_v49 = vadd.f32 %v2044_v22, %v5427_v37  ;;  %v2147_v36 = vld [vmem:[#allocation22 + $0x40] sm:$0xff] (!%p2868_p4)  ;;  %v2150_v22 = vld [vmem:[#allocation22 + $0x58] sm:$0xff] (!%p2868_p4) }
 0x616   : > { %2089 = vst [vmem:[#allocation2 + $0x10] sm:$0xff] %v2081_v18  ;;  %v2074_v50 = vadd.f32 %v2043_v21, %v5188_v20  ;;  %v2100_v20 = vld [vmem:[#allocation3 + $0x28] sm:$0xff]  ;;  %v3263_v18 = vpack.c.bf16 (!%p2868_p4), %v2148_v51, %v2147_v36 }
 0x617   : > { %v2106_v27 = vadd.f32 %v2098_v6, %v2045_v49  ;;  %v2048_v28 = vpop.f32.mrb[16].mxu0  ;;  %v2149_v21 = vld [vmem:[#allocation22 + $0x50] sm:$0xff] (!%p2868_p4)  ;;  %v2151_v49 = vld [vmem:[#allocation22 + $0x60] sm:$0xff] (!%p2868_p4) }
 0x618   : > { %v2082_v33 = vmul.f32 0.70710677, %v2074_v50  ;;  %v2049_v34 = vadd.f32 %v2048_v28, %v5423_v29  ;;  %v2050_v7 = vpop.f32.mrb[17].mxu0  ;;  %v3267_v6 = vpack.c.bf16 (!%p2868_p4), %v2150_v22, %v2149_v21  ;;  %v2152_v50 = vld [vmem:[#allocation22 + $0x68] sm:$0xff] (!%p2868_p4)  ;;  %v2153_v28 = vld [vmem:[#allocation22 + $0x70] sm:$0xff] (!%p2868_p4) }
 0x619   : > { %2114 = vst [vmem:[#allocation3 + $0x18] sm:$0xff] %v2106_v27  ;;  %v2051_v45 = vadd.f32 %v2050_v7, %v5427_v37  ;;  %v3271_v27 = vpack.c.bf16 (!%p2868_p4), %v2152_v50, %v2151_v49  ;;  %v2124_v7 = vld [vmem:[#allocation3 + $0x8] sm:$0xff] (!%p2868_p4) }
 0x61a   : > { %2090 = vst [vmem:[#allocation2 + $0x18] sm:$0xff] %v2082_v33  ;;  %v2075_v40 = vadd.f32 %v2049_v34, %v5203_v32  ;;  %v2101_v32 = vld [vmem:[#allocation3 + $0x30] sm:$0xff] }
 0x61b   : > { %v2107_v41 = vadd.f32 %v2099_v19, %v2051_v45  ;;  %v2054_v42 = vpop.f32.mrb[18].mxu0  ;;  %v2154_v33 = vld [vmem:[#allocation22 + $0x78] sm:$0xff] (!%p2868_p4)  ;;  %v2132_v45 = vmul.f32 (!%p2868_p4), 0.57735026, %v2124_v7 }
 0x61c   : > { %v2083_v46 = vmul.f32 0.70710677, %v2075_v40  ;;  %v2055_v8 = vadd.f32 %v2054_v42, %v5423_v29  ;;  %v2056_v55 = vpop.f32.mrb[19].mxu0  ;;  %v3275_v34 = vpack.c.bf16 (!%p2868_p4), %v2154_v33, %v2153_v28  ;;  %v2125_v19 = vld [vmem:[#allocation3 + $0x10] sm:$0xff] (!%p2868_p4) }
 0x61d   : > { %2115 = vst [vmem:[#allocation3 + $0x20] sm:$0xff] %v2107_v41  ;;  %v2057_v2 = vadd.f32 %v2056_v55, %v5427_v37  ;;  %v2133_v40 = vmul.f32 (!%p2868_p4), 0.57735026, %v2125_v19 }
 0x61e   : > { %2091 = vst [vmem:[#allocation2 + $0x20] sm:$0xff] %v2083_v46  ;;  %v2076_v13 = vadd.f32 %v2055_v8, %v5193_v23  ;;  %v2102_v23 = vld [vmem:[#allocation3 + $0x38] sm:$0xff] }
 0x61f   : > { %v2108_v52 = vadd.f32 %v2100_v20, %v2057_v2  ;;  %v2060_v62 = vpop.f32.mrb[20].mxu0 }
 0x620   : > { %v2084_v53 = vmul.f32 0.70710677, %v2076_v13  ;;  %v2061_v54 = vadd.f32 %v2060_v62, %v5423_v29  ;;  %v2062_v3 = vpop.f32.mrb[21].mxu0  ;;  %v2126_v41 = vld [vmem:[#allocation3 + $0x18] sm:$0xff] (!%p2868_p4) }
 0x621   : > { %2116 = vst [vmem:[#allocation3 + $0x28] sm:$0xff] %v2108_v52  ;;  %v2063_v4 = vadd.f32 %v2062_v3, %v5427_v37  ;;  %v2134_v46 = vmul.f32 (!%p2868_p4), 0.57735026, %v2126_v41 }
 0x622   : > { %2092 = vst [vmem:[#allocation2 + $0x28] sm:$0xff] %v2084_v53  ;;  %v2077_v12 = vadd.f32 %v2061_v54, %v5233_v63  ;;  %v2139_v63 = vld [vmem:[#allocation22] sm:$0xff] (!%p2868_p4)  ;;  %v2355_v53 = vld [vmem:[%s5807_s14] sm:$0xff] (!%p2868_p4)  ;;  %v2356_v54 = vld [vmem:[%s5807_s14 + $0x8] sm:$0xff] (!%p2868_p4) }
 0x623   : > { %v2109_v24 = vadd.f32 %v2101_v32, %v2063_v4  ;;  %v2066_v58 = vpop.f32.mrb[22].mxu0  ;;  %v3247_v57 = vpack.c.bf16 (!%p2868_p4), %v2140_v14, %v2139_v63  ;;  %v3279_v3 = vpack.c.bf16 (!%p2868_p4), %v2356_v54, %v2355_v53  ;;  %v2357_v32 = vld [vmem:[%s5807_s14 + $0x10] sm:$0xff] (!%p2868_p4)  ;;  %v2358_v4 = vld [vmem:[%s5807_s14 + $0x18] sm:$0xff] (!%p2868_p4) }
 0x624   : > { %v2085_v25 = vmul.f32 0.70710677, %v2077_v12  ;;  %v2067_v30 = vadd.f32 %v2066_v58, %v5423_v29  ;;  %v2068_v31 = vpop.f32.mrb[23].mxu0  ;;  %2122 = sbr.rel (%p2868_p4) target bundleno = 2086 (0x826), region = 148  ;;  %v2142_v29 = vld [vmem:[#allocation22 + $0x18] sm:$0xff] (!%p2868_p4)  ;;  %v2127_v42 = vld [vmem:[#allocation3 + $0x20] sm:$0xff] (!%p2868_p4)  ;;  %v3283_v12 = vpack.c.bf16 (!%p2868_p4), %v2358_v4, %v2357_v32 }
 0x625   : > { %2117 = vst [vmem:[#allocation3 + $0x30] sm:$0xff] %v2109_v24  ;;  %v2069_v59 = vadd.f32 %v2068_v31, %v5427_v37  ;;  %v3251_v5 = vpack.c.bf16 (!%p2868_p4), %v2142_v29, %v2141_v39  ;;  %3248 = vmatprep.subr.bf16.mxu0 (!%p2868_p4), %v3247_v57  ;;  %v3255_v37 = vpack.c.bf16 (!%p2868_p4), %v2144_v48, %v2143_v43  ;;  %v2135_v8 = vmul.f32 (!%p2868_p4), 0.57735026, %v2127_v42  ;;  %v2359_v24 = vld [vmem:[%s5807_s14 + $0x20] sm:$0xff] (!%p2868_p4)  ;;  %v2360_v58 = vld [vmem:[%s5807_s14 + $0x28] sm:$0xff] (!%p2868_p4)  ;;  %v2362_v31 = vld [vmem:[%s5807_s14 + $0x38] sm:$0xff] (!%p2868_p4) }
 0x626   : > { %2093 = vst [vmem:[#allocation2 + $0x30] sm:$0xff] %v2085_v25  ;;  %v2078_v60 = vadd.f32 %v2067_v30, %v5231_v61  ;;  %3250 = vmatpush3.bf16.msra.mxu0 (!%p2868_p4), %v3247_v57  ;;  %v2123_v61 = vld [vmem:[#allocation3] sm:$0xff] (!%p2868_p4)  ;;  %3280 = vmatprep.subr.bf16.mxu1 (!%p2868_p4), %v3279_v3  ;;  %v3287_v25 = vpack.c.bf16 (!%p2868_p4), %v2360_v58, %v2359_v24  ;;  %v2361_v30 = vld [vmem:[%s5807_s14 + $0x30] sm:$0xff] (!%p2868_p4)  ;;  %v2366_v63 = vld [vmem:[%s5807_s14 + $0x58] sm:$0xff] (!%p2868_p4) }
 0x627   : > { %v2110_v26 = vadd.f32 %v2102_v23, %v2069_v59  ;;  %3252 = vmatprep.subr.bf16.mxu0 (!%p2868_p4), %v3251_v5  ;;  %v2131_v47 = vmul.f32 (!%p2868_p4), 0.57735026, %v2123_v61  ;;  %3282 = vmatpush3.bf16.msra.mxu1 (!%p2868_p4), %v3279_v3  ;;  %v3291_v23 = vpack.c.bf16 (!%p2868_p4), %v2362_v31, %v2361_v30  ;;  %v2363_v59 = vld [vmem:[%s5807_s14 + $0x40] sm:$0xff] (!%p2868_p4)  ;;  %v2368_v57 = vld [vmem:[%s5807_s14 + $0x68] sm:$0xff] (!%p2868_p4)  ;;  %v2370_v43 = vld [vmem:[%s5807_s14 + $0x78] sm:$0xff] (!%p2868_p4) }
 0x628   : > { %v2086_v38 = vmul.f32 0.70710677, %v2078_v60  ;;  %v2128_v55 = vld [vmem:[#allocation3 + $0x28] sm:$0xff] (!%p2868_p4)  ;;  %3284 = vmatprep.subr.bf16.mxu1 (!%p2868_p4), %v3283_v12  ;;  %v2367_v39 = vld [vmem:[%s5807_s14 + $0x60] sm:$0xff] (!%p2868_p4) }
 0x629   : > { %2118 = vst [vmem:[#allocation3 + $0x38] sm:$0xff] %v2110_v26  ;;  %3031 = vmatprep.mubr.f32.mxu0 (!%p2868_p4), %v2131_v47  ;;  %v2136_v2 = vmul.f32 (!%p2868_p4), 0.57735026, %v2128_v55  ;;  %v2364_v60 = vld [vmem:[%s5807_s14 + $0x48] sm:$0xff] (!%p2868_p4)  ;;  %v2365_v26 = vld [vmem:[%s5807_s14 + $0x50] sm:$0xff] (!%p2868_p4)  ;;  %v3303_v29 = vpack.c.bf16 (!%p2868_p4), %v2368_v57, %v2367_v39 }
 0x62a   : > { %2094 = vst [vmem:[#allocation2 + $0x38] sm:$0xff] %v2086_v38  ;;  %3254 = vmatpush3.bf16.msra.mxu0 (!%p2868_p4), %v3251_v5  ;;  %v3295_v38 = vpack.c.bf16 (!%p2868_p4), %v2364_v60, %v2363_v59  ;;  %v3299_v14 = vpack.c.bf16 (!%p2868_p4), %v2366_v63, %v2365_v26  ;;  %v2369_v5 = vld [vmem:[%s5807_s14 + $0x70] sm:$0xff] (!%p2868_p4) }
 0x62b   : > { %3256 = vmatprep.subr.bf16.mxu0 %v3255_v37  ;;  %3286 = vmatpush3.bf16.msra.mxu1 %v3283_v12  ;;  %v3307_v48 = vpack.c.bf16 %v2370_v43, %v2369_v5 }
 0x62c   : > { %v2129_v20 = vld [vmem:[#allocation3 + $0x30] sm:$0xff]  ;;  %3288 = vmatprep.subr.bf16.mxu1 %v3287_v25 }
 0x62d   : > { %v2137_v13 = vmul.f32 0.57735026, %v2129_v20 }
 0x62e   : > { %3258 = vmatpush3.bf16.msra.mxu0 %v3255_v37  ;;  %v2869_v37 = vld [vmem:[#allocation24] ss:$0 sm:$0xff] }
 0x62f   : > { %3260 = vmatprep.subr.bf16.mxu0 %v3259_v35  ;;  %3290 = vmatpush3.bf16.msra.mxu1 %v3287_v25 }
 0x630   : > { %v2130_v52 = vld [vmem:[#allocation3 + $0x38] sm:$0xff]  ;;  %3292 = vmatprep.subr.bf16.mxu1 %v3291_v23 }
 0x631   : > { %v2138_v62 = vmul.f32 0.57735026, %v2130_v52 }
 0x632   : > { %3262 = vmatpush3.bf16.msra.mxu0 %v3259_v35 }
 0x633   : > { %3264 = vmatprep.subr.bf16.mxu0 %v3263_v18  ;;  %3294 = vmatpush3.bf16.msra.mxu1 %v3291_v23 }
 0x634   : > { %3296 = vmatprep.subr.bf16.mxu1 %v3295_v38 }
 0x636   : > { %3266 = vmatpush3.bf16.msra.mxu0 %v3263_v18 }
 0x637   : > { %3268 = vmatprep.subr.bf16.mxu0 %v3267_v6  ;;  %3298 = vmatpush3.bf16.msra.mxu1 %v3295_v38 }
 0x638   : > { %3300 = vmatprep.subr.bf16.mxu1 %v3299_v14 }
 0x63a   : > { %3270 = vmatpush3.bf16.msra.mxu0 %v3267_v6 }
 0x63b   : > { %3272 = vmatprep.subr.bf16.mxu0 %v3271_v27  ;;  %3302 = vmatpush3.bf16.msra.mxu1 %v3299_v14 }
 0x63c   : > { %3304 = vmatprep.subr.bf16.mxu1 %v3303_v29 }
 0x63e   : > { %3274 = vmatpush3.bf16.msra.mxu0 %v3271_v27 }
 0x63f   : > { %3276 = vmatprep.subr.bf16.mxu0 %v3275_v34  ;;  %3306 = vmatpush3.bf16.msra.mxu1 %v3303_v29 }
 0x640   : > { %3308 = vmatprep.subr.bf16.mxu1 %v3307_v48 }
 0x642   : > { %3278 = vmatpush3.bf16.msra.mxu0 %v3275_v34 }
 0x643   : > { %3310 = vmatpush3.bf16.msra.mxu1 %v3307_v48 }
 0x645   : > { %3032 = vmatmul.mubr.f32.vlgmr.msra.gmra.mrb[0].mxu0 %v2132_v45 }
 0x646   : > { %3034 = vmatprep.mubr.f32.mxu0 %v2133_v40 }
 0x649   : > { %3035 = vmatmul.mubr.f32.gmra.mrb[2].mxu0 %v2134_v46 }
 0x64a   : > { %3037 = vmatprep.mubr.f32.mxu0 %v2135_v8 }
 0x64d   : > { %3038 = vmatmul.mubr.f32.gmra.mrb[4].mxu0 %v2136_v2 }
 0x64e   : > { %3040 = vmatprep.mubr.f32.mxu0 %v2137_v13 }
 0x651   : > { %3041 = vmatmul.mubr.f32.gmra.mrb[6].mxu0 %v2138_v62 }
 0x718   : > { %v3033_v61 = vpop.f32.mrb[0].mxu0 }
 0x719   : > { %v5502_v17 = vadd.f32 %v3033_v61, %v2869_v37  ;;  %v2228_v9 = vpop.f32.mrb[1].mxu0 }
 0x71a   : > { %v5504_v47 = vadd.f32 %v2869_v37, %v2228_v9 }
 0x71b   : > { %v2268_v35 = vmin.f32 %v5502_v17, 15.0  ;;  %vm2308_vm13 = vcmp.gt.f32.partialorder %v5502_v17, 15.0 }
 0x71c   : > { %v2267_v36 = vmin.f32 %v5504_v47, 15.0  ;;  %v3036_v51 = vpop.f32.mrb[2].mxu0  ;;  %vm2307_vm12 = vcmp.gt.f32.partialorder %v5504_v47, 15.0 }
 0x71d   : > { %v2277_v18 = vmul.f32 1.442695, %v2268_v35  ;;  %v5508_v21 = vadd.f32 %v3036_v51, %v2869_v37  ;;  %v2238_v22 = vpop.f32.mrb[3].mxu0 }
 0x71e   : > { %v2275_v6 = vmul.f32 1.442695, %v2267_v36  ;;  %v5510_v49 = vadd.f32 %v2869_v37, %v2238_v22 }
 0x71f   : > { %3640 = vpow2.f32 %v2277_v18  ;;  %v2270_v50 = vmin.f32 %v5508_v21, 15.0  ;;  %vm2310_vm15 = vcmp.gt.f32.partialorder %v5508_v21, 15.0 }
 0x720   : > { %3642 = vpow2.f32 %v2275_v6  ;;  %v2269_v27 = vmin.f32 %v5510_v49, 15.0  ;;  %v3039_v28 = vpop.f32.mrb[4].mxu0  ;;  %vm2309_vm14 = vcmp.gt.f32.partialorder %v5510_v49, 15.0 }
 0x721   : > { %v2281_v33 = vmul.f32 1.442695, %v2270_v50  ;;  %v5514_v34 = vadd.f32 %v3039_v28, %v2869_v37  ;;  %v2248_v7 = vpop.f32.mrb[5].mxu0 }
 0x722   : > { %v2279_v19 = vmul.f32 1.442695, %v2269_v27  ;;  %v5516_v45 = vadd.f32 %v2869_v37, %v2248_v7 }
 0x723   : > { %3644 = vpow2.f32 %v2281_v33  ;;  %v2272_v40 = vmin.f32 %v5514_v34, 15.0  ;;  %vm2312_vm1 = vcmp.gt.f32.partialorder %v5514_v34, 15.0 }
 0x724   : > { %3646 = vpow2.f32 %v2279_v19  ;;  %v2271_v41 = vmin.f32 %v5516_v45, 15.0  ;;  %v3042_v42 = vpop.f32.mrb[6].mxu0  ;;  %vm2311_vm0 = vcmp.gt.f32.partialorder %v5516_v45, 15.0 }
 0x725   : > { %v2285_v46 = vmul.f32 1.442695, %v2272_v40  ;;  %v5520_v8 = vadd.f32 %v3042_v42, %v2869_v37  ;;  %v2258_v55 = vpop.f32.mrb[7].mxu0 }
 0x726   : > { %v2283_v20 = vmul.f32 1.442695, %v2271_v41  ;;  %v5522_v2 = vadd.f32 %v2869_v37, %v2258_v55 }
 0x727   : > { %3648 = vpow2.f32 %v2285_v46  ;;  %v2274_v13 = vmin.f32 %v5520_v8, 15.0  ;;  %vm2314_vm3 = vcmp.gt.f32.partialorder %v5520_v8, 15.0 }
 0x728   : > { %3650 = vpow2.f32 %v2283_v20  ;;  %v2273_v52 = vmin.f32 %v5522_v2, 15.0  ;;  %vm2313_vm2 = vcmp.gt.f32.partialorder %v5522_v2, 15.0 }
 0x729   : > { %v3641_v62 = vpop.eup %3640  ;;  %v2289_v53 = vmul.f32 1.442695, %v2274_v13 }
 0x72a   : > { %v3643_v54 = vpop.eup %3642  ;;  %v2287_v3 = vmul.f32 1.442695, %v2273_v52  ;;  %v2292_v32 = vadd.f32 2.0, %v3641_v62 }
 0x72b   : > { %3652 = vpow2.f32 %v2289_v53  ;;  %v2291_v4 = vadd.f32 2.0, %v3643_v54 }
 0x72c   : > { %3654 = vpow2.f32 %v2287_v3  ;;  %v2300_v12 = vmul.f32 %v3641_v62, %v2292_v32 }
 0x72d   : > { %v3645_v24 = vpop.eup %3644  ;;  %v2299_v58 = vmul.f32 %v3643_v54, %v2291_v4 }
 0x72e   : > { %v3647_v25 = vpop.eup %3646  ;;  %v2324_v30 = vadd.f32 2.0, %v2300_v12  ;;  %v2294_v31 = vadd.f32 2.0, %v3645_v24  ;;  %v2316_v18 = vmul.f32 %v2300_v12, %v5502_v17 }
 0x72f   : > { %v2323_v23 = vadd.f32 2.0, %v2299_v58  ;;  %v2293_v59 = vadd.f32 2.0, %v3647_v25  ;;  %v2315_v50 = vmul.f32 %v2299_v58, %v5504_v47 }
 0x730   : > { %3656 = vrcp.f32 %v2324_v30  ;;  %v2302_v60 = vmul.f32 %v3645_v24, %v2294_v31 }
 0x731   : > { %v3649_v26 = vpop.eup %3648  ;;  %3658 = vrcp.f32 %v2323_v23  ;;  %v2301_v38 = vmul.f32 %v3647_v25, %v2293_v59  ;;  %v2870_v59 = vld [vmem:[#allocation4] ss:$0 sm:$0xff] }
 0x732   : > { %v3651_v63 = vpop.eup %3650  ;;  %v2326_v14 = vadd.f32 2.0, %v2302_v60  ;;  %v2296_v39 = vadd.f32 2.0, %v3649_v26  ;;  %v2318_v40 = vmul.f32 %v2302_v60, %v5508_v21 }
 0x733   : > { %v2325_v57 = vadd.f32 2.0, %v2301_v38  ;;  %v2295_v29 = vadd.f32 2.0, %v3651_v63  ;;  %v2317_v46 = vmul.f32 %v2301_v38, %v5510_v49 }
 0x734   : > { %3660 = vrcp.f32 %v2326_v14  ;;  %v2304_v5 = vmul.f32 %v3649_v26, %v2296_v39 }
 0x735   : > { %v3653_v43 = vpop.eup %3652  ;;  %3662 = vrcp.f32 %v2325_v57  ;;  %v2303_v48 = vmul.f32 %v3651_v63, %v2295_v29 }
 0x736   : > { %v3655_v37 = vpop.eup %3654  ;;  %v2328_v61 = vadd.f32 2.0, %v2304_v5  ;;  %v2298_v9 = vadd.f32 2.0, %v3653_v43  ;;  %v2320_v62 = vmul.f32 %v2304_v5, %v5514_v34 }
 0x737   : > { %v2327_v35 = vadd.f32 2.0, %v2303_v48  ;;  %v2297_v36 = vadd.f32 2.0, %v3655_v37 }
 0x738   : > { %3664 = vrcp.f32 %v2328_v61  ;;  %v2306_v51 = vmul.f32 %v3653_v43, %v2298_v9 }
 0x739   : > { %3666 = vrcp.f32 %v2327_v35  ;;  %v2305_v22 = vmul.f32 %v3655_v37, %v2297_v36 }
 0x73a   : > { %v3657_v6 = vpop.eup %3656  ;;  %v2330_v27 = vadd.f32 2.0, %v2306_v51  ;;  %v2322_v12 = vmul.f32 %v2306_v51, %v5520_v8 }
 0x73b   : > { %v3659_v28 = vpop.eup %3658  ;;  %v2334_v33 = vmul.f32 %v3657_v6, %v2316_v18  ;;  %v2329_v7 = vadd.f32 2.0, %v2305_v22 }
 0x73c   : > { %v2332_v19 = vmul.f32 %v3659_v28, %v2315_v50  ;;  %3668 = vrcp.f32 %v2330_v27 }
 0x73d   : > { %3670 = vrcp.f32 %v2329_v7  ;;  %v2348_v20 = vsel %vm2308_vm13, %v5502_v17, %v2334_v33 }
 0x73e   : > { %v3661_v41 = vpop.eup %3660  ;;  %v2347_v42 = vsel %vm2307_vm12, %v5504_v47, %v2332_v19  ;;  %v2319_v47 = vmul.f32 %v2303_v48, %v5516_v45 }
 0x73f   : > { %v3663_v55 = vpop.eup %3662  ;;  %3075 = vmatprep.mubr.f32.mxu1 %v2347_v42  ;;  %v2338_v13 = vmul.f32 %v3661_v41, %v2318_v40 }
 0x740   : > { %3076 = vmatmul.mubr.f32.vlgmr.msra.gmra.mrb[0].mxu1 %v2348_v20  ;;  %v2336_v52 = vmul.f32 %v3663_v55, %v2317_v46 }
 0x741   : > { %v2350_v32 = vsel %vm2310_vm15, %v5508_v21, %v2338_v13 }
 0x742   : > { %v3665_v53 = vpop.eup %3664  ;;  %v2349_v54 = vsel %vm2309_vm14, %v5510_v49, %v2336_v52  ;;  %v2321_v49 = vmul.f32 %v2305_v22, %v5522_v2 }
 0x743   : > { %v3667_v3 = vpop.eup %3666  ;;  %3078 = vmatprep.mubr.f32.mxu1 %v2349_v54  ;;  %v2342_v4 = vmul.f32 %v3665_v53, %v2320_v62 }
 0x744   : > { %3079 = vmatmul.mubr.f32.gmra.mrb[2].mxu1 %v2350_v32  ;;  %v2340_v17 = vmul.f32 %v3667_v3, %v2319_v47 }
 0x745   : > { %v2352_v30 = vsel %vm2312_vm1, %v5514_v34, %v2342_v4 }
 0x746   : > { %v3669_v24 = vpop.eup %3668  ;;  %v2351_v58 = vsel %vm2311_vm0, %v5516_v45, %v2340_v17 }
 0x747   : > { %v3671_v25 = vpop.eup %3670  ;;  %3081 = vmatprep.mubr.f32.mxu1 %v2351_v58  ;;  %v2346_v31 = vmul.f32 %v3669_v24, %v2322_v12 }
 0x748   : > { %3082 = vmatmul.mubr.f32.gmra.mrb[4].mxu1 %v2352_v30  ;;  %v2344_v21 = vmul.f32 %v3671_v25, %v2321_v49 }
 0x749   : > { %v2354_v45 = vsel %vm2314_vm3, %v5520_v8, %v2346_v31 }
 0x74a   : > { %v2353_v23 = vsel %vm2313_vm2, %v5522_v2, %v2344_v21 }
 0x74b   : > { %3084 = vmatprep.mubr.f32.mxu1 %v2353_v23 }
 0x74c   : > { %3085 = vmatmul.mubr.f32.gmra.mrb[6].mxu1 %v2354_v45 }
 0x813   : > { %v3077_v60 = vpop.f32.mrb[0].mxu1 }
 0x814   : > { %v2450_v26 = vadd.f32 %v3077_v60, %v2870_v59  ;;  %v2444_v34 = vpop.f32.mrb[1].mxu1 }
 0x815   : > { %v2445_v38 = vadd.f32 %v2870_v59, %v2444_v34 }
 0x816   : > { %v2484_v63 = vmul.f32 %v2450_v26, %v5029_v1 }
 0x817   : > { %v2483_v14 = vmul.f32 %v2445_v38, %v5021_v0  ;;  %v3080_v2 = vpop.f32.mrb[2].mxu1 }
 0x818   : > { %2493 = vst.msk [vmem:[%s4966_s7 + $0x8] sm:$0xff] %vm2491_vm4, %v2484_v63  ;;  %v2460_v39 = vadd.f32 %v3080_v2, %v2870_v59  ;;  %v2454_v57 = vpop.f32.mrb[3].mxu1 }
 0x819   : > { %2492 = vst.msk [vmem:[%s4966_s7] sm:$0xff] %vm2491_vm4, %v2483_v14  ;;  %v2455_v8 = vadd.f32 %v2870_v59, %v2454_v57 }
 0x81a   : > { %v2486_v29 = vmul.f32 %v2460_v39, %v5026_v56 }
 0x81b   : > { %v2485_v5 = vmul.f32 %v2455_v8, %v5018_v44  ;;  %v3083_v43 = vpop.f32.mrb[4].mxu1 }
 0x81c   : > { %2495 = vst.msk [vmem:[%s4966_s7 + $0x18] sm:$0xff] %vm2491_vm4, %v2486_v29  ;;  %v2470_v0 = vadd.f32 %v3083_v43, %v2870_v59  ;;  %v2464_v1 = vpop.f32.mrb[5].mxu1 }
 0x81d   : > { %2494 = vst.msk [vmem:[%s4966_s7 + $0x10] sm:$0xff] %vm2491_vm4, %v2485_v5  ;;  %v2465_v48 = vadd.f32 %v2870_v59, %v2464_v1 }
 0x81e   : > { %v2488_v37 = vmul.f32 %v2470_v0, %v5040_v10 }
 0x81f   : > { %v2487_v61 = vmul.f32 %v2465_v48, %v5043_v11  ;;  %v3086_v9 = vpop.f32.mrb[6].mxu1 }
 0x820   : > { %2497 = vst.msk [vmem:[%s4966_s7 + $0x28] sm:$0xff] %vm2491_vm4, %v2488_v37  ;;  %v2480_v56 = vadd.f32 %v3086_v9, %v2870_v59  ;;  %v2474_v35 = vpop.f32.mrb[7].mxu1 }
 0x821   : > { %2496 = vst.msk [vmem:[%s4966_s7 + $0x20] sm:$0xff] %vm2491_vm4, %v2487_v61  ;;  %v2475_v44 = vadd.f32 %v2870_v59, %v2474_v35 }
 0x822   : > { %v2490_v36 = vmul.f32 %v2480_v56, %v5050_v15 }
 0x823   : > { %v2489_v51 = vmul.f32 %v2475_v44, %v5053_v16 }
 0x824   : > { %2499 = vst.msk [vmem:[%s4966_s7 + $0x38] sm:$0xff] %vm2491_vm4, %v2490_v36 }
 0x825   : > { %2498 = vst.msk [vmem:[%s4966_s7 + $0x30] sm:$0xff] %vm2491_vm4, %v2489_v51 }
 0x826 PF: > { %s46_s23 = sadd.s32 1, %s4192_s23   ;;  %s5809_s26 = sld [smem:[#allocation32_spill]] }
 0x827   : > { %p5575_p5 = scmp.ge.s32.totalorder %s46_s23, 8   ;;  %s5810_s27 = sld [smem:[#allocation33_spill]] }
 0x828   : > { %s5811_s28 = sld [smem:[#allocation44_spill]]  ;;  %s5812_s16 = sld [smem:[#allocation34_spill]] }
 0x829   : > { %s5813_s8 = sld [smem:[#allocation45_spill]]  ;;  %s5814_s30 = sld [smem:[#allocation36_spill]] }
 0x82a   : > { %s5815_s18 = sld [smem:[#allocation37_spill]]  ;;  %s5816_s7 = sld [smem:[#allocation41_spill]] }
 0x82b   : > { %s5817_s13 = sld [smem:[#allocation42_spill]]  ;;  %s5818_s29 = smov %s4160_s0 }
 0x82c   : > { %s5820_s19 = smov %s4736_s24  ;;  %s5821_s1 = smov %s4184_s21 }
 0x82d   : > { %s5822_s20 = smov %s4188_s22  ;;  %45 = sbr.rel (!%p5575_p5) target bundleno = 35 (0x23), region = 254 }
 0x82f   : > { %s5819_s0 = smov %s5813_s8 }
 0x830   : > { %s5823_s21 = smov %s5816_s7 }
 0x831   : > { %s5824_s22 = smov %s5817_s13 }
 0x834   :  { %2521 = vsyncpa [#allocation6], 1 }
 0x835   :  { %2523 = vsyncpa [#allocation6 + $0x1], 1 }
 0x836   :  { %2524 = vsyncpa [#allocation8], 1 }
 0x837   :  { %2526 = vsyncpa [#allocation8 + $0x1], 1 }
 0x838   :  { %2527 = vsyncpa [#allocation11], 1 }
 0x839   :  { %2528 = vsyncpa [#allocation14], 1 }
 0x83a   :  { %2530 = vsyncpa [#allocation14 + $0x1], 1 }
 0x83b   :  { %2531 = vsyncpa [#allocation17], 1 }
 0x83c   :  { %2533 = vsyncpa [#allocation17 + $0x1], 1 }
 0x83d   :  { %2534 = vsyncpa [#allocation20], 1 }
 0x83e   :  { %2536 = vsyncpa [#allocation20 + $0x1], 1 }
 0x83f   :  { %2537 = vsyncpa [#allocation23], 1 }

</bundles_post_ra>
